<compile_context>
chip_gen: v5e
topology: v5e:2x2
jax: 0.10.0
libtpu: 0.0.40
codegen_flags: <defaults>
</compile_context>

<pallas_src>
import functools

import jax
import jax.numpy as jnp
import numpy as np
from jax.experimental import pallas as pl
from jax.experimental.pallas import tpu as pltpu

EPS = 1e-6
NEG_INF = -1e30


# ----------------------------------------------------------------------------
# Pallas kernel: one full TransformerBlock (RMSNorm -> MHA+RoPE -> RMSNorm ->
# SwiGLU FFN, with the source module's quirk query = RMS1(RMS1(x)) preserved).
# Grid iterates over the batch; each program processes one (S, E) sequence.
# ----------------------------------------------------------------------------
def transformer_block_kernel(
    num_heads,
    x_ref, mask_ref, cos_ref, sin_ref,
    rms1_ref, rms2_ref,
    wqk_ref, bqk_ref, wv_ref, bv_ref, wo_ref, bo_ref,
    wgu_ref, wd_ref,
    o_ref,
):
    S, E = x_ref.shape[1], x_ref.shape[2]
    H = num_heads
    Dh = E // H
    half = Dh // 2
    Hid = wd_ref.shape[0]
    scale = 1.0 / (Dh ** 0.5)
    bf16 = jnp.bfloat16

    x = x_ref[0]                      # (S, E) f32
    cos = cos_ref[...]                # (S, Dh) f32
    sin = sin_ref[...]                # (S, Dh) f32

    def rmsnorm(v, w):                # f32 math, w: (1, E)
        ms = jnp.mean(v * v, axis=-1, keepdims=True)
        return v * jax.lax.rsqrt(ms + EPS) * w

    # --- TransformerBlock prologue (value = key = x, query = x at encoder level)
    vk_in = rmsnorm(x, rms1_ref[...])          # Q/K projection input  = RMS1(x)
    q_res = rmsnorm(vk_in, rms1_ref[...])      # V input + residual    = RMS1(RMS1(x))
    vk_b = vk_in.astype(bf16)
    qr_b = q_res.astype(bf16)

    # Additive attention-mask bias, computed once (0 == masked -> -inf-ish).
    mvals = mask_ref[0].astype(jnp.int32)                       # (S, S)
    bias = jnp.where(mvals == 0, NEG_INF, 0.0).astype(jnp.float32)

    # Fused projections: Q|K in one wide matmul (N = 2E), V in one (N = E).
    qk = jnp.dot(vk_b, wqk_ref[...], preferred_element_type=jnp.float32) + bqk_ref[...]
    v_all = jnp.dot(qr_b, wv_ref[...], preferred_element_type=jnp.float32) + bv_ref[...]
    q_all = qk[:, :E] * scale          # fold 1/sqrt(Dh) into q (RoPE is linear)
    k_all = qk[:, E:]

    def rope(t):                      # (S, Dh) rotate-half RoPE, f32
        rot = jnp.concatenate([-t[:, half:], t[:, :half]], axis=-1)
        return t * cos + rot * sin

    # Per-head scores/softmax/context.  Contexts are concatenated once along
    # lanes and projected with a single (S,E)x(E,E) matmul (fused out-proj).
    ctxs = []
    for h in range(H):                # static unroll (H is small here)
        lo = h * Dh
        qh = rope(q_all[:, lo:lo + Dh])
        kh = rope(k_all[:, lo:lo + Dh])
        vh = v_all[:, lo:lo + Dh]
        sc = jax.lax.dot_general(     # (S, S) = q @ k^T, bf16 MXU, f32 acc
            qh.astype(bf16), kh.astype(bf16),
            (((1,), (1,)), ((), ())),
            preferred_element_type=jnp.float32) + bias
        m = jnp.max(sc, axis=-1, keepdims=True)
        p = jnp.exp(sc - m)
        l = jnp.sum(p, axis=-1, keepdims=True)
        ctx = jnp.dot(p.astype(bf16), vh.astype(bf16),
                      preferred_element_type=jnp.float32)        # (S, Dh) un-normalized
        ctxs.append(ctx * pl.reciprocal(l, approx=True))         # EUP divide
    ctx_all = jnp.concatenate(ctxs, axis=-1).astype(bf16)        # (S, E), head-major lanes

    attn_out = (jnp.dot(ctx_all, wo_ref[...], preferred_element_type=jnp.float32)
                + bo_ref[...])

    # --- residual + RMS2 + SwiGLU FFN + residual (dropout p=0 -> identity)
    xres = rmsnorm(attn_out + q_res, rms2_ref[...])
    xres_b = xres.astype(bf16)
    gu = jnp.dot(xres_b, wgu_ref[...], preferred_element_type=jnp.float32)  # (S, 2*Hid)
    gate = gu[:, :Hid]
    up = gu[:, Hid:]
    hact = gate * (1.0 / (1.0 + jnp.exp(-gate))) * up
    ff = jnp.dot(hact.astype(bf16), wd_ref[...], preferred_element_type=jnp.float32)
    o_ref[0] = (ff + xres).astype(o_ref.dtype)


# ----------------------------------------------------------------------------
# pallas_call builder
# ----------------------------------------------------------------------------
def _tpu_vmem_cap_bytes():
    """~85% of the physical VMEM of the current generation; conservative fallback."""
    try:
        return int(0.85 * pltpu.get_tpu_info().vmem_capacity_bytes)
    except Exception:
        return 64 << 20   # v7x physical total; safe on v5e/v6e too


def _vmem_limit_bytes(S, E, Hid, H, Dh, single_buffer):
    """Explicit VMEM budget: resident weights, per-step blocks, live f32 temps."""
    f32, bf16, i8 = 4, 2, 1
    weights = bf16 * (2 * E * E + E * E + E * E + 2 * E * Hid + Hid * E)
    consts = f32 * (2 * S * Dh + 4 * E + 2 * E + E + E)   # cos/sin, rms, biases
    wbuf = 1 if single_buffer else 2
    per_step = f32 * 2 * S * E + i8 * S * S               # x block, out block, mask block
    temps = f32 * (10 * S * E + 3 * S * S + 6 * S * Dh + 4 * S * Hid)
    total = wbuf * (weights + consts) + 2 * per_step + temps + (4 << 20)
    return int(min(max(total, 16 << 20), _tpu_vmem_cap_bytes()))


def _const_spec(shape, single_buffer):
    """Constant-index block; single-buffered when supported (DMA'd once)."""
    zero = (0,) * len(shape)
    if single_buffer:
        return pl.BlockSpec(shape, lambda b: zero, pipeline_mode=pl.Buffered(1))
    return pl.BlockSpec(shape, lambda b: zero)


def _build_block_call(B, S, E, Hid, H, Dh, single_buffer):
    cs = lambda shape: _const_spec(shape, single_buffer)
    per_b = lambda shape: pl.BlockSpec(shape, lambda b: (b, 0, 0))
    kern = functools.partial(transformer_block_kernel, H)
    return pl.pallas_call(
        kern,
        out_shape=jax.ShapeDtypeStruct((B, S, E), jnp.float32),
        grid_spec=pltpu.PrefetchScalarGridSpec(
            num_scalar_prefetch=0,
            grid=(B,),
            in_specs=[
                per_b((1, S, E)),                      # x
                per_b((1, S, S)),                      # mask (int8)
                cs((S, Dh)), cs((S, Dh)),              # cos, sin
                cs((1, E)), cs((1, E)),                # rms1, rms2
                cs((E, 2 * E)), cs((1, 2 * E)),        # wqk (fused Q|K), bqk
                cs((E, E)), cs((1, E)),                # wv, bv
                cs((E, E)), cs((1, E)),                # wo, bo
                cs((E, 2 * Hid)), cs((Hid, E)),        # wgu (fused gate|up), wd
            ],
            out_specs=per_b((1, S, E)),
        ),
        compiler_params=pltpu.CompilerParams(
            dimension_semantics=("parallel",),
            vmem_limit_bytes=_vmem_limit_bytes(S, E, Hid, H, Dh, single_buffer)),
    )


_SINGLE_BUFFER_STATE = {"ok": True}


def transformer_block(x, mask_i8, cos, sin, lp, *, num_heads):
    B, S, E = x.shape
    H = num_heads
    Dh = E // H
    assert Dh * H == E and Dh % 2 == 0
    Hid = lp["wd"].shape[0]

    args = (x, mask_i8, cos, sin,
            lp["rms1"], lp["rms2"],
            lp["wqk"], lp["bqk"], lp["wv"], lp["bv"], lp["wo"], lp["bo"],
            lp["wgu"], lp["wd"])

    if _SINGLE_BUFFER_STATE["ok"]:
        try:
            return _build_block_call(B, S, E, Hid, H, Dh, True)(*args)
        except Exception:
            # pipeline_mode=pl.Buffered(1) not supported on this JAX build:
            # fall back to default double-buffered constant blocks.
            _SINGLE_BUFFER_STATE["ok"] = False
    return _build_block_call(B, S, E, Hid, H, Dh, False)(*args)


# ----------------------------------------------------------------------------
# One-time parameter packing (hoisted out of the per-call hot path).
# ----------------------------------------------------------------------------
def prepare_encoder_params(params):
    bf16 = jnp.bfloat16
    layers = []
    for p in params["layers"]:
        layers.append({
            "rms1": p["rms1"],
            "rms2": p["rms2"],
            "wqk": jnp.concatenate([p["wq"], p["wk"]], axis=1).astype(bf16),  # (E, 2E)
            "bqk": jnp.concatenate([p["bq"], p["bk"]], axis=1),               # (1, 2E)
            "wv": p["wv"].astype(bf16),
            "bv": p["bv"],
            "wo": p["wo"].astype(bf16),
            "bo": p["bo"],
            "wgu": jnp.concatenate([p["wg"], p["wu"]], axis=1).astype(bf16),  # (E, 2*Hid)
            "wd": p["wd"].astype(bf16),
        })
    return {"embedding": params["embedding"], "layers": layers}


# ----------------------------------------------------------------------------
# Encoder wrapper (embedding lookup is plain-JAX glue; per-layer hot path is
# the Pallas kernel above).
# ----------------------------------------------------------------------------
def rope_tables(seq_len, head_dim):
    half = head_dim // 2
    inv_freq = 1.0 / (10000.0 ** (jnp.arange(half, dtype=jnp.float32) * 2.0 / head_dim))
    ang = jnp.arange(seq_len, dtype=jnp.float32)[:, None] * inv_freq[None, :]
    cos = jnp.concatenate([jnp.cos(ang), jnp.cos(ang)], axis=-1)       # (S, Dh)
    sin = jnp.concatenate([jnp.sin(ang), jnp.sin(ang)], axis=-1)
    return cos, sin


def encoder_forward(enc_params, x_ids, mask, *, num_heads):
    # TODO(synk): bf16 inter-layer activations (v5e HBM win) once the accuracy
    # budget is confirmed; kept f32 to match the reference tolerance here.
    out = enc_params["embedding"][x_ids]             # (B, S, E) gather glue
    S = x_ids.shape[1]
    Dh = out.shape[-1] // num_heads
    cos, sin = rope_tables(S, Dh)
    mask_i8 = mask.astype(jnp.int8)
    for layer_p in enc_params["layers"]:
        out = transformer_block(out, mask_i8, cos, sin, layer_p, num_heads=num_heads)
    return out


# ----------------------------------------------------------------------------
# Pure-JAX reference (same math, mirrors the bf16-matmul / f32-accumulate
# precision policy) for verification.
# ----------------------------------------------------------------------------
def _rms_ref(v, w):
    return v * jax.lax.rsqrt(jnp.mean(v * v, axis=-1, keepdims=True) + EPS) * w


def _block_ref(p, x, mask, cos, sin, H):
    B, S, E = x.shape
    Dh = E // H
    bf = jnp.bfloat16

    def bdot(a, b):
        return jnp.einsum("...ij,jk->...ik", a.astype(bf), b.astype(bf),
                          preferred_element_type=jnp.float32)

    vk = _rms_ref(x, p["rms1"])
    qi = _rms_ref(vk, p["rms1"])
    q = bdot(vk, p["wq"]) + p["bq"]
    k = bdot(vk, p["wk"]) + p["bk"]
    v = bdot(qi, p["wv"]) + p["bv"]
    split = lambda t: t.reshape(B, S, H, Dh).transpose(0, 2, 1, 3)
    q, k, v = split(q), split(k), split(v)
    half = Dh // 2
    rope = lambda t: t * cos + jnp.concatenate([-t[..., half:], t[..., :half]], -1) * sin
    q, k = rope(q), rope(k)
    sc = jnp.einsum("bhqd,bhkd->bhqk", q.astype(bf), k.astype(bf),
                    preferred_element_type=jnp.float32) / (Dh ** 0.5)
    sc = jnp.where(mask[:, None] == 0, -jnp.inf, sc)
    attn = jax.nn.softmax(sc, axis=-1)
    o = jnp.einsum("bhqk,bhkd->bhqd", attn.astype(bf), v.astype(bf),
                   preferred_element_type=jnp.float32)
    o = o.transpose(0, 2, 1, 3).reshape(B, S, E)
    o = bdot(o, p["wo"]) + p["bo"]
    xres = _rms_ref(o + qi, p["rms2"])
    g = bdot(xres, p["wg"])
    u = bdot(xres, p["wu"])
    ff = bdot(g * (1.0 / (1.0 + jnp.exp(-g))) * u, p["wd"])
    return ff + xres


def encoder_ref(params, x_ids, mask, *, num_heads):
    out = params["embedding"][x_ids]
    S = x_ids.shape[1]
    Dh = out.shape[-1] // num_heads
    cos, sin = rope_tables(S, Dh)
    for layer_p in params["layers"]:
        out = _block_ref(layer_p, out, mask, cos, sin, num_heads)
    return out


# ----------------------------------------------------------------------------
# Parameter construction (deterministic, synthetic).
# ----------------------------------------------------------------------------
def init_params(key, vocab, embed, num_layers, forward_expansion):
    hid = forward_expansion * embed
    keys = jax.random.split(key, 1 + num_layers)
    params = {
        "embedding": 0.02 * jax.random.normal(keys[0], (vocab, embed), jnp.float32),
        "layers": [],
    }
    for li in range(num_layers):
        lk = jax.random.split(keys[1 + li], 8)
        s = 0.02
        layer = {
            "rms1": jnp.ones((1, embed), jnp.float32),
            "rms2": jnp.ones((1, embed), jnp.float32),
            "wq": s * jax.random.normal(lk[0], (embed, embed), jnp.float32),
            "bq": s * jax.random.normal(lk[1], (1, embed), jnp.float32),
            "wk": s * jax.random.normal(lk[2], (embed, embed), jnp.float32),
            "bk": s * jax.random.normal(lk[3], (1, embed), jnp.float32),
            "wv": s * jax.random.normal(lk[4], (embed, embed), jnp.float32),
            "bv": s * jax.random.normal(lk[5], (1, embed), jnp.float32),
            "wo": s * jax.random.normal(lk[6], (embed, embed), jnp.float32),
            "bo": jnp.zeros((1, embed), jnp.float32),
            "wg": s * jax.random.normal(jax.random.fold_in(lk[7], 0), (embed, hid), jnp.float32),
            "wu": s * jax.random.normal(jax.random.fold_in(lk[7], 1), (embed, hid), jnp.float32),
            "wd": s * jax.random.normal(jax.random.fold_in(lk[7], 2), (hid, embed), jnp.float32),
        }
        params["layers"].append(layer)
    return params


if __name__ == "__main__":
    B, S = 2, 8
    VOCAB, EMBED, HEADS, LAYERS, FWD_EXP = 50, 32, 4, 2, 2

    key = jax.random.PRNGKey(0)
    pkey, xkey = jax.random.split(key)
    params = init_params(pkey, VOCAB, EMBED, LAYERS, FWD_EXP)
    enc_params = prepare_encoder_params(params)      # one-time weight packing

    x_ids = jax.random.randint(xkey, (B, S), 0, VOCAB, dtype=jnp.int32)
    causal = jnp.tril(jnp.ones((S, S), jnp.int32))
    mask = jnp.broadcast_to(causal[None], (B, S, S))     # 0 == masked position

    out = encoder_forward(enc_params, x_ids, mask, num_heads=HEADS)
    out = jax.block_until_ready(out)

    ref = encoder_ref(params, x_ids, mask, num_heads=HEADS)
    np.testing.assert_allclose(np.asarray(out), np.asarray(ref), rtol=5e-3, atol=5e-3)

    print("KERNEL_OK")
</pallas_src>

<mosaic_0001>
module attributes {stable_mosaic.version = 11 : i64} {
  func.func @transformer_block_kernel(%arg0: i32, %arg1: memref<1x8x32xf32, #tpu.memory_space<vmem>>, %arg2: memref<1x8x8xi8, #tpu.memory_space<vmem>>, %arg3: memref<8x8xf32, #tpu.memory_space<vmem>>, %arg4: memref<8x8xf32, #tpu.memory_space<vmem>>, %arg5: memref<1x32xf32, #tpu.memory_space<vmem>>, %arg6: memref<1x32xf32, #tpu.memory_space<vmem>>, %arg7: memref<32x64xbf16, #tpu.memory_space<vmem>>, %arg8: memref<1x64xf32, #tpu.memory_space<vmem>>, %arg9: memref<32x32xbf16, #tpu.memory_space<vmem>>, %arg10: memref<1x32xf32, #tpu.memory_space<vmem>>, %arg11: memref<32x32xbf16, #tpu.memory_space<vmem>>, %arg12: memref<1x32xf32, #tpu.memory_space<vmem>>, %arg13: memref<32x128xbf16, #tpu.memory_space<vmem>>, %arg14: memref<64x32xbf16, #tpu.memory_space<vmem>>, %arg15: memref<1x8x32xf32, #tpu.memory_space<vmem>>) attributes {dimension_semantics = [#tpu.dimension_semantics<parallel>], iteration_bounds = array<i64: 2>, scalar_prefetch = 0 : i64, scratch_operands = 0 : i64, tpu.core_type = #tpu.core_type<tc>, window_params = [{transform_indices = @transform_0, window_bounds = array<i64: 1, 8, 32>}, {transform_indices = @transform_1, window_bounds = array<i64: 1, 8, 8>}, {pipeline_mode = #tpu.pipeline_mode<synchronous>, transform_indices = @transform_2, window_bounds = array<i64: 8, 8>}, {pipeline_mode = #tpu.pipeline_mode<synchronous>, transform_indices = @transform_3, window_bounds = array<i64: 8, 8>}, {pipeline_mode = #tpu.pipeline_mode<synchronous>, transform_indices = @transform_4, window_bounds = array<i64: 1, 32>}, {pipeline_mode = #tpu.pipeline_mode<synchronous>, transform_indices = @transform_5, window_bounds = array<i64: 1, 32>}, {pipeline_mode = #tpu.pipeline_mode<synchronous>, transform_indices = @transform_6, window_bounds = array<i64: 32, 64>}, {pipeline_mode = #tpu.pipeline_mode<synchronous>, transform_indices = @transform_7, window_bounds = array<i64: 1, 64>}, {pipeline_mode = #tpu.pipeline_mode<synchronous>, transform_indices = @transform_8, window_bounds = array<i64: 32, 32>}, {pipeline_mode = #tpu.pipeline_mode<synchronous>, transform_indices = @transform_9, window_bounds = array<i64: 1, 32>}, {pipeline_mode = #tpu.pipeline_mode<synchronous>, transform_indices = @transform_10, window_bounds = array<i64: 32, 32>}, {pipeline_mode = #tpu.pipeline_mode<synchronous>, transform_indices = @transform_11, window_bounds = array<i64: 1, 32>}, {pipeline_mode = #tpu.pipeline_mode<synchronous>, transform_indices = @transform_12, window_bounds = array<i64: 32, 128>}, {pipeline_mode = #tpu.pipeline_mode<synchronous>, transform_indices = @transform_13, window_bounds = array<i64: 64, 32>}, {transform_indices = @transform_14, window_bounds = array<i64: 1, 8, 32>}]} {
    %c0 = arith.constant 0 : index
    %c0_0 = arith.constant 0 : index
    %c0_1 = arith.constant 0 : index
    %0 = vector.load %arg1[%c0, %c0_0, %c0_1] : memref<1x8x32xf32, #tpu.memory_space<vmem>>, vector<1x8x32xf32>
    %1 = vector.shape_cast %0 : vector<1x8x32xf32> to vector<8x32xf32>
    %c0_2 = arith.constant 0 : index
    %c0_3 = arith.constant 0 : index
    %2 = vector.load %arg3[%c0_2, %c0_3] : memref<8x8xf32, #tpu.memory_space<vmem>>, vector<8x8xf32>
    %c0_4 = arith.constant 0 : index
    %c0_5 = arith.constant 0 : index
    %3 = vector.load %arg4[%c0_4, %c0_5] : memref<8x8xf32, #tpu.memory_space<vmem>>, vector<8x8xf32>
    %c0_6 = arith.constant 0 : index
    %c0_7 = arith.constant 0 : index
    %4 = vector.load %arg5[%c0_6, %c0_7] : memref<1x32xf32, #tpu.memory_space<vmem>>, vector<1x32xf32>
    %5 = arith.mulf %1, %1 : vector<8x32xf32>
    %cst = arith.constant dense<0.000000e+00> : vector<8xf32>
    %6 = vector.multi_reduction <add>, %5, %cst [1] : vector<8x32xf32> to vector<8xf32>
    %7 = vector.shape_cast %6 : vector<8xf32> to vector<8x1xf32>
    %cst_8 = arith.constant 3.200000e+01 : f32
    %8 = vector.broadcast %cst_8 : f32 to vector<8x1xf32>
    %9 = arith.divf %7, %8 : vector<8x1xf32>
    %cst_9 = arith.constant 9.99999997E-7 : f32
    %10 = vector.broadcast %cst_9 : f32 to vector<8x1xf32>
    %11 = arith.addf %9, %10 : vector<8x1xf32>
    %12 = math.rsqrt %11 : vector<8x1xf32>
    %13 = vector.broadcast %12 : vector<8x1xf32> to vector<8x32xf32>
    %14 = arith.mulf %1, %13 : vector<8x32xf32>
    %15 = vector.broadcast %4 : vector<1x32xf32> to vector<8x32xf32>
    %16 = arith.mulf %14, %15 : vector<8x32xf32>
    %c0_10 = arith.constant 0 : index
    %c0_11 = arith.constant 0 : index
    %17 = vector.load %arg5[%c0_10, %c0_11] : memref<1x32xf32, #tpu.memory_space<vmem>>, vector<1x32xf32>
    %18 = arith.mulf %16, %16 : vector<8x32xf32>
    %cst_12 = arith.constant dense<0.000000e+00> : vector<8xf32>
    %19 = vector.multi_reduction <add>, %18, %cst_12 [1] : vector<8x32xf32> to vector<8xf32>
    %20 = vector.shape_cast %19 : vector<8xf32> to vector<8x1xf32>
    %cst_13 = arith.constant 3.200000e+01 : f32
    %21 = vector.broadcast %cst_13 : f32 to vector<8x1xf32>
    %22 = arith.divf %20, %21 : vector<8x1xf32>
    %cst_14 = arith.constant 9.99999997E-7 : f32
    %23 = vector.broadcast %cst_14 : f32 to vector<8x1xf32>
    %24 = arith.addf %22, %23 : vector<8x1xf32>
    %25 = math.rsqrt %24 : vector<8x1xf32>
    %26 = vector.broadcast %25 : vector<8x1xf32> to vector<8x32xf32>
    %27 = arith.mulf %16, %26 : vector<8x32xf32>
    %28 = vector.broadcast %17 : vector<1x32xf32> to vector<8x32xf32>
    %29 = arith.mulf %27, %28 : vector<8x32xf32>
    %30 = arith.truncf %16 : vector<8x32xf32> to vector<8x32xbf16>
    %31 = arith.truncf %29 : vector<8x32xf32> to vector<8x32xbf16>
    %c0_15 = arith.constant 0 : index
    %c0_16 = arith.constant 0 : index
    %c0_17 = arith.constant 0 : index
    %32 = vector.load %arg2[%c0_15, %c0_16, %c0_17] : memref<1x8x8xi8, #tpu.memory_space<vmem>>, vector<1x8x8xi8>
    %33 = vector.shape_cast %32 : vector<1x8x8xi8> to vector<8x8xi8>
    %34 = arith.extsi %33 : vector<8x8xi8> to vector<8x8xi32>
    %c0_i32 = arith.constant 0 : i32
    %35 = vector.broadcast %c0_i32 : i32 to vector<8x8xi32>
    %36 = arith.cmpi eq, %34, %35 : vector<8x8xi32>
    %cst_18 = arith.constant -1.000000e+30 : f32
    %cst_19 = arith.constant 0.000000e+00 : f32
    %37 = vector.broadcast %cst_18 : f32 to vector<8x8xf32>
    %38 = vector.broadcast %cst_19 : f32 to vector<8x8xf32>
    %39 = arith.select %36, %37, %38 : vector<8x8xi1>, vector<8x8xf32>
    %c0_20 = arith.constant 0 : index
    %c0_21 = arith.constant 0 : index
    %40 = vector.load %arg7[%c0_20, %c0_21] : memref<32x64xbf16, #tpu.memory_space<vmem>>, vector<32x64xbf16>
    %cst_22 = arith.constant dense<0.000000e+00> : vector<8x64xf32>
    %41 = tpu.matmul %30, %40, %cst_22 {dimension_numbers = #tpu.dot_dimension_numbers<[1], [0], [0], [1], [0, 0, 1, 1], [], []>} : vector<8x32xbf16>, vector<32x64xbf16>, vector<8x64xf32> -> vector<8x64xf32>
    %c0_23 = arith.constant 0 : index
    %c0_24 = arith.constant 0 : index
    %42 = vector.load %arg8[%c0_23, %c0_24] : memref<1x64xf32, #tpu.memory_space<vmem>>, vector<1x64xf32>
    %43 = vector.broadcast %42 : vector<1x64xf32> to vector<8x64xf32>
    %44 = arith.addf %41, %43 : vector<8x64xf32>
    %c0_25 = arith.constant 0 : index
    %c0_26 = arith.constant 0 : index
    %45 = vector.load %arg9[%c0_25, %c0_26] : memref<32x32xbf16, #tpu.memory_space<vmem>>, vector<32x32xbf16>
    %cst_27 = arith.constant dense<0.000000e+00> : vector<8x32xf32>
    %46 = tpu.matmul %31, %45, %cst_27 {dimension_numbers = #tpu.dot_dimension_numbers<[1], [0], [0], [1], [0, 0, 1, 1], [], []>} : vector<8x32xbf16>, vector<32x32xbf16>, vector<8x32xf32> -> vector<8x32xf32>
    %c0_28 = arith.constant 0 : index
    %c0_29 = arith.constant 0 : index
    %47 = vector.load %arg10[%c0_28, %c0_29] : memref<1x32xf32, #tpu.memory_space<vmem>>, vector<1x32xf32>
    %48 = vector.broadcast %47 : vector<1x32xf32> to vector<8x32xf32>
    %49 = arith.addf %46, %48 : vector<8x32xf32>
    %50 = vector.extract_strided_slice %44 {offsets = [0, 0], sizes = [8, 32], strides = [1, 1]} : vector<8x64xf32> to vector<8x32xf32>
    %cst_30 = arith.constant 0.353553385 : f32
    %51 = vector.broadcast %cst_30 : f32 to vector<8x32xf32>
    %52 = arith.mulf %50, %51 : vector<8x32xf32>
    %53 = vector.extract_strided_slice %44 {offsets = [0, 32], sizes = [8, 32], strides = [1, 1]} : vector<8x64xf32> to vector<8x32xf32>
    %54 = vector.extract_strided_slice %52 {offsets = [0, 0], sizes = [8, 8], strides = [1, 1]} : vector<8x32xf32> to vector<8x8xf32>
    %55 = vector.extract_strided_slice %54 {offsets = [0, 4], sizes = [8, 4], strides = [1, 1]} : vector<8x8xf32> to vector<8x4xf32>
    %cst_31 = arith.constant 0.000000e+00 : f32
    %56 = vector.broadcast %cst_31 : f32 to vector<8x4xf32>
    %57 = arith.subf %56, %55 : vector<8x4xf32>
    %58 = vector.extract_strided_slice %54 {offsets = [0, 0], sizes = [8, 4], strides = [1, 1]} : vector<8x8xf32> to vector<8x4xf32>
    %59 = tpu.concatenate %57, %58 in 1 : vector<8x4xf32>, vector<8x4xf32> -> vector<8x8xf32>
    %60 = arith.mulf %54, %2 : vector<8x8xf32>
    %61 = arith.mulf %59, %3 : vector<8x8xf32>
    %62 = arith.addf %60, %61 : vector<8x8xf32>
    %63 = vector.extract_strided_slice %53 {offsets = [0, 0], sizes = [8, 8], strides = [1, 1]} : vector<8x32xf32> to vector<8x8xf32>
    %64 = vector.extract_strided_slice %63 {offsets = [0, 4], sizes = [8, 4], strides = [1, 1]} : vector<8x8xf32> to vector<8x4xf32>
    %cst_32 = arith.constant 0.000000e+00 : f32
    %65 = vector.broadcast %cst_32 : f32 to vector<8x4xf32>
    %66 = arith.subf %65, %64 : vector<8x4xf32>
    %67 = vector.extract_strided_slice %63 {offsets = [0, 0], sizes = [8, 4], strides = [1, 1]} : vector<8x8xf32> to vector<8x4xf32>
    %68 = tpu.concatenate %66, %67 in 1 : vector<8x4xf32>, vector<8x4xf32> -> vector<8x8xf32>
    %69 = arith.mulf %63, %2 : vector<8x8xf32>
    %70 = arith.mulf %68, %3 : vector<8x8xf32>
    %71 = arith.addf %69, %70 : vector<8x8xf32>
    %72 = vector.extract_strided_slice %49 {offsets = [0, 0], sizes = [8, 8], strides = [1, 1]} : vector<8x32xf32> to vector<8x8xf32>
    %73 = arith.truncf %62 : vector<8x8xf32> to vector<8x8xbf16>
    %74 = arith.truncf %71 : vector<8x8xf32> to vector<8x8xbf16>
    %cst_33 = arith.constant dense<0.000000e+00> : vector<8x8xf32>
    %75 = tpu.matmul %73, %74, %cst_33 {dimension_numbers = #tpu.dot_dimension_numbers<[1], [1], [0], [0], [0, 0, 1, 0], [], []>} : vector<8x8xbf16>, vector<8x8xbf16>, vector<8x8xf32> -> vector<8x8xf32>
    %76 = arith.addf %75, %39 : vector<8x8xf32>
    %cst_34 = arith.constant dense<0xFF800000> : vector<8xf32>
    %77 = vector.multi_reduction <maximumf>, %76, %cst_34 [1] : vector<8x8xf32> to vector<8xf32>
    %78 = vector.shape_cast %77 : vector<8xf32> to vector<8x1xf32>
    %79 = vector.broadcast %78 : vector<8x1xf32> to vector<8x8xf32>
    %80 = arith.subf %76, %79 : vector<8x8xf32>
    %81 = math.exp %80 : vector<8x8xf32>
    %cst_35 = arith.constant dense<0.000000e+00> : vector<8xf32>
    %82 = vector.multi_reduction <add>, %81, %cst_35 [1] : vector<8x8xf32> to vector<8xf32>
    %83 = vector.shape_cast %82 : vector<8xf32> to vector<8x1xf32>
    %84 = arith.truncf %81 : vector<8x8xf32> to vector<8x8xbf16>
    %85 = arith.truncf %72 : vector<8x8xf32> to vector<8x8xbf16>
    %cst_36 = arith.constant dense<0.000000e+00> : vector<8x8xf32>
    %86 = tpu.matmul %84, %85, %cst_36 {dimension_numbers = #tpu.dot_dimension_numbers<[1], [0], [0], [1], [0, 0, 1, 1], [], []>} : vector<8x8xbf16>, vector<8x8xbf16>, vector<8x8xf32> -> vector<8x8xf32>
    %87 = tpu.reciprocal %83 {approx = true} : vector<8x1xf32> -> vector<8x1xf32>
    %88 = vector.broadcast %87 : vector<8x1xf32> to vector<8x8xf32>
    %89 = arith.mulf %86, %88 : vector<8x8xf32>
    %90 = vector.extract_strided_slice %52 {offsets = [0, 8], sizes = [8, 8], strides = [1, 1]} : vector<8x32xf32> to vector<8x8xf32>
    %91 = vector.extract_strided_slice %90 {offsets = [0, 4], sizes = [8, 4], strides = [1, 1]} : vector<8x8xf32> to vector<8x4xf32>
    %cst_37 = arith.constant 0.000000e+00 : f32
    %92 = vector.broadcast %cst_37 : f32 to vector<8x4xf32>
    %93 = arith.subf %92, %91 : vector<8x4xf32>
    %94 = vector.extract_strided_slice %90 {offsets = [0, 0], sizes = [8, 4], strides = [1, 1]} : vector<8x8xf32> to vector<8x4xf32>
    %95 = tpu.concatenate %93, %94 in 1 : vector<8x4xf32>, vector<8x4xf32> -> vector<8x8xf32>
    %96 = arith.mulf %90, %2 : vector<8x8xf32>
    %97 = arith.mulf %95, %3 : vector<8x8xf32>
    %98 = arith.addf %96, %97 : vector<8x8xf32>
    %99 = vector.extract_strided_slice %53 {offsets = [0, 8], sizes = [8, 8], strides = [1, 1]} : vector<8x32xf32> to vector<8x8xf32>
    %100 = vector.extract_strided_slice %99 {offsets = [0, 4], sizes = [8, 4], strides = [1, 1]} : vector<8x8xf32> to vector<8x4xf32>
    %cst_38 = arith.constant 0.000000e+00 : f32
    %101 = vector.broadcast %cst_38 : f32 to vector<8x4xf32>
    %102 = arith.subf %101, %100 : vector<8x4xf32>
    %103 = vector.extract_strided_slice %99 {offsets = [0, 0], sizes = [8, 4], strides = [1, 1]} : vector<8x8xf32> to vector<8x4xf32>
    %104 = tpu.concatenate %102, %103 in 1 : vector<8x4xf32>, vector<8x4xf32> -> vector<8x8xf32>
    %105 = arith.mulf %99, %2 : vector<8x8xf32>
    %106 = arith.mulf %104, %3 : vector<8x8xf32>
    %107 = arith.addf %105, %106 : vector<8x8xf32>
    %108 = vector.extract_strided_slice %49 {offsets = [0, 8], sizes = [8, 8], strides = [1, 1]} : vector<8x32xf32> to vector<8x8xf32>
    %109 = arith.truncf %98 : vector<8x8xf32> to vector<8x8xbf16>
    %110 = arith.truncf %107 : vector<8x8xf32> to vector<8x8xbf16>
    %cst_39 = arith.constant dense<0.000000e+00> : vector<8x8xf32>
    %111 = tpu.matmul %109, %110, %cst_39 {dimension_numbers = #tpu.dot_dimension_numbers<[1], [1], [0], [0], [0, 0, 1, 0], [], []>} : vector<8x8xbf16>, vector<8x8xbf16>, vector<8x8xf32> -> vector<8x8xf32>
    %112 = arith.addf %111, %39 : vector<8x8xf32>
    %cst_40 = arith.constant dense<0xFF800000> : vector<8xf32>
    %113 = vector.multi_reduction <maximumf>, %112, %cst_40 [1] : vector<8x8xf32> to vector<8xf32>
    %114 = vector.shape_cast %113 : vector<8xf32> to vector<8x1xf32>
    %115 = vector.broadcast %114 : vector<8x1xf32> to vector<8x8xf32>
    %116 = arith.subf %112, %115 : vector<8x8xf32>
    %117 = math.exp %116 : vector<8x8xf32>
    %cst_41 = arith.constant dense<0.000000e+00> : vector<8xf32>
    %118 = vector.multi_reduction <add>, %117, %cst_41 [1] : vector<8x8xf32> to vector<8xf32>
    %119 = vector.shape_cast %118 : vector<8xf32> to vector<8x1xf32>
    %120 = arith.truncf %117 : vector<8x8xf32> to vector<8x8xbf16>
    %121 = arith.truncf %108 : vector<8x8xf32> to vector<8x8xbf16>
    %cst_42 = arith.constant dense<0.000000e+00> : vector<8x8xf32>
    %122 = tpu.matmul %120, %121, %cst_42 {dimension_numbers = #tpu.dot_dimension_numbers<[1], [0], [0], [1], [0, 0, 1, 1], [], []>} : vector<8x8xbf16>, vector<8x8xbf16>, vector<8x8xf32> -> vector<8x8xf32>
    %123 = tpu.reciprocal %119 {approx = true} : vector<8x1xf32> -> vector<8x1xf32>
    %124 = vector.broadcast %123 : vector<8x1xf32> to vector<8x8xf32>
    %125 = arith.mulf %122, %124 : vector<8x8xf32>
    %126 = vector.extract_strided_slice %52 {offsets = [0, 16], sizes = [8, 8], strides = [1, 1]} : vector<8x32xf32> to vector<8x8xf32>
    %127 = vector.extract_strided_slice %126 {offsets = [0, 4], sizes = [8, 4], strides = [1, 1]} : vector<8x8xf32> to vector<8x4xf32>
    %cst_43 = arith.constant 0.000000e+00 : f32
    %128 = vector.broadcast %cst_43 : f32 to vector<8x4xf32>
    %129 = arith.subf %128, %127 : vector<8x4xf32>
    %130 = vector.extract_strided_slice %126 {offsets = [0, 0], sizes = [8, 4], strides = [1, 1]} : vector<8x8xf32> to vector<8x4xf32>
    %131 = tpu.concatenate %129, %130 in 1 : vector<8x4xf32>, vector<8x4xf32> -> vector<8x8xf32>
    %132 = arith.mulf %126, %2 : vector<8x8xf32>
    %133 = arith.mulf %131, %3 : vector<8x8xf32>
    %134 = arith.addf %132, %133 : vector<8x8xf32>
    %135 = vector.extract_strided_slice %53 {offsets = [0, 16], sizes = [8, 8], strides = [1, 1]} : vector<8x32xf32> to vector<8x8xf32>
    %136 = vector.extract_strided_slice %135 {offsets = [0, 4], sizes = [8, 4], strides = [1, 1]} : vector<8x8xf32> to vector<8x4xf32>
    %cst_44 = arith.constant 0.000000e+00 : f32
    %137 = vector.broadcast %cst_44 : f32 to vector<8x4xf32>
    %138 = arith.subf %137, %136 : vector<8x4xf32>
    %139 = vector.extract_strided_slice %135 {offsets = [0, 0], sizes = [8, 4], strides = [1, 1]} : vector<8x8xf32> to vector<8x4xf32>
    %140 = tpu.concatenate %138, %139 in 1 : vector<8x4xf32>, vector<8x4xf32> -> vector<8x8xf32>
    %141 = arith.mulf %135, %2 : vector<8x8xf32>
    %142 = arith.mulf %140, %3 : vector<8x8xf32>
    %143 = arith.addf %141, %142 : vector<8x8xf32>
    %144 = vector.extract_strided_slice %49 {offsets = [0, 16], sizes = [8, 8], strides = [1, 1]} : vector<8x32xf32> to vector<8x8xf32>
    %145 = arith.truncf %134 : vector<8x8xf32> to vector<8x8xbf16>
    %146 = arith.truncf %143 : vector<8x8xf32> to vector<8x8xbf16>
    %cst_45 = arith.constant dense<0.000000e+00> : vector<8x8xf32>
    %147 = tpu.matmul %145, %146, %cst_45 {dimension_numbers = #tpu.dot_dimension_numbers<[1], [1], [0], [0], [0, 0, 1, 0], [], []>} : vector<8x8xbf16>, vector<8x8xbf16>, vector<8x8xf32> -> vector<8x8xf32>
    %148 = arith.addf %147, %39 : vector<8x8xf32>
    %cst_46 = arith.constant dense<0xFF800000> : vector<8xf32>
    %149 = vector.multi_reduction <maximumf>, %148, %cst_46 [1] : vector<8x8xf32> to vector<8xf32>
    %150 = vector.shape_cast %149 : vector<8xf32> to vector<8x1xf32>
    %151 = vector.broadcast %150 : vector<8x1xf32> to vector<8x8xf32>
    %152 = arith.subf %148, %151 : vector<8x8xf32>
    %153 = math.exp %152 : vector<8x8xf32>
    %cst_47 = arith.constant dense<0.000000e+00> : vector<8xf32>
    %154 = vector.multi_reduction <add>, %153, %cst_47 [1] : vector<8x8xf32> to vector<8xf32>
    %155 = vector.shape_cast %154 : vector<8xf32> to vector<8x1xf32>
    %156 = arith.truncf %153 : vector<8x8xf32> to vector<8x8xbf16>
    %157 = arith.truncf %144 : vector<8x8xf32> to vector<8x8xbf16>
    %cst_48 = arith.constant dense<0.000000e+00> : vector<8x8xf32>
    %158 = tpu.matmul %156, %157, %cst_48 {dimension_numbers = #tpu.dot_dimension_numbers<[1], [0], [0], [1], [0, 0, 1, 1], [], []>} : vector<8x8xbf16>, vector<8x8xbf16>, vector<8x8xf32> -> vector<8x8xf32>
    %159 = tpu.reciprocal %155 {approx = true} : vector<8x1xf32> -> vector<8x1xf32>
    %160 = vector.broadcast %159 : vector<8x1xf32> to vector<8x8xf32>
    %161 = arith.mulf %158, %160 : vector<8x8xf32>
    %162 = vector.extract_strided_slice %52 {offsets = [0, 24], sizes = [8, 8], strides = [1, 1]} : vector<8x32xf32> to vector<8x8xf32>
    %163 = vector.extract_strided_slice %162 {offsets = [0, 4], sizes = [8, 4], strides = [1, 1]} : vector<8x8xf32> to vector<8x4xf32>
    %cst_49 = arith.constant 0.000000e+00 : f32
    %164 = vector.broadcast %cst_49 : f32 to vector<8x4xf32>
    %165 = arith.subf %164, %163 : vector<8x4xf32>
    %166 = vector.extract_strided_slice %162 {offsets = [0, 0], sizes = [8, 4], strides = [1, 1]} : vector<8x8xf32> to vector<8x4xf32>
    %167 = tpu.concatenate %165, %166 in 1 : vector<8x4xf32>, vector<8x4xf32> -> vector<8x8xf32>
    %168 = arith.mulf %162, %2 : vector<8x8xf32>
    %169 = arith.mulf %167, %3 : vector<8x8xf32>
    %170 = arith.addf %168, %169 : vector<8x8xf32>
    %171 = vector.extract_strided_slice %53 {offsets = [0, 24], sizes = [8, 8], strides = [1, 1]} : vector<8x32xf32> to vector<8x8xf32>
    %172 = vector.extract_strided_slice %171 {offsets = [0, 4], sizes = [8, 4], strides = [1, 1]} : vector<8x8xf32> to vector<8x4xf32>
    %cst_50 = arith.constant 0.000000e+00 : f32
    %173 = vector.broadcast %cst_50 : f32 to vector<8x4xf32>
    %174 = arith.subf %173, %172 : vector<8x4xf32>
    %175 = vector.extract_strided_slice %171 {offsets = [0, 0], sizes = [8, 4], strides = [1, 1]} : vector<8x8xf32> to vector<8x4xf32>
    %176 = tpu.concatenate %174, %175 in 1 : vector<8x4xf32>, vector<8x4xf32> -> vector<8x8xf32>
    %177 = arith.mulf %171, %2 : vector<8x8xf32>
    %178 = arith.mulf %176, %3 : vector<8x8xf32>
    %179 = arith.addf %177, %178 : vector<8x8xf32>
    %180 = vector.extract_strided_slice %49 {offsets = [0, 24], sizes = [8, 8], strides = [1, 1]} : vector<8x32xf32> to vector<8x8xf32>
    %181 = arith.truncf %170 : vector<8x8xf32> to vector<8x8xbf16>
    %182 = arith.truncf %179 : vector<8x8xf32> to vector<8x8xbf16>
    %cst_51 = arith.constant dense<0.000000e+00> : vector<8x8xf32>
    %183 = tpu.matmul %181, %182, %cst_51 {dimension_numbers = #tpu.dot_dimension_numbers<[1], [1], [0], [0], [0, 0, 1, 0], [], []>} : vector<8x8xbf16>, vector<8x8xbf16>, vector<8x8xf32> -> vector<8x8xf32>
    %184 = arith.addf %183, %39 : vector<8x8xf32>
    %cst_52 = arith.constant dense<0xFF800000> : vector<8xf32>
    %185 = vector.multi_reduction <maximumf>, %184, %cst_52 [1] : vector<8x8xf32> to vector<8xf32>
    %186 = vector.shape_cast %185 : vector<8xf32> to vector<8x1xf32>
    %187 = vector.broadcast %186 : vector<8x1xf32> to vector<8x8xf32>
    %188 = arith.subf %184, %187 : vector<8x8xf32>
    %189 = math.exp %188 : vector<8x8xf32>
    %cst_53 = arith.constant dense<0.000000e+00> : vector<8xf32>
    %190 = vector.multi_reduction <add>, %189, %cst_53 [1] : vector<8x8xf32> to vector<8xf32>
    %191 = vector.shape_cast %190 : vector<8xf32> to vector<8x1xf32>
    %192 = arith.truncf %189 : vector<8x8xf32> to vector<8x8xbf16>
    %193 = arith.truncf %180 : vector<8x8xf32> to vector<8x8xbf16>
    %cst_54 = arith.constant dense<0.000000e+00> : vector<8x8xf32>
    %194 = tpu.matmul %192, %193, %cst_54 {dimension_numbers = #tpu.dot_dimension_numbers<[1], [0], [0], [1], [0, 0, 1, 1], [], []>} : vector<8x8xbf16>, vector<8x8xbf16>, vector<8x8xf32> -> vector<8x8xf32>
    %195 = tpu.reciprocal %191 {approx = true} : vector<8x1xf32> -> vector<8x1xf32>
    %196 = vector.broadcast %195 : vector<8x1xf32> to vector<8x8xf32>
    %197 = arith.mulf %194, %196 : vector<8x8xf32>
    %198 = tpu.concatenate %89, %125, %161, %197 in 1 : vector<8x8xf32>, vector<8x8xf32>, vector<8x8xf32>, vector<8x8xf32> -> vector<8x32xf32>
    %199 = arith.truncf %198 : vector<8x32xf32> to vector<8x32xbf16>
    %c0_55 = arith.constant 0 : index
    %c0_56 = arith.constant 0 : index
    %200 = vector.load %arg11[%c0_55, %c0_56] : memref<32x32xbf16, #tpu.memory_space<vmem>>, vector<32x32xbf16>
    %cst_57 = arith.constant dense<0.000000e+00> : vector<8x32xf32>
    %201 = tpu.matmul %199, %200, %cst_57 {dimension_numbers = #tpu.dot_dimension_numbers<[1], [0], [0], [1], [0, 0, 1, 1], [], []>} : vector<8x32xbf16>, vector<32x32xbf16>, vector<8x32xf32> -> vector<8x32xf32>
    %c0_58 = arith.constant 0 : index
    %c0_59 = arith.constant 0 : index
    %202 = vector.load %arg12[%c0_58, %c0_59] : memref<1x32xf32, #tpu.memory_space<vmem>>, vector<1x32xf32>
    %203 = vector.broadcast %202 : vector<1x32xf32> to vector<8x32xf32>
    %204 = arith.addf %201, %203 : vector<8x32xf32>
    %205 = arith.addf %204, %29 : vector<8x32xf32>
    %c0_60 = arith.constant 0 : index
    %c0_61 = arith.constant 0 : index
    %206 = vector.load %arg6[%c0_60, %c0_61] : memref<1x32xf32, #tpu.memory_space<vmem>>, vector<1x32xf32>
    %207 = arith.mulf %205, %205 : vector<8x32xf32>
    %cst_62 = arith.constant dense<0.000000e+00> : vector<8xf32>
    %208 = vector.multi_reduction <add>, %207, %cst_62 [1] : vector<8x32xf32> to vector<8xf32>
    %209 = vector.shape_cast %208 : vector<8xf32> to vector<8x1xf32>
    %cst_63 = arith.constant 3.200000e+01 : f32
    %210 = vector.broadcast %cst_63 : f32 to vector<8x1xf32>
    %211 = arith.divf %209, %210 : vector<8x1xf32>
    %cst_64 = arith.constant 9.99999997E-7 : f32
    %212 = vector.broadcast %cst_64 : f32 to vector<8x1xf32>
    %213 = arith.addf %211, %212 : vector<8x1xf32>
    %214 = math.rsqrt %213 : vector<8x1xf32>
    %215 = vector.broadcast %214 : vector<8x1xf32> to vector<8x32xf32>
    %216 = arith.mulf %205, %215 : vector<8x32xf32>
    %217 = vector.broadcast %206 : vector<1x32xf32> to vector<8x32xf32>
    %218 = arith.mulf %216, %217 : vector<8x32xf32>
    %219 = arith.truncf %218 : vector<8x32xf32> to vector<8x32xbf16>
    %c0_65 = arith.constant 0 : index
    %c0_66 = arith.constant 0 : index
    %220 = vector.load %arg13[%c0_65, %c0_66] : memref<32x128xbf16, #tpu.memory_space<vmem>>, vector<32x128xbf16>
    %cst_67 = arith.constant dense<0.000000e+00> : vector<8x128xf32>
    %221 = tpu.matmul %219, %220, %cst_67 {dimension_numbers = #tpu.dot_dimension_numbers<[1], [0], [0], [1], [0, 0, 1, 1], [], []>} : vector<8x32xbf16>, vector<32x128xbf16>, vector<8x128xf32> -> vector<8x128xf32>
    %222 = vector.extract_strided_slice %221 {offsets = [0, 0], sizes = [8, 64], strides = [1, 1]} : vector<8x128xf32> to vector<8x64xf32>
    %223 = vector.extract_strided_slice %221 {offsets = [0, 64], sizes = [8, 64], strides = [1, 1]} : vector<8x128xf32> to vector<8x64xf32>
    %cst_68 = arith.constant 0.000000e+00 : f32
    %224 = vector.broadcast %cst_68 : f32 to vector<8x64xf32>
    %225 = arith.subf %224, %222 : vector<8x64xf32>
    %226 = math.exp %225 : vector<8x64xf32>
    %cst_69 = arith.constant 1.000000e+00 : f32
    %227 = vector.broadcast %cst_69 : f32 to vector<8x64xf32>
    %228 = arith.addf %227, %226 : vector<8x64xf32>
    %cst_70 = arith.constant 1.000000e+00 : f32
    %229 = vector.broadcast %cst_70 : f32 to vector<8x64xf32>
    %230 = arith.divf %229, %228 : vector<8x64xf32>
    %231 = arith.mulf %222, %230 : vector<8x64xf32>
    %232 = arith.mulf %231, %223 : vector<8x64xf32>
    %233 = arith.truncf %232 : vector<8x64xf32> to vector<8x64xbf16>
    %c0_71 = arith.constant 0 : index
    %c0_72 = arith.constant 0 : index
    %234 = vector.load %arg14[%c0_71, %c0_72] : memref<64x32xbf16, #tpu.memory_space<vmem>>, vector<64x32xbf16>
    %cst_73 = arith.constant dense<0.000000e+00> : vector<8x32xf32>
    %235 = tpu.matmul %233, %234, %cst_73 {dimension_numbers = #tpu.dot_dimension_numbers<[1], [0], [0], [1], [0, 0, 1, 1], [], []>} : vector<8x64xbf16>, vector<64x32xbf16>, vector<8x32xf32> -> vector<8x32xf32>
    %236 = arith.addf %235, %218 : vector<8x32xf32>
    %c0_74 = arith.constant 0 : index
    %c0_75 = arith.constant 0 : index
    %c0_76 = arith.constant 0 : index
    %237 = vector.load %arg15[%c0_74, %c0_75, %c0_76] : memref<1x8x32xf32, #tpu.memory_space<vmem>>, vector<1x8x32xf32>
    %238 = vector.shape_cast %237 : vector<1x8x32xf32> to vector<8x32xf32>
    %239 = vector.shape_cast %236 : vector<8x32xf32> to vector<1x8x32xf32>
    tpu.vector_store %arg15[%c0_74, %c0_75, %c0_76], %239 {strides = array<i32>} : memref<1x8x32xf32, #tpu.memory_space<vmem>>, vector<1x8x32xf32>,
    return
  }
  func.func @transform_0(%arg0: i32) -> (i32, i32, i32) {
    %c0_i32 = arith.constant 0 : i32
    %c0_i32_0 = arith.constant 0 : i32
    %c0_i32_1 = arith.constant 0 : i32
    return %arg0, %c0_i32, %c0_i32_0 : i32, i32, i32
  }
  func.func @transform_1(%arg0: i32) -> (i32, i32, i32) {
    %c0_i32 = arith.constant 0 : i32
    %c0_i32_0 = arith.constant 0 : i32
    %c0_i32_1 = arith.constant 0 : i32
    return %arg0, %c0_i32, %c0_i32_0 : i32, i32, i32
  }
  func.func @transform_2(%arg0: i32) -> (i32, i32) {
    %c0_i32 = arith.constant 0 : i32
    %c0_i32_0 = arith.constant 0 : i32
    %c0_i32_1 = arith.constant 0 : i32
    return %c0_i32, %c0_i32_0 : i32, i32
  }
  func.func @transform_3(%arg0: i32) -> (i32, i32) {
    %c0_i32 = arith.constant 0 : i32
    %c0_i32_0 = arith.constant 0 : i32
    %c0_i32_1 = arith.constant 0 : i32
    return %c0_i32, %c0_i32_0 : i32, i32
  }
  func.func @transform_4(%arg0: i32) -> (i32, i32) {
    %c0_i32 = arith.constant 0 : i32
    %c0_i32_0 = arith.constant 0 : i32
    %c0_i32_1 = arith.constant 0 : i32
    return %c0_i32, %c0_i32_0 : i32, i32
  }
  func.func @transform_5(%arg0: i32) -> (i32, i32) {
    %c0_i32 = arith.constant 0 : i32
    %c0_i32_0 = arith.constant 0 : i32
    %c0_i32_1 = arith.constant 0 : i32
    return %c0_i32, %c0_i32_0 : i32, i32
  }
  func.func @transform_6(%arg0: i32) -> (i32, i32) {
    %c0_i32 = arith.constant 0 : i32
    %c0_i32_0 = arith.constant 0 : i32
    %c0_i32_1 = arith.constant 0 : i32
    return %c0_i32, %c0_i32_0 : i32, i32
  }
  func.func @transform_7(%arg0: i32) -> (i32, i32) {
    %c0_i32 = arith.constant 0 : i32
    %c0_i32_0 = arith.constant 0 : i32
    %c0_i32_1 = arith.constant 0 : i32
    return %c0_i32, %c0_i32_0 : i32, i32
  }
  func.func @transform_8(%arg0: i32) -> (i32, i32) {
    %c0_i32 = arith.constant 0 : i32
    %c0_i32_0 = arith.constant 0 : i32
    %c0_i32_1 = arith.constant 0 : i32
    return %c0_i32, %c0_i32_0 : i32, i32
  }
  func.func @transform_9(%arg0: i32) -> (i32, i32) {
    %c0_i32 = arith.constant 0 : i32
    %c0_i32_0 = arith.constant 0 : i32
    %c0_i32_1 = arith.constant 0 : i32
    return %c0_i32, %c0_i32_0 : i32, i32
  }
  func.func @transform_10(%arg0: i32) -> (i32, i32) {
    %c0_i32 = arith.constant 0 : i32
    %c0_i32_0 = arith.constant 0 : i32
    %c0_i32_1 = arith.constant 0 : i32
    return %c0_i32, %c0_i32_0 : i32, i32
  }
  func.func @transform_11(%arg0: i32) -> (i32, i32) {
    %c0_i32 = arith.constant 0 : i32
    %c0_i32_0 = arith.constant 0 : i32
    %c0_i32_1 = arith.constant 0 : i32
    return %c0_i32, %c0_i32_0 : i32, i32
  }
  func.func @transform_12(%arg0: i32) -> (i32, i32) {
    %c0_i32 = arith.constant 0 : i32
    %c0_i32_0 = arith.constant 0 : i32
    %c0_i32_1 = arith.constant 0 : i32
    return %c0_i32, %c0_i32_0 : i32, i32
  }
  func.func @transform_13(%arg0: i32) -> (i32, i32) {
    %c0_i32 = arith.constant 0 : i32
    %c0_i32_0 = arith.constant 0 : i32
    %c0_i32_1 = arith.constant 0 : i32
    return %c0_i32, %c0_i32_0 : i32, i32
  }
  func.func @transform_14(%arg0: i32) -> (i32, i32, i32) {
    %c0_i32 = arith.constant 0 : i32
    %c0_i32_0 = arith.constant 0 : i32
    %c0_i32_1 = arith.constant 0 : i32
    return %arg0, %c0_i32, %c0_i32_0 : i32, i32, i32
  }
}

module attributes {stable_mosaic.version = 11 : i64} {
  func.func @transformer_block_kernel(%arg0: i32, %arg1: memref<1x8x32xf32, #tpu.memory_space<vmem>>, %arg2: memref<1x8x8xi8, #tpu.memory_space<vmem>>, %arg3: memref<8x8xf32, #tpu.memory_space<vmem>>, %arg4: memref<8x8xf32, #tpu.memory_space<vmem>>, %arg5: memref<1x32xf32, #tpu.memory_space<vmem>>, %arg6: memref<1x32xf32, #tpu.memory_space<vmem>>, %arg7: memref<32x64xbf16, #tpu.memory_space<vmem>>, %arg8: memref<1x64xf32, #tpu.memory_space<vmem>>, %arg9: memref<32x32xbf16, #tpu.memory_space<vmem>>, %arg10: memref<1x32xf32, #tpu.memory_space<vmem>>, %arg11: memref<32x32xbf16, #tpu.memory_space<vmem>>, %arg12: memref<1x32xf32, #tpu.memory_space<vmem>>, %arg13: memref<32x128xbf16, #tpu.memory_space<vmem>>, %arg14: memref<64x32xbf16, #tpu.memory_space<vmem>>, %arg15: memref<1x8x32xf32, #tpu.memory_space<vmem>>) attributes {dimension_semantics = [#tpu.dimension_semantics<parallel>], iteration_bounds = array<i64: 2>, scalar_prefetch = 0 : i64, scratch_operands = 0 : i64, tpu.core_type = #tpu.core_type<tc>, window_params = [{transform_indices = @transform_0, window_bounds = array<i64: 1, 8, 32>}, {transform_indices = @transform_1, window_bounds = array<i64: 1, 8, 8>}, {pipeline_mode = #tpu.pipeline_mode<synchronous>, transform_indices = @transform_2, window_bounds = array<i64: 8, 8>}, {pipeline_mode = #tpu.pipeline_mode<synchronous>, transform_indices = @transform_3, window_bounds = array<i64: 8, 8>}, {pipeline_mode = #tpu.pipeline_mode<synchronous>, transform_indices = @transform_4, window_bounds = array<i64: 1, 32>}, {pipeline_mode = #tpu.pipeline_mode<synchronous>, transform_indices = @transform_5, window_bounds = array<i64: 1, 32>}, {pipeline_mode = #tpu.pipeline_mode<synchronous>, transform_indices = @transform_6, window_bounds = array<i64: 32, 64>}, {pipeline_mode = #tpu.pipeline_mode<synchronous>, transform_indices = @transform_7, window_bounds = array<i64: 1, 64>}, {pipeline_mode = #tpu.pipeline_mode<synchronous>, transform_indices = @transform_8, window_bounds = array<i64: 32, 32>}, {pipeline_mode = #tpu.pipeline_mode<synchronous>, transform_indices = @transform_9, window_bounds = array<i64: 1, 32>}, {pipeline_mode = #tpu.pipeline_mode<synchronous>, transform_indices = @transform_10, window_bounds = array<i64: 32, 32>}, {pipeline_mode = #tpu.pipeline_mode<synchronous>, transform_indices = @transform_11, window_bounds = array<i64: 1, 32>}, {pipeline_mode = #tpu.pipeline_mode<synchronous>, transform_indices = @transform_12, window_bounds = array<i64: 32, 128>}, {pipeline_mode = #tpu.pipeline_mode<synchronous>, transform_indices = @transform_13, window_bounds = array<i64: 64, 32>}, {transform_indices = @transform_14, window_bounds = array<i64: 1, 8, 32>}]} {
    %c0 = arith.constant 0 : index
    %c0_0 = arith.constant 0 : index
    %c0_1 = arith.constant 0 : index
    %0 = vector.load %arg1[%c0, %c0_0, %c0_1] : memref<1x8x32xf32, #tpu.memory_space<vmem>>, vector<1x8x32xf32>
    %1 = vector.shape_cast %0 : vector<1x8x32xf32> to vector<8x32xf32>
    %c0_2 = arith.constant 0 : index
    %c0_3 = arith.constant 0 : index
    %2 = vector.load %arg3[%c0_2, %c0_3] : memref<8x8xf32, #tpu.memory_space<vmem>>, vector<8x8xf32>
    %c0_4 = arith.constant 0 : index
    %c0_5 = arith.constant 0 : index
    %3 = vector.load %arg4[%c0_4, %c0_5] : memref<8x8xf32, #tpu.memory_space<vmem>>, vector<8x8xf32>
    %c0_6 = arith.constant 0 : index
    %c0_7 = arith.constant 0 : index
    %4 = vector.load %arg5[%c0_6, %c0_7] : memref<1x32xf32, #tpu.memory_space<vmem>>, vector<1x32xf32>
    %5 = arith.mulf %1, %1 : vector<8x32xf32>
    %cst = arith.constant dense<0.000000e+00> : vector<8xf32>
    %6 = vector.multi_reduction <add>, %5, %cst [1] : vector<8x32xf32> to vector<8xf32>
    %7 = vector.shape_cast %6 : vector<8xf32> to vector<8x1xf32>
    %cst_8 = arith.constant 3.200000e+01 : f32
    %8 = vector.broadcast %cst_8 : f32 to vector<8x1xf32>
    %9 = arith.divf %7, %8 : vector<8x1xf32>
    %cst_9 = arith.constant 9.99999997E-7 : f32
    %10 = vector.broadcast %cst_9 : f32 to vector<8x1xf32>
    %11 = arith.addf %9, %10 : vector<8x1xf32>
    %12 = math.rsqrt %11 : vector<8x1xf32>
    %13 = vector.broadcast %12 : vector<8x1xf32> to vector<8x32xf32>
    %14 = arith.mulf %1, %13 : vector<8x32xf32>
    %15 = vector.broadcast %4 : vector<1x32xf32> to vector<8x32xf32>
    %16 = arith.mulf %14, %15 : vector<8x32xf32>
    %c0_10 = arith.constant 0 : index
    %c0_11 = arith.constant 0 : index
    %17 = vector.load %arg5[%c0_10, %c0_11] : memref<1x32xf32, #tpu.memory_space<vmem>>, vector<1x32xf32>
    %18 = arith.mulf %16, %16 : vector<8x32xf32>
    %cst_12 = arith.constant dense<0.000000e+00> : vector<8xf32>
    %19 = vector.multi_reduction <add>, %18, %cst_12 [1] : vector<8x32xf32> to vector<8xf32>
    %20 = vector.shape_cast %19 : vector<8xf32> to vector<8x1xf32>
    %cst_13 = arith.constant 3.200000e+01 : f32
    %21 = vector.broadcast %cst_13 : f32 to vector<8x1xf32>
    %22 = arith.divf %20, %21 : vector<8x1xf32>
    %cst_14 = arith.constant 9.99999997E-7 : f32
    %23 = vector.broadcast %cst_14 : f32 to vector<8x1xf32>
    %24 = arith.addf %22, %23 : vector<8x1xf32>
    %25 = math.rsqrt %24 : vector<8x1xf32>
    %26 = vector.broadcast %25 : vector<8x1xf32> to vector<8x32xf32>
    %27 = arith.mulf %16, %26 : vector<8x32xf32>
    %28 = vector.broadcast %17 : vector<1x32xf32> to vector<8x32xf32>
    %29 = arith.mulf %27, %28 : vector<8x32xf32>
    %30 = arith.truncf %16 : vector<8x32xf32> to vector<8x32xbf16>
    %31 = arith.truncf %29 : vector<8x32xf32> to vector<8x32xbf16>
    %c0_15 = arith.constant 0 : index
    %c0_16 = arith.constant 0 : index
    %c0_17 = arith.constant 0 : index
    %32 = vector.load %arg2[%c0_15, %c0_16, %c0_17] : memref<1x8x8xi8, #tpu.memory_space<vmem>>, vector<1x8x8xi8>
    %33 = vector.shape_cast %32 : vector<1x8x8xi8> to vector<8x8xi8>
    %34 = arith.extsi %33 : vector<8x8xi8> to vector<8x8xi32>
    %c0_i32 = arith.constant 0 : i32
    %35 = vector.broadcast %c0_i32 : i32 to vector<8x8xi32>
    %36 = arith.cmpi eq, %34, %35 : vector<8x8xi32>
    %cst_18 = arith.constant -1.000000e+30 : f32
    %cst_19 = arith.constant 0.000000e+00 : f32
    %37 = vector.broadcast %cst_18 : f32 to vector<8x8xf32>
    %38 = vector.broadcast %cst_19 : f32 to vector<8x8xf32>
    %39 = arith.select %36, %37, %38 : vector<8x8xi1>, vector<8x8xf32>
    %c0_20 = arith.constant 0 : index
    %c0_21 = arith.constant 0 : index
    %40 = vector.load %arg7[%c0_20, %c0_21] : memref<32x64xbf16, #tpu.memory_space<vmem>>, vector<32x64xbf16>
    %cst_22 = arith.constant dense<0.000000e+00> : vector<8x64xf32>
    %41 = tpu.matmul %30, %40, %cst_22 {dimension_numbers = #tpu.dot_dimension_numbers<[1], [0], [0], [1], [0, 0, 1, 1], [], []>} : vector<8x32xbf16>, vector<32x64xbf16>, vector<8x64xf32> -> vector<8x64xf32>
    %c0_23 = arith.constant 0 : index
    %c0_24 = arith.constant 0 : index
    %42 = vector.load %arg8[%c0_23, %c0_24] : memref<1x64xf32, #tpu.memory_space<vmem>>, vector<1x64xf32>
    %43 = vector.broadcast %42 : vector<1x64xf32> to vector<8x64xf32>
    %44 = arith.addf %41, %43 : vector<8x64xf32>
    %c0_25 = arith.constant 0 : index
    %c0_26 = arith.constant 0 : index
    %45 = vector.load %arg9[%c0_25, %c0_26] : memref<32x32xbf16, #tpu.memory_space<vmem>>, vector<32x32xbf16>
    %cst_27 = arith.constant dense<0.000000e+00> : vector<8x32xf32>
    %46 = tpu.matmul %31, %45, %cst_27 {dimension_numbers = #tpu.dot_dimension_numbers<[1], [0], [0], [1], [0, 0, 1, 1], [], []>} : vector<8x32xbf16>, vector<32x32xbf16>, vector<8x32xf32> -> vector<8x32xf32>
    %c0_28 = arith.constant 0 : index
    %c0_29 = arith.constant 0 : index
    %47 = vector.load %arg10[%c0_28, %c0_29] : memref<1x32xf32, #tpu.memory_space<vmem>>, vector<1x32xf32>
    %48 = vector.broadcast %47 : vector<1x32xf32> to vector<8x32xf32>
    %49 = arith.addf %46, %48 : vector<8x32xf32>
    %50 = vector.extract_strided_slice %44 {offsets = [0, 0], sizes = [8, 32], strides = [1, 1]} : vector<8x64xf32> to vector<8x32xf32>
    %cst_30 = arith.constant 0.353553385 : f32
    %51 = vector.broadcast %cst_30 : f32 to vector<8x32xf32>
    %52 = arith.mulf %50, %51 : vector<8x32xf32>
    %53 = vector.extract_strided_slice %44 {offsets = [0, 32], sizes = [8, 32], strides = [1, 1]} : vector<8x64xf32> to vector<8x32xf32>
    %54 = vector.extract_strided_slice %52 {offsets = [0, 0], sizes = [8, 8], strides = [1, 1]} : vector<8x32xf32> to vector<8x8xf32>
    %55 = vector.extract_strided_slice %54 {offsets = [0, 4], sizes = [8, 4], strides = [1, 1]} : vector<8x8xf32> to vector<8x4xf32>
    %cst_31 = arith.constant 0.000000e+00 : f32
    %56 = vector.broadcast %cst_31 : f32 to vector<8x4xf32>
    %57 = arith.subf %56, %55 : vector<8x4xf32>
    %58 = vector.extract_strided_slice %54 {offsets = [0, 0], sizes = [8, 4], strides = [1, 1]} : vector<8x8xf32> to vector<8x4xf32>
    %59 = tpu.concatenate %57, %58 in 1 : vector<8x4xf32>, vector<8x4xf32> -> vector<8x8xf32>
    %60 = arith.mulf %54, %2 : vector<8x8xf32>
    %61 = arith.mulf %59, %3 : vector<8x8xf32>
    %62 = arith.addf %60, %61 : vector<8x8xf32>
    %63 = vector.extract_strided_slice %53 {offsets = [0, 0], sizes = [8, 8], strides = [1, 1]} : vector<8x32xf32> to vector<8x8xf32>
    %64 = vector.extract_strided_slice %63 {offsets = [0, 4], sizes = [8, 4], strides = [1, 1]} : vector<8x8xf32> to vector<8x4xf32>
    %cst_32 = arith.constant 0.000000e+00 : f32
    %65 = vector.broadcast %cst_32 : f32 to vector<8x4xf32>
    %66 = arith.subf %65, %64 : vector<8x4xf32>
    %67 = vector.extract_strided_slice %63 {offsets = [0, 0], sizes = [8, 4], strides = [1, 1]} : vector<8x8xf32> to vector<8x4xf32>
    %68 = tpu.concatenate %66, %67 in 1 : vector<8x4xf32>, vector<8x4xf32> -> vector<8x8xf32>
    %69 = arith.mulf %63, %2 : vector<8x8xf32>
    %70 = arith.mulf %68, %3 : vector<8x8xf32>
    %71 = arith.addf %69, %70 : vector<8x8xf32>
    %72 = vector.extract_strided_slice %49 {offsets = [0, 0], sizes = [8, 8], strides = [1, 1]} : vector<8x32xf32> to vector<8x8xf32>
    %73 = arith.truncf %62 : vector<8x8xf32> to vector<8x8xbf16>
    %74 = arith.truncf %71 : vector<8x8xf32> to vector<8x8xbf16>
    %cst_33 = arith.constant dense<0.000000e+00> : vector<8x8xf32>
    %75 = tpu.matmul %73, %74, %cst_33 {dimension_numbers = #tpu.dot_dimension_numbers<[1], [1], [0], [0], [0, 0, 1, 0], [], []>} : vector<8x8xbf16>, vector<8x8xbf16>, vector<8x8xf32> -> vector<8x8xf32>
    %76 = arith.addf %75, %39 : vector<8x8xf32>
    %cst_34 = arith.constant dense<0xFF800000> : vector<8xf32>
    %77 = vector.multi_reduction <maximumf>, %76, %cst_34 [1] : vector<8x8xf32> to vector<8xf32>
    %78 = vector.shape_cast %77 : vector<8xf32> to vector<8x1xf32>
    %79 = vector.broadcast %78 : vector<8x1xf32> to vector<8x8xf32>
    %80 = arith.subf %76, %79 : vector<8x8xf32>
    %81 = math.exp %80 : vector<8x8xf32>
    %cst_35 = arith.constant dense<0.000000e+00> : vector<8xf32>
    %82 = vector.multi_reduction <add>, %81, %cst_35 [1] : vector<8x8xf32> to vector<8xf32>
    %83 = vector.shape_cast %82 : vector<8xf32> to vector<8x1xf32>
    %84 = arith.truncf %81 : vector<8x8xf32> to vector<8x8xbf16>
    %85 = arith.truncf %72 : vector<8x8xf32> to vector<8x8xbf16>
    %cst_36 = arith.constant dense<0.000000e+00> : vector<8x8xf32>
    %86 = tpu.matmul %84, %85, %cst_36 {dimension_numbers = #tpu.dot_dimension_numbers<[1], [0], [0], [1], [0, 0, 1, 1], [], []>} : vector<8x8xbf16>, vector<8x8xbf16>, vector<8x8xf32> -> vector<8x8xf32>
    %87 = tpu.reciprocal %83 {approx = true} : vector<8x1xf32> -> vector<8x1xf32>
    %88 = vector.broadcast %87 : vector<8x1xf32> to vector<8x8xf32>
    %89 = arith.mulf %86, %88 : vector<8x8xf32>
    %90 = vector.extract_strided_slice %52 {offsets = [0, 8], sizes = [8, 8], strides = [1, 1]} : vector<8x32xf32> to vector<8x8xf32>
    %91 = vector.extract_strided_slice %90 {offsets = [0, 4], sizes = [8, 4], strides = [1, 1]} : vector<8x8xf32> to vector<8x4xf32>
    %cst_37 = arith.constant 0.000000e+00 : f32
    %92 = vector.broadcast %cst_37 : f32 to vector<8x4xf32>
    %93 = arith.subf %92, %91 : vector<8x4xf32>
    %94 = vector.extract_strided_slice %90 {offsets = [0, 0], sizes = [8, 4], strides = [1, 1]} : vector<8x8xf32> to vector<8x4xf32>
    %95 = tpu.concatenate %93, %94 in 1 : vector<8x4xf32>, vector<8x4xf32> -> vector<8x8xf32>
    %96 = arith.mulf %90, %2 : vector<8x8xf32>
    %97 = arith.mulf %95, %3 : vector<8x8xf32>
    %98 = arith.addf %96, %97 : vector<8x8xf32>
    %99 = vector.extract_strided_slice %53 {offsets = [0, 8], sizes = [8, 8], strides = [1, 1]} : vector<8x32xf32> to vector<8x8xf32>
    %100 = vector.extract_strided_slice %99 {offsets = [0, 4], sizes = [8, 4], strides = [1, 1]} : vector<8x8xf32> to vector<8x4xf32>
    %cst_38 = arith.constant 0.000000e+00 : f32
    %101 = vector.broadcast %cst_38 : f32 to vector<8x4xf32>
    %102 = arith.subf %101, %100 : vector<8x4xf32>
    %103 = vector.extract_strided_slice %99 {offsets = [0, 0], sizes = [8, 4], strides = [1, 1]} : vector<8x8xf32> to vector<8x4xf32>
    %104 = tpu.concatenate %102, %103 in 1 : vector<8x4xf32>, vector<8x4xf32> -> vector<8x8xf32>
    %105 = arith.mulf %99, %2 : vector<8x8xf32>
    %106 = arith.mulf %104, %3 : vector<8x8xf32>
    %107 = arith.addf %105, %106 : vector<8x8xf32>
    %108 = vector.extract_strided_slice %49 {offsets = [0, 8], sizes = [8, 8], strides = [1, 1]} : vector<8x32xf32> to vector<8x8xf32>
    %109 = arith.truncf %98 : vector<8x8xf32> to vector<8x8xbf16>
    %110 = arith.truncf %107 : vector<8x8xf32> to vector<8x8xbf16>
    %cst_39 = arith.constant dense<0.000000e+00> : vector<8x8xf32>
    %111 = tpu.matmul %109, %110, %cst_39 {dimension_numbers = #tpu.dot_dimension_numbers<[1], [1], [0], [0], [0, 0, 1, 0], [], []>} : vector<8x8xbf16>, vector<8x8xbf16>, vector<8x8xf32> -> vector<8x8xf32>
    %112 = arith.addf %111, %39 : vector<8x8xf32>
    %cst_40 = arith.constant dense<0xFF800000> : vector<8xf32>
    %113 = vector.multi_reduction <maximumf>, %112, %cst_40 [1] : vector<8x8xf32> to vector<8xf32>
    %114 = vector.shape_cast %113 : vector<8xf32> to vector<8x1xf32>
    %115 = vector.broadcast %114 : vector<8x1xf32> to vector<8x8xf32>
    %116 = arith.subf %112, %115 : vector<8x8xf32>
    %117 = math.exp %116 : vector<8x8xf32>
    %cst_41 = arith.constant dense<0.000000e+00> : vector<8xf32>
    %118 = vector.multi_reduction <add>, %117, %cst_41 [1] : vector<8x8xf32> to vector<8xf32>
    %119 = vector.shape_cast %118 : vector<8xf32> to vector<8x1xf32>
    %120 = arith.truncf %117 : vector<8x8xf32> to vector<8x8xbf16>
    %121 = arith.truncf %108 : vector<8x8xf32> to vector<8x8xbf16>
    %cst_42 = arith.constant dense<0.000000e+00> : vector<8x8xf32>
    %122 = tpu.matmul %120, %121, %cst_42 {dimension_numbers = #tpu.dot_dimension_numbers<[1], [0], [0], [1], [0, 0, 1, 1], [], []>} : vector<8x8xbf16>, vector<8x8xbf16>, vector<8x8xf32> -> vector<8x8xf32>
    %123 = tpu.reciprocal %119 {approx = true} : vector<8x1xf32> -> vector<8x1xf32>
    %124 = vector.broadcast %123 : vector<8x1xf32> to vector<8x8xf32>
    %125 = arith.mulf %122, %124 : vector<8x8xf32>
    %126 = vector.extract_strided_slice %52 {offsets = [0, 16], sizes = [8, 8], strides = [1, 1]} : vector<8x32xf32> to vector<8x8xf32>
    %127 = vector.extract_strided_slice %126 {offsets = [0, 4], sizes = [8, 4], strides = [1, 1]} : vector<8x8xf32> to vector<8x4xf32>
    %cst_43 = arith.constant 0.000000e+00 : f32
    %128 = vector.broadcast %cst_43 : f32 to vector<8x4xf32>
    %129 = arith.subf %128, %127 : vector<8x4xf32>
    %130 = vector.extract_strided_slice %126 {offsets = [0, 0], sizes = [8, 4], strides = [1, 1]} : vector<8x8xf32> to vector<8x4xf32>
    %131 = tpu.concatenate %129, %130 in 1 : vector<8x4xf32>, vector<8x4xf32> -> vector<8x8xf32>
    %132 = arith.mulf %126, %2 : vector<8x8xf32>
    %133 = arith.mulf %131, %3 : vector<8x8xf32>
    %134 = arith.addf %132, %133 : vector<8x8xf32>
    %135 = vector.extract_strided_slice %53 {offsets = [0, 16], sizes = [8, 8], strides = [1, 1]} : vector<8x32xf32> to vector<8x8xf32>
    %136 = vector.extract_strided_slice %135 {offsets = [0, 4], sizes = [8, 4], strides = [1, 1]} : vector<8x8xf32> to vector<8x4xf32>
    %cst_44 = arith.constant 0.000000e+00 : f32
    %137 = vector.broadcast %cst_44 : f32 to vector<8x4xf32>
    %138 = arith.subf %137, %136 : vector<8x4xf32>
    %139 = vector.extract_strided_slice %135 {offsets = [0, 0], sizes = [8, 4], strides = [1, 1]} : vector<8x8xf32> to vector<8x4xf32>
    %140 = tpu.concatenate %138, %139 in 1 : vector<8x4xf32>, vector<8x4xf32> -> vector<8x8xf32>
    %141 = arith.mulf %135, %2 : vector<8x8xf32>
    %142 = arith.mulf %140, %3 : vector<8x8xf32>
    %143 = arith.addf %141, %142 : vector<8x8xf32>
    %144 = vector.extract_strided_slice %49 {offsets = [0, 16], sizes = [8, 8], strides = [1, 1]} : vector<8x32xf32> to vector<8x8xf32>
    %145 = arith.truncf %134 : vector<8x8xf32> to vector<8x8xbf16>
    %146 = arith.truncf %143 : vector<8x8xf32> to vector<8x8xbf16>
    %cst_45 = arith.constant dense<0.000000e+00> : vector<8x8xf32>
    %147 = tpu.matmul %145, %146, %cst_45 {dimension_numbers = #tpu.dot_dimension_numbers<[1], [1], [0], [0], [0, 0, 1, 0], [], []>} : vector<8x8xbf16>, vector<8x8xbf16>, vector<8x8xf32> -> vector<8x8xf32>
    %148 = arith.addf %147, %39 : vector<8x8xf32>
    %cst_46 = arith.constant dense<0xFF800000> : vector<8xf32>
    %149 = vector.multi_reduction <maximumf>, %148, %cst_46 [1] : vector<8x8xf32> to vector<8xf32>
    %150 = vector.shape_cast %149 : vector<8xf32> to vector<8x1xf32>
    %151 = vector.broadcast %150 : vector<8x1xf32> to vector<8x8xf32>
    %152 = arith.subf %148, %151 : vector<8x8xf32>
    %153 = math.exp %152 : vector<8x8xf32>
    %cst_47 = arith.constant dense<0.000000e+00> : vector<8xf32>
    %154 = vector.multi_reduction <add>, %153, %cst_47 [1] : vector<8x8xf32> to vector<8xf32>
    %155 = vector.shape_cast %154 : vector<8xf32> to vector<8x1xf32>
    %156 = arith.truncf %153 : vector<8x8xf32> to vector<8x8xbf16>
    %157 = arith.truncf %144 : vector<8x8xf32> to vector<8x8xbf16>
    %cst_48 = arith.constant dense<0.000000e+00> : vector<8x8xf32>
    %158 = tpu.matmul %156, %157, %cst_48 {dimension_numbers = #tpu.dot_dimension_numbers<[1], [0], [0], [1], [0, 0, 1, 1], [], []>} : vector<8x8xbf16>, vector<8x8xbf16>, vector<8x8xf32> -> vector<8x8xf32>
    %159 = tpu.reciprocal %155 {approx = true} : vector<8x1xf32> -> vector<8x1xf32>
    %160 = vector.broadcast %159 : vector<8x1xf32> to vector<8x8xf32>
    %161 = arith.mulf %158, %160 : vector<8x8xf32>
    %162 = vector.extract_strided_slice %52 {offsets = [0, 24], sizes = [8, 8], strides = [1, 1]} : vector<8x32xf32> to vector<8x8xf32>
    %163 = vector.extract_strided_slice %162 {offsets = [0, 4], sizes = [8, 4], strides = [1, 1]} : vector<8x8xf32> to vector<8x4xf32>
    %cst_49 = arith.constant 0.000000e+00 : f32
    %164 = vector.broadcast %cst_49 : f32 to vector<8x4xf32>
    %165 = arith.subf %164, %163 : vector<8x4xf32>
    %166 = vector.extract_strided_slice %162 {offsets = [0, 0], sizes = [8, 4], strides = [1, 1]} : vector<8x8xf32> to vector<8x4xf32>
    %167 = tpu.concatenate %165, %166 in 1 : vector<8x4xf32>, vector<8x4xf32> -> vector<8x8xf32>
    %168 = arith.mulf %162, %2 : vector<8x8xf32>
    %169 = arith.mulf %167, %3 : vector<8x8xf32>
    %170 = arith.addf %168, %169 : vector<8x8xf32>
    %171 = vector.extract_strided_slice %53 {offsets = [0, 24], sizes = [8, 8], strides = [1, 1]} : vector<8x32xf32> to vector<8x8xf32>
    %172 = vector.extract_strided_slice %171 {offsets = [0, 4], sizes = [8, 4], strides = [1, 1]} : vector<8x8xf32> to vector<8x4xf32>
    %cst_50 = arith.constant 0.000000e+00 : f32
    %173 = vector.broadcast %cst_50 : f32 to vector<8x4xf32>
    %174 = arith.subf %173, %172 : vector<8x4xf32>
    %175 = vector.extract_strided_slice %171 {offsets = [0, 0], sizes = [8, 4], strides = [1, 1]} : vector<8x8xf32> to vector<8x4xf32>
    %176 = tpu.concatenate %174, %175 in 1 : vector<8x4xf32>, vector<8x4xf32> -> vector<8x8xf32>
    %177 = arith.mulf %171, %2 : vector<8x8xf32>
    %178 = arith.mulf %176, %3 : vector<8x8xf32>
    %179 = arith.addf %177, %178 : vector<8x8xf32>
    %180 = vector.extract_strided_slice %49 {offsets = [0, 24], sizes = [8, 8], strides = [1, 1]} : vector<8x32xf32> to vector<8x8xf32>
    %181 = arith.truncf %170 : vector<8x8xf32> to vector<8x8xbf16>
    %182 = arith.truncf %179 : vector<8x8xf32> to vector<8x8xbf16>
    %cst_51 = arith.constant dense<0.000000e+00> : vector<8x8xf32>
    %183 = tpu.matmul %181, %182, %cst_51 {dimension_numbers = #tpu.dot_dimension_numbers<[1], [1], [0], [0], [0, 0, 1, 0], [], []>} : vector<8x8xbf16>, vector<8x8xbf16>, vector<8x8xf32> -> vector<8x8xf32>
    %184 = arith.addf %183, %39 : vector<8x8xf32>
    %cst_52 = arith.constant dense<0xFF800000> : vector<8xf32>
    %185 = vector.multi_reduction <maximumf>, %184, %cst_52 [1] : vector<8x8xf32> to vector<8xf32>
    %186 = vector.shape_cast %185 : vector<8xf32> to vector<8x1xf32>
    %187 = vector.broadcast %186 : vector<8x1xf32> to vector<8x8xf32>
    %188 = arith.subf %184, %187 : vector<8x8xf32>
    %189 = math.exp %188 : vector<8x8xf32>
    %cst_53 = arith.constant dense<0.000000e+00> : vector<8xf32>
    %190 = vector.multi_reduction <add>, %189, %cst_53 [1] : vector<8x8xf32> to vector<8xf32>
    %191 = vector.shape_cast %190 : vector<8xf32> to vector<8x1xf32>
    %192 = arith.truncf %189 : vector<8x8xf32> to vector<8x8xbf16>
    %193 = arith.truncf %180 : vector<8x8xf32> to vector<8x8xbf16>
    %cst_54 = arith.constant dense<0.000000e+00> : vector<8x8xf32>
    %194 = tpu.matmul %192, %193, %cst_54 {dimension_numbers = #tpu.dot_dimension_numbers<[1], [0], [0], [1], [0, 0, 1, 1], [], []>} : vector<8x8xbf16>, vector<8x8xbf16>, vector<8x8xf32> -> vector<8x8xf32>
    %195 = tpu.reciprocal %191 {approx = true} : vector<8x1xf32> -> vector<8x1xf32>
    %196 = vector.broadcast %195 : vector<8x1xf32> to vector<8x8xf32>
    %197 = arith.mulf %194, %196 : vector<8x8xf32>
    %198 = tpu.concatenate %89, %125, %161, %197 in 1 : vector<8x8xf32>, vector<8x8xf32>, vector<8x8xf32>, vector<8x8xf32> -> vector<8x32xf32>
    %199 = arith.truncf %198 : vector<8x32xf32> to vector<8x32xbf16>
    %c0_55 = arith.constant 0 : index
    %c0_56 = arith.constant 0 : index
    %200 = vector.load %arg11[%c0_55, %c0_56] : memref<32x32xbf16, #tpu.memory_space<vmem>>, vector<32x32xbf16>
    %cst_57 = arith.constant dense<0.000000e+00> : vector<8x32xf32>
    %201 = tpu.matmul %199, %200, %cst_57 {dimension_numbers = #tpu.dot_dimension_numbers<[1], [0], [0], [1], [0, 0, 1, 1], [], []>} : vector<8x32xbf16>, vector<32x32xbf16>, vector<8x32xf32> -> vector<8x32xf32>
    %c0_58 = arith.constant 0 : index
    %c0_59 = arith.constant 0 : index
    %202 = vector.load %arg12[%c0_58, %c0_59] : memref<1x32xf32, #tpu.memory_space<vmem>>, vector<1x32xf32>
    %203 = vector.broadcast %202 : vector<1x32xf32> to vector<8x32xf32>
    %204 = arith.addf %201, %203 : vector<8x32xf32>
    %205 = arith.addf %204, %29 : vector<8x32xf32>
    %c0_60 = arith.constant 0 : index
    %c0_61 = arith.constant 0 : index
    %206 = vector.load %arg6[%c0_60, %c0_61] : memref<1x32xf32, #tpu.memory_space<vmem>>, vector<1x32xf32>
    %207 = arith.mulf %205, %205 : vector<8x32xf32>
    %cst_62 = arith.constant dense<0.000000e+00> : vector<8xf32>
    %208 = vector.multi_reduction <add>, %207, %cst_62 [1] : vector<8x32xf32> to vector<8xf32>
    %209 = vector.shape_cast %208 : vector<8xf32> to vector<8x1xf32>
    %cst_63 = arith.constant 3.200000e+01 : f32
    %210 = vector.broadcast %cst_63 : f32 to vector<8x1xf32>
    %211 = arith.divf %209, %210 : vector<8x1xf32>
    %cst_64 = arith.constant 9.99999997E-7 : f32
    %212 = vector.broadcast %cst_64 : f32 to vector<8x1xf32>
    %213 = arith.addf %211, %212 : vector<8x1xf32>
    %214 = math.rsqrt %213 : vector<8x1xf32>
    %215 = vector.broadcast %214 : vector<8x1xf32> to vector<8x32xf32>
    %216 = arith.mulf %205, %215 : vector<8x32xf32>
    %217 = vector.broadcast %206 : vector<1x32xf32> to vector<8x32xf32>
    %218 = arith.mulf %216, %217 : vector<8x32xf32>
    %219 = arith.truncf %218 : vector<8x32xf32> to vector<8x32xbf16>
    %c0_65 = arith.constant 0 : index
    %c0_66 = arith.constant 0 : index
    %220 = vector.load %arg13[%c0_65, %c0_66] : memref<32x128xbf16, #tpu.memory_space<vmem>>, vector<32x128xbf16>
    %cst_67 = arith.constant dense<0.000000e+00> : vector<8x128xf32>
    %221 = tpu.matmul %219, %220, %cst_67 {dimension_numbers = #tpu.dot_dimension_numbers<[1], [0], [0], [1], [0, 0, 1, 1], [], []>} : vector<8x32xbf16>, vector<32x128xbf16>, vector<8x128xf32> -> vector<8x128xf32>
    %222 = vector.extract_strided_slice %221 {offsets = [0, 0], sizes = [8, 64], strides = [1, 1]} : vector<8x128xf32> to vector<8x64xf32>
    %223 = vector.extract_strided_slice %221 {offsets = [0, 64], sizes = [8, 64], strides = [1, 1]} : vector<8x128xf32> to vector<8x64xf32>
    %cst_68 = arith.constant 0.000000e+00 : f32
    %224 = vector.broadcast %cst_68 : f32 to vector<8x64xf32>
    %225 = arith.subf %224, %222 : vector<8x64xf32>
    %226 = math.exp %225 : vector<8x64xf32>
    %cst_69 = arith.constant 1.000000e+00 : f32
    %227 = vector.broadcast %cst_69 : f32 to vector<8x64xf32>
    %228 = arith.addf %227, %226 : vector<8x64xf32>
    %cst_70 = arith.constant 1.000000e+00 : f32
    %229 = vector.broadcast %cst_70 : f32 to vector<8x64xf32>
    %230 = arith.divf %229, %228 : vector<8x64xf32>
    %231 = arith.mulf %222, %230 : vector<8x64xf32>
    %232 = arith.mulf %231, %223 : vector<8x64xf32>
    %233 = arith.truncf %232 : vector<8x64xf32> to vector<8x64xbf16>
    %c0_71 = arith.constant 0 : index
    %c0_72 = arith.constant 0 : index
    %234 = vector.load %arg14[%c0_71, %c0_72] : memref<64x32xbf16, #tpu.memory_space<vmem>>, vector<64x32xbf16>
    %cst_73 = arith.constant dense<0.000000e+00> : vector<8x32xf32>
    %235 = tpu.matmul %233, %234, %cst_73 {dimension_numbers = #tpu.dot_dimension_numbers<[1], [0], [0], [1], [0, 0, 1, 1], [], []>} : vector<8x64xbf16>, vector<64x32xbf16>, vector<8x32xf32> -> vector<8x32xf32>
    %236 = arith.addf %235, %218 : vector<8x32xf32>
    %c0_74 = arith.constant 0 : index
    %c0_75 = arith.constant 0 : index
    %c0_76 = arith.constant 0 : index
    %237 = vector.load %arg15[%c0_74, %c0_75, %c0_76] : memref<1x8x32xf32, #tpu.memory_space<vmem>>, vector<1x8x32xf32>
    %238 = vector.shape_cast %237 : vector<1x8x32xf32> to vector<8x32xf32>
    %239 = vector.shape_cast %236 : vector<8x32xf32> to vector<1x8x32xf32>
    tpu.vector_store %arg15[%c0_74, %c0_75, %c0_76], %239 {strides = array<i32>} : memref<1x8x32xf32, #tpu.memory_space<vmem>>, vector<1x8x32xf32>,
    return
  }
  func.func @transform_0(%arg0: i32) -> (i32, i32, i32) {
    %c0_i32 = arith.constant 0 : i32
    %c0_i32_0 = arith.constant 0 : i32
    %c0_i32_1 = arith.constant 0 : i32
    return %arg0, %c0_i32, %c0_i32_0 : i32, i32, i32
  }
  func.func @transform_1(%arg0: i32) -> (i32, i32, i32) {
    %c0_i32 = arith.constant 0 : i32
    %c0_i32_0 = arith.constant 0 : i32
    %c0_i32_1 = arith.constant 0 : i32
    return %arg0, %c0_i32, %c0_i32_0 : i32, i32, i32
  }
  func.func @transform_2(%arg0: i32) -> (i32, i32) {
    %c0_i32 = arith.constant 0 : i32
    %c0_i32_0 = arith.constant 0 : i32
    %c0_i32_1 = arith.constant 0 : i32
    return %c0_i32, %c0_i32_0 : i32, i32
  }
  func.func @transform_3(%arg0: i32) -> (i32, i32) {
    %c0_i32 = arith.constant 0 : i32
    %c0_i32_0 = arith.constant 0 : i32
    %c0_i32_1 = arith.constant 0 : i32
    return %c0_i32, %c0_i32_0 : i32, i32
  }
  func.func @transform_4(%arg0: i32) -> (i32, i32) {
    %c0_i32 = arith.constant 0 : i32
    %c0_i32_0 = arith.constant 0 : i32
    %c0_i32_1 = arith.constant 0 : i32
    return %c0_i32, %c0_i32_0 : i32, i32
  }
  func.func @transform_5(%arg0: i32) -> (i32, i32) {
    %c0_i32 = arith.constant 0 : i32
    %c0_i32_0 = arith.constant 0 : i32
    %c0_i32_1 = arith.constant 0 : i32
    return %c0_i32, %c0_i32_0 : i32, i32
  }
  func.func @transform_6(%arg0: i32) -> (i32, i32) {
    %c0_i32 = arith.constant 0 : i32
    %c0_i32_0 = arith.constant 0 : i32
    %c0_i32_1 = arith.constant 0 : i32
    return %c0_i32, %c0_i32_0 : i32, i32
  }
  func.func @transform_7(%arg0: i32) -> (i32, i32) {
    %c0_i32 = arith.constant 0 : i32
    %c0_i32_0 = arith.constant 0 : i32
    %c0_i32_1 = arith.constant 0 : i32
    return %c0_i32, %c0_i32_0 : i32, i32
  }
  func.func @transform_8(%arg0: i32) -> (i32, i32) {
    %c0_i32 = arith.constant 0 : i32
    %c0_i32_0 = arith.constant 0 : i32
    %c0_i32_1 = arith.constant 0 : i32
    return %c0_i32, %c0_i32_0 : i32, i32
  }
  func.func @transform_9(%arg0: i32) -> (i32, i32) {
    %c0_i32 = arith.constant 0 : i32
    %c0_i32_0 = arith.constant 0 : i32
    %c0_i32_1 = arith.constant 0 : i32
    return %c0_i32, %c0_i32_0 : i32, i32
  }
  func.func @transform_10(%arg0: i32) -> (i32, i32) {
    %c0_i32 = arith.constant 0 : i32
    %c0_i32_0 = arith.constant 0 : i32
    %c0_i32_1 = arith.constant 0 : i32
    return %c0_i32, %c0_i32_0 : i32, i32
  }
  func.func @transform_11(%arg0: i32) -> (i32, i32) {
    %c0_i32 = arith.constant 0 : i32
    %c0_i32_0 = arith.constant 0 : i32
    %c0_i32_1 = arith.constant 0 : i32
    return %c0_i32, %c0_i32_0 : i32, i32
  }
  func.func @transform_12(%arg0: i32) -> (i32, i32) {
    %c0_i32 = arith.constant 0 : i32
    %c0_i32_0 = arith.constant 0 : i32
    %c0_i32_1 = arith.constant 0 : i32
    return %c0_i32, %c0_i32_0 : i32, i32
  }
  func.func @transform_13(%arg0: i32) -> (i32, i32) {
    %c0_i32 = arith.constant 0 : i32
    %c0_i32_0 = arith.constant 0 : i32
    %c0_i32_1 = arith.constant 0 : i32
    return %c0_i32, %c0_i32_0 : i32, i32
  }
  func.func @transform_14(%arg0: i32) -> (i32, i32, i32) {
    %c0_i32 = arith.constant 0 : i32
    %c0_i32_0 = arith.constant 0 : i32
    %c0_i32_1 = arith.constant 0 : i32
    return %arg0, %c0_i32, %c0_i32_0 : i32, i32, i32
  }
}

</mosaic_0001>

<bundles_post_ra>
// kernel: tpu_custom_call.1
= control target key start
LH: loop header
LB: loop body
LE: loop exit
PB: predicated region body
PF: predicated region fallthrough
CT: control target
= control target key end

     0   :  { %s2349_s0 = inlined_call_operand.vmem [shape: f32[2,8,32], index: 0, kind: input, shape index: {}]   ;;  %s2350_s1 = inlined_call_operand.hbm [shape: s8[2,8,8], index: 1, kind: input, shape index: {}]   ;;  %s2351_s2 = inlined_call_operand.hbm [shape: f32[8,8], index: 2, kind: input, shape index: {}]   ;;  %s2352_s3 = inlined_call_operand.hbm [shape: f32[8,8], index: 3, kind: input, shape index: {}]   ;;  %s2353_s4 = inlined_call_operand.vmem [shape: f32[1,32], index: 4, kind: input, shape index: {}]   ;;  %s2354_s5 = inlined_call_operand.vmem [shape: f32[1,32], index: 5, kind: input, shape index: {}]   ;;  %s2355_s6 = inlined_call_operand.vmem [shape: bf16[32,64], index: 6, kind: input, shape index: {}]   ;;  %s2356_s7 = inlined_call_operand.vmem [shape: f32[1,64], index: 7, kind: input, shape index: {}]   ;;  %s2357_s8 = inlined_call_operand.vmem [shape: bf16[32,32], index: 8, kind: input, shape index: {}]   ;;  %s2358_s9 = inlined_call_operand.vmem [shape: f32[1,32], index: 9, kind: input, shape index: {}]   ;;  %s2359_s10 = inlined_call_operand.hbm [shape: bf16[32,32], index: 10, kind: input, shape index: {}]   ;;  %s2360_s11 = inlined_call_operand.vmem [shape: f32[1,32], index: 11, kind: input, shape index: {}]   ;;  %s2361_s12 = inlined_call_operand.hbm [shape: bf16[32,128], index: 12, kind: input, shape index: {}]   ;;  %s2362_s13 = inlined_call_operand.vmem [shape: bf16[64,32], index: 13, kind: input, shape index: {}]   ;;  %s2363_s14 = inlined_call_operand.hbm [shape: f32[2,8,32], index: 14, kind: output, shape index: {}]  }
   0x1   :  { %2369 = sst [smem:[#allocation20_spill]] %s2351_s2 }
   0x2   :  { %2370 = sst [smem:[#allocation21_spill]] %s2352_s3 }
   0x3   :  { %2371 = sst [smem:[#allocation22_spill]] %s2359_s10 }
   0x4   :  { %2372 = sst [smem:[#allocation23_spill]] %s2361_s12 }
   0x5   :  { %2373 = sst [smem:[#allocation24_spill]] %s2363_s14 }
   0x6   :  { %19 = vsyncpa [#allocation3], 0 }
   0x7   :  { %21 = vsyncpa [#allocation3 + $0x1], 0 }
   0x8   :  { %22 = vsyncpa [#allocation6], 0 }
   0x9   :  { %23 = vsyncpa [#allocation9], 0 }
   0xa   :  { %24 = vsyncpa [#allocation4], 0 }
   0xb   :  { %26 = vsyncpa [#allocation4 + $0x1], 0  ;;  %s1968_s29 = smov 0   ;;  %s1970_s30 = smov 0  }
   0xc   :  { %s1972_s15 = smov 0   ;;  %s1974_s16 = smov 0  }
   0xd LB: > { %2374 = sst [smem:[#allocation16_spill]] %s1855_s15  ;;  %s1992_s20 = sadd.s32 4294967295, %s1859_s16   ;;  %s1859_s16 = sphi %s1974_s16, %s2392_s16   ;;  %s1855_s15 = sphi %s1972_s15, %s2397_s15   ;;  %s1851_s30 = sphi %s1970_s30, %s2396_s30   ;;  %s1847_s29 = sphi %s1968_s29, %s2395_s29  }
   0xe   : > { %s2375_s2 = sld [smem:[#allocation20_spill]]  ;;  %p1394_p0 = scmp.ge.s32.totalorder %s1859_s16, 1 }
   0xf   : > { %p79_p1 = scmp.eq.s32.totalorder %s1992_s20, 0  ;;  %p367_p2 = scmp.lt.s32.totalorder %s1859_s16, 3 }
  0x10   : > { %s1861_s22 = smov [#allocation5]   ;;  %s2377_s10 = sld [smem:[#allocation22_spill]] }
  0x11   : > { %p1997_p3 = pnand %p1394_p0, %p367_p2  ;;  %s381_s23 = sshll.u32 %s1861_s22, 4  ;;  %s382_s23 = int_to_ptr.vmem [resolvable:$true] %s381_s23 }
  0x12   : > { %s1862_s28 = smov [#allocation8]   ;;  %s1863_s18 = smov 64  }
  0x13   : > { %p1507_p5 = pneg %p1997_p3  ;;  %s422_s17 = sshll.u32 %s1862_s28, 4  ;;  %s423_s17 = int_to_ptr.vmem [resolvable:$true] %s422_s17 }
  0x14   : > { %s379_s19 = sshll.u32 %s2375_s2, 4  ;;  %s1864_s22 = smov 4   ;;  %s380_s19 = int_to_ptr.hbm [resolvable:$true] %s379_s19 }
  0x15   : > { %p2009_p6 = pnand %p1507_p5, %p79_p1  ;;  %s2379_s3 = sld [smem:[#allocation21_spill]] }
  0x16   : > { %s420_s26 = sshll.u32 %s2377_s10, 4  ;;  %s1865_s28 = smov [#allocation7]   ;;  %s421_s26 = int_to_ptr.hbm [resolvable:$true] %s420_s26 }
  0x17   : > { %1510 = dma.hbm_to_vmem [thread:$0]  (!%p2009_p6), %s380_s19, 128, %s382_s23, [#allocation6]  }
  0x18   : > { %1516 = dma.hbm_to_vmem [thread:$0]  (!%p2009_p6), %s421_s26, 256, %s423_s17, [#allocation9], %s1863_s18, %s1863_s18, %s1864_s22  }
  0x19   : > { %s393_s10 = sshll.u32 %s1865_s28, 4  ;;  %s2380_s12 = sld [smem:[#allocation23_spill]]  ;;  %s394_s10 = int_to_ptr.vmem [resolvable:$true] %s393_s10 }
  0x1a   : > { %s1866_s26 = smov [#allocation10]   ;;  %s1393_s24 = sadd.s32 4294967294, %s1859_s16  }
  0x1b   : > { %s391_s2 = sshll.u32 %s2379_s3, 4  ;;  %s439_s17 = sshll.u32 %s1866_s26, 4  ;;  %s392_s2 = int_to_ptr.hbm [resolvable:$true] %s391_s2  ;;  %s440_s17 = int_to_ptr.vmem [resolvable:$true] %s439_s17 }
  0x1c   : > { %1513 = dma.hbm_to_vmem [thread:$0]  (!%p2009_p6), %s392_s2, 128, %s394_s10, [#allocation6]  }
  0x1d   : > { %s2029_s25 = sadd.s32 1, %s1859_s16   ;;  %s65_s19 = sadd.s32 1, %s1855_s15 }
  0x1e   : > { %2381 = sst [smem:[#allocation17_spill]] %s2029_s25  ;;  %s62_s28 = ssub.s32 %s1859_s16, %s2029_s25 }
  0x1f   : > { %s437_s14 = sshll.u32 %s2380_s12, 4  ;;  %p63_p7 = scmp.eq.s32.totalorder %s62_s28, 0  ;;  %s438_s14 = int_to_ptr.hbm [resolvable:$true] %s437_s14 }
  0x20   : > { %1519 = dma.hbm_to_vmem [thread:$0]  (!%p2009_p6), %s438_s14, 256, %s440_s17, [#allocation9], %s1863_s18, %s1863_s18, %s1864_s22  }
  0x21   : > { %p72_p8 = scmp.ne.s32.totalorder %s1855_s15, %s1851_s30  ;;  %p73_p9 = scmp.eq.s32.totalorder %s1859_s16, 0 }
  0x22   : > { %p78_p10 = scmp.ne.s32.totalorder %s1851_s30, %s1847_s29  ;;  %p354_p13 = scmp.eq.s32.totalorder %s1992_s20, 1 }
  0x23   : > { %s2040_s2 = scalar_select %p63_p7, %s1855_s15, %s65_s19  }
  0x24   : > { %p2042_p11 = por %p73_p9, %p72_p8  ;;  %p2048_p12 = por %p79_p1, %p78_p10 }
  0x25   : > { %2382 = sst [smem:[#allocation18_spill]] %s2040_s2  ;;  %p360_p0 = scmp.eq.s32.totalorder %s1393_s24, 1 }
  0x26   : > { %p1532_p2 = scmp.lt.s32.totalorder %s1859_s16, 2  ;;  %s463_s27 = sand.u32 1, %s1855_s15  }
  0x27   : > { %p2055_p5 = por %p354_p13, %p72_p8  ;;  %p2059_p6 = por %p360_p0, %p78_p10 }
  0x28   : > { %s1400_s23 = sshll.u32 %s463_s27, 1  ;;  %s1401_s26 = sshll.u32 %s1859_s16, 1 }
  0x29   : > { %s2386_s22 = scalar_select %p2059_p6, 1, 0 }
  0x2a   : > { %s471_s19 = scalar_lea.hbm %s2350_s1, %s1401_s26  ;;  %s467_s3 = scalar_lea.vmem [#allocation2], %s1400_s23 }
  0x2b   : > { %2387 = sst [smem:[#allocation19_spill]] %s2386_s22  ;;  %s475_s12 = sshll.u32 %s467_s3, 4  ;;  %s476_s12 = int_to_ptr.vmem [resolvable:$true] %s475_s12 }
  0x2c   : > { %s473_s2 = sshll.u32 %s471_s19, 4  ;;  %p2069_p7 = pnand %p1532_p2, %p2042_p11  ;;  %s474_s2 = int_to_ptr.hbm [resolvable:$true] %s473_s2 }
  0x2d   : > { %s464_s15 = scalar_lea.sflag [#allocation3], %s463_s27  ;;  %s1755_s25 = sshra.s32 %s474_s2, 4  ;;  %s1756_s25 = int_to_ptr.hbm [resolvable:$true] %s1755_s25 }
  0x2e   : > { %s1757_s22 = scalar_lea.hbm %s1756_s25, 2  ;;  %p1759_p9 = pneg %p2069_p7 }
  0x2f   : > { %p1758_p8 = scmp.ne.s32.totalorder %s1756_s25, %s1757_s22  ;;  %s1762_s26 = scalar_lea.hbm %s2350_s1, 4 }
  0x30   : > { %p1763_p11 = scmp.lt.s32.totalorder %s1756_s25, %s2350_s1  ;;  %p1764_p0 = scmp.lt.s32.totalorder %s1762_s26, %s1757_s22 }
  0x31   : > { %p1760_p10 = pnand %p1759_p9, %p1758_p8 }
  0x32   : > { %p1765_p2 = por %p1764_p0, %p1763_p11 }
  0x33   : > { %p1761_p13 = pneg %p1760_p10 }
  0x35   : > { %p1766_p4 = pnand %p1765_p2, %p1761_p13 }
  0x37   : > { %1769 = shalt.err (!%p1766_p4)
}
  0x38   : > { %1523 = dma.hbm_to_vmem [thread:$0]  (!%p2069_p7), %s474_s2, 32, %s476_s12, %s464_s15  }
  0x39   : > { %484 = sbr.rel (%p1997_p3) target bundleno = 2144 (0x860), region = 76  ;;  %s2086_s27 = sand.u32 (!%p1997_p3), 1, %s1851_s30  }
  0x3a   : > { %s1403_s28 = sshll.u32 (!%p1997_p3), %s2086_s27, 1  ;;  %s487_s19 = scalar_lea.sflag (!%p1997_p3), [#allocation3], %s2086_s27 }
  0x3b   : > { %s2090_s23 = scalar_lea.vmem (!%p1997_p3), [#allocation2], %s1403_s28 }
  0x3e   : > { %1830 = dma.done.wait (%p2048_p12), %s487_s19, 32  }
  0x3f   : > { %1832 = vsyncadd (%p2048_p12), %s487_s19, 4294967264 }
  0x40   : > { %1834 = dma.done.wait (%p79_p1), [#allocation6], 256  }
  0x41   : > { %1836 = vsyncadd (%p79_p1), [#allocation6], 4294967040 }
  0x42   : > { %1838 = dma.done.wait (%p79_p1), [#allocation9], 512  }
  0x43   : > { %1840 = vsyncadd (%p79_p1), [#allocation9], 4294966784  ;;  %p560_p3 = scmp.lt.s32.totalorder %s1992_s20, 1  ;;  %vm570_vm0 = vcmask 261120   ;;  %v1867_v3 = vmov 32.0   ;;  %v1476_v7 = vld [vmem:[%s2355_s6 + $0x8] sm:$0xff] }
  0x44   : > { %1607 = vrcp.f32 %v1867_v3  ;;  %651 = vmatpush.bf16.msra.mxu0 %v1476_v7  ;;  %v1475_v9 = vld [vmem:[%s2355_s6] sm:$0xff]  ;;  %s1868_s19 = smov 100   ;;  %s1871_s21 = smov 124   ;;  %vm704_vm5 = vcmask 31744   ;;  %v2171_v36 = vld [vmem:[#allocation7] sm:$0xff]  ;;  %vm735_vm9 = vcmask 64512  }
  0x45   : > { %s561_s12 = scalar_select %p560_p3, %s1992_s20, 1  ;;  %v2122_v21 = vld [vmem:[%s2353_s4] ss:$0 sm:$0xff]  ;;  %v2141_v31 = vld [vmem:[#allocation5] sm:$0xff]  ;;  %vm769_vm10 = vcmask 1043456   ;;  %vm1084_vm12 = vcmask 130048  }
  0x46   : > { %v1603_v26 = vld [vmem:[%s2356_s7] ss:$0 sm:$0xff]  ;;  %s1872_s25 = smov 84   ;;  %s1874_s14 = smov 116   ;;  %v1478_v42 = vld [vmem:[%s2357_s8 + $0x8] sm:$0xff]  ;;  %vm1086_vm13 = vcmask 195584  }
  0x47   : > { %s1409_s15 = sshll.u32 %s561_s12, 3  ;;  %s1869_s12 = smov 92   ;;  %687 = vmatpush.bf16.msra.mxu1 %v1478_v42  ;;  %v1477_v44 = vld [vmem:[%s2357_s8] sm:$0xff] }
  0x48   : > { %s563_s2 = scalar_lea.vmem %s2349_s0, %s1409_s15  ;;  %652 = vmatpush.bf16.msra.mxu0 %v1475_v9  ;;  %s1870_s15 = smov 32  }
  0x49   : > { %v565_v0 = vld [vmem:[%s563_s2] sm:$0xff]  ;;  %s1873_s2 = smov 76   ;;  %s1875_s22 = smov 40  }
  0x4a   : > { %v569_v1 = vmul.f32 %v565_v0, %v565_v0  ;;  %v1608_v4 = vpop.eup %1607  ;;  %s1876_s24 = smov 8   ;;  %s1877_s3 = smov 48  }
  0x4b   : > { %v575_v5 = vmul.f32 32.0, %v1608_v4  ;;  %vm579_vm1 = vweird.f32 %v1608_v4  ;;  %s1878_s26 = smov 108   ;;  %688 = vmatpush.bf16.msra.mxu1 %v1477_v44  ;;  %s1881_s17 = smov 68  }
  0x4c   : > { %v571_v2 = vsel %vm570_vm0, %v569_v1, 0.0  ;;  %s1889_s10 = smov 72   ;;  %s1890_s28 = smov 112  }
  0x4d   : > { %572 = vadd.xlane.f32.xlu0 %v571_v2  ;;  %v576_v6 = vsub.f32 1.0, %v575_v5 }
  0x4f   : > { %v577_v8 = vmul.f32 %v1608_v4, %v576_v6 }
  0x51   : > { %v578_v10 = vadd.f32 %v1608_v4, %v577_v8 }
  0x53   : > { %v2116_v11 = vsel %vm579_vm1, %v1608_v4, %v578_v10 }
  0xc0   : > { %v573_v12 = vpop.xlane.xlu0 %572 }
  0xc1   : > { %v581_v13 = vmul.f32 %v2116_v11, %v573_v12  ;;  %v1604_v12 = vld [vmem:[%s2358_s9] ss:$0 sm:$0xff] }
  0xc3   : > { %v582_v14 = vadd.f32 1e-06, %v581_v13 }
  0xc5   : > { %1609 = vrsqrt.f32 %v582_v14  ;;  %vm589_vm3 = vweird.f32 %v582_v14 }
  0xcb   : > { %v1610_v15 = vpop.eup %1609 }
  0xcc   : > { %v584_v16 = vmul.f32 %v1610_v15, %v582_v14  ;;  %vm590_vm2 = vweird.f32 %v1610_v15 }
  0xcd   : > { %vm591_vm4 = vmor %vm589_vm3, %vm590_vm2 }
  0xce   : > { %v585_v17 = vmul.f32 %v1610_v15, %v584_v16 }
  0xd0   : > { %v586_v18 = vmul.f32 0.5, %v585_v17 }
  0xd2   : > { %v587_v19 = vsub.f32 1.5, %v586_v18 }
  0xd4   : > { %v588_v20 = vmul.f32 %v1610_v15, %v587_v19 }
  0xd6   : > { %v592_v22 = vsel %vm591_vm4, %v1610_v15, %v588_v20 }
  0xd7   : > { %v593_v23 = vmul.f32 %v592_v22, %v565_v0 }
  0xd9   : > { %v2125_v24 = vmul.f32 %v2122_v21, %v593_v23 }
  0xdb   : > { %v616_v25 = vpack.c.bf16 %v2125_v24, %v2125_v24  ;;  %v598_v34 = vmul.f32 %v2125_v24, %v2125_v24 }
  0xdd   : > { %1418 = vmatmul.msk.bf16.vlgmr.msra.gmra.mxu0 %vm570_vm0, %v616_v25  ;;  %v599_v35 = vsel %vm570_vm0, %v598_v34, 0.0 }
 0x15a   : > { %v654_v27 = vpop.f32.mrf.mxu0 }
 0x15b   : > { %v2133_v28 = vadd.f32 %v1603_v26, %v654_v27 }
 0x15d   : > { %715 = vrot.lane.b32.xlu1 %v2133_v28, %s1868_s19  ;;  %v2138_v29 = vsub.f32 0.0, %v2133_v28  ;;  %v2147_v32 = vmul.f32 0.35355338, %v2133_v28 }
 0x15f   : > { %711 = vrot.lane.b32.xlu0 %v2138_v29, %s1869_s12  ;;  %v2150_v33 = vsub.f32 0.0, %v2147_v32  ;;  %v706_v4 = vmul.f32 %v2147_v32, %v2141_v31 }
 0x162   : > { %v656_v30 = vpop.f32.mrf.mxu0 }
 0x165   : > { %720 = vrot.lane.b32.xlu1 %v2141_v31, %s1870_s15 }
 0x167   : > { %808 = vrot.lane.b32.xlu0 %v2133_v28, %s1869_s12  ;;  %s1891_s12 = smov 104  }
 0x16d   : > { %697 = vrot.lane.b32.xlu1 %v2150_v33, %s1871_s21 }
 0x16f   : > { %791 = vrot.lane.b32.xlu0 %v2147_v32, %s1871_s21  ;;  %s1880_s21 = smov 4  }
 0x177   : > { %903 = vrot.lane.b32.xlu0 %v2133_v28, %s1872_s25 }
 0x17f   : > { %997 = vrot.lane.b32.xlu0 %v2133_v28, %s1873_s2 }
 0x187   : > { %886 = vrot.lane.b32.xlu0 %v2147_v32, %s1874_s14 }
 0x18f   : > { %812 = vrot.lane.b32.xlu0 %v2141_v31, %s1875_s22 }
 0x197   : > { %795 = vrot.lane.b32.xlu0 %v2141_v31, %s1876_s24  ;;  %600 = vadd.xlane.f32.xlu1 %v599_v35 }
 0x19f   : > { %907 = vrot.lane.b32.xlu0 %v2141_v31, %s1877_s3 }
 0x1b0   : > { %980 = vrot.lane.b32.xlu1 %v2147_v32, %s1878_s26 }
 0x1cf   : > { %v716_v37 = vpop.permute.xlu1 %715 }
 0x1d1   : > { %v712_v38 = vpop.permute.xlu0 %711 }
 0x1d2   : > { %v718_v39 = vsel %vm704_vm5, %v712_v38, %v716_v37 }
 0x1d3   : > { %v724_v40 = vmul.f32 %v718_v39, %v2171_v36 }
 0x1d5   : > { %726 = vrot.lane.b32.xlu2 %v724_v40, %s1870_s15  ;;  %s1879_s15 = smov 96  }
 0x1d7   : > { %v721_v41 = vpop.permute.xlu1 %720 }
 0x1d8   : > { %v723_v58 = vmul.f32 %v721_v41, %v2133_v28 }
 0x1d9   : > { %v809_v0 = vpop.permute.xlu0 %808 }
 0x1df   : > { %v698_v43 = vpop.permute.xlu1 %697 }
 0x1e1   : > { %v792_v9 = vpop.permute.xlu0 %791 }
 0x1e9   : > { %v904_v20 = vpop.permute.xlu0 %903 }
 0x1f1   : > { %v998_v25 = vpop.permute.xlu0 %997 }
 0x1f9   : > { %v887_v30 = vpop.permute.xlu0 %886 }
 0x201   : > { %v813_v41 = vpop.permute.xlu0 %812 }
 0x202   : > { %v815_v42 = vmul.f32 %v813_v41, %v2133_v28 }
 0x20a   : > { %v601_v45 = vpop.xlane.xlu1 %600 }
 0x20b   : > { %v602_v46 = vmul.f32 %v601_v45, %v2116_v11 }
 0x20d   : > { %v603_v47 = vadd.f32 1e-06, %v602_v46  ;;  %v796_v46 = vpop.permute.xlu0 %795 }
 0x20f   : > { %1611 = vrsqrt.f32 %v603_v47  ;;  %vm610_vm7 = vweird.f32 %v603_v47 }
 0x215   : > { %v1612_v48 = vpop.eup %1611 }
 0x216   : > { %v605_v49 = vmul.f32 %v1612_v48, %v603_v47  ;;  %vm611_vm6 = vweird.f32 %v1612_v48 }
 0x217   : > { %vm612_vm8 = vmor %vm610_vm7, %vm611_vm6  ;;  %vm1239_vm6 = vcmask 523264  }
 0x218   : > { %v606_v50 = vmul.f32 %v1612_v48, %v605_v49 }
 0x21a   : > { %v607_v51 = vmul.f32 0.5, %v606_v50 }
 0x21c   : > { %v608_v52 = vsub.f32 1.5, %v607_v51  ;;  %v1887_v51 = vmov 0.0  }
 0x21e   : > { %v609_v53 = vmul.f32 %v1612_v48, %v608_v52 }
 0x220   : > { %v613_v54 = vsel %vm612_vm8, %v1612_v48, %v609_v53  ;;  %v908_v53 = vpop.permute.xlu0 %907 }
 0x221   : > { %v614_v55 = vmul.f32 %v613_v54, %v2125_v24 }
 0x222   : > { %v981_v37 = vpop.permute.xlu1 %980 }
 0x223   : > { %v2185_v56 = vmul.f32 %v2122_v21, %v614_v55 }
 0x225   : > { %v617_v57 = vpack.c.bf16 %v2185_v56, %v2185_v56 }
 0x227   : > { %1427 = vmatmul.msk.bf16.vlgmr.msra.gmra.mxu1 %vm570_vm0, %v617_v57  ;;  %v910_v57 = vmul.f32 %v908_v53, %v2133_v28 }
 0x22f   : > { %v727_v59 = vpop.permute.xlu2 %726 }
 0x230   : > { %v729_v60 = vadd.f32 %v727_v59, %v723_v58 }
 0x232   : > { %v731_v61 = vpack.c.bf16 %v729_v60, %v729_v60 }
 0x234   : > { %733 = vrot.lane.b32.xlu2 %v731_v61, %s1879_s15 }
 0x23c   : > { %701 = vrot.lane.b32.xlu2 %v2147_v32, %s1880_s21  ;;  %s2389_s21 = sld [smem:[#allocation24_spill]] }
 0x244   : > { %805 = vrot.lane.b32.xlu2 %v2138_v29, %s1872_s25 }
 0x24c   : > { %788 = vrot.lane.b32.xlu2 %v2150_v33, %s1874_s14  ;;  %s1883_s14 = smov 16  }
 0x254   : > { %900 = vrot.lane.b32.xlu2 %v2138_v29, %s1873_s2  ;;  %s1882_s2 = smov 56  }
 0x25c   : > { %994 = vrot.lane.b32.xlu2 %v2138_v29, %s1881_s17 }
 0x264   : > { %883 = vrot.lane.b32.xlu2 %v2150_v33, %s1878_s26  ;;  %s1886_s26 = smov 120  }
 0x26c   : > { %977 = vrot.lane.b32.xlu2 %v2150_v33, %s1868_s19 }
 0x28e   : > { %v734_v62 = vpop.permute.xlu2 %733 }
 0x28f   : > { %v740_v63 = vsel %vm735_vm9, %v734_v62, 0 }
 0x290   : > { %749 = vmatpush.bf16.xpose.msra.mxu2 %v740_v63 }
 0x296   : > { %v702_v1 = vpop.permute.xlu2 %701 }
 0x297   : > { %v705_v2 = vsel %vm704_vm5, %v698_v43, %v702_v1 }
 0x298   : > { %v707_v3 = vmul.f32 %v705_v2, %v2171_v36 }
 0x29a   : > { %v708_v5 = vadd.f32 %v707_v3, %v706_v4 }
 0x29c   : > { %v730_v6 = vpack.c.bf16 %v708_v5, %v708_v5 }
 0x29e   : > { %v806_v7 = vpop.permute.xlu2 %805  ;;  %1428 = vmatmul.msk.bf16.vlgmr.msra.gmra.mxu2 %vm735_vm9, %v730_v6 }
 0x29f   : > { %v811_v8 = vsel %vm704_vm5, %v806_v7, %v809_v0 }
 0x2a0   : > { %v816_v10 = vmul.f32 %v811_v8, %v2171_v36 }
 0x2a2   : > { %818 = vrot.lane.b32.xlu2 %v816_v10, %s1875_s22  ;;  %s1884_s22 = smov 24  }
 0x2a4   : > { %v690_v13 = vpop.f32.mrf.mxu1 }
 0x2a5   : > { %v691_v14 = vadd.f32 %v1604_v12, %v690_v13 }
 0x2a6   : > { %v789_v15 = vpop.permute.xlu2 %788 }
 0x2a7   : > { %v2215_v16 = vpack.c.bf16 %v691_v14, %v691_v14  ;;  %v794_v17 = vsel %vm704_vm5, %v789_v15, %v792_v9 }
 0x2a8   : > { %v799_v18 = vmul.f32 %v794_v17, %v2171_v36 }
 0x2a9   : > { %v771_v19 = vsel %vm769_vm10, %v2215_v16, 0 }
 0x2aa   : > { %801 = vrot.lane.b32.xlu2 %v799_v18, %s1876_s24  ;;  %780 = vmatpush.bf16.msra.mxu3 %v771_v19 }
 0x2ac   : > { %v692_v21 = vpop.f32.mrf.mxu1 }
 0x2ae   : > { %v901_v22 = vpop.permute.xlu2 %900 }
 0x2af   : > { %v906_v23 = vsel %vm704_vm5, %v901_v22, %v904_v20 }
 0x2b0   : > { %v911_v24 = vmul.f32 %v906_v23, %v2171_v36 }
 0x2b2   : > { %1001 = vrot.lane.b32.xlu2 %v2141_v31, %s1882_s2  ;;  %913 = vrot.lane.b32.xlu1 %v911_v24, %s1877_s3  ;;  %s1885_s3 = smov 88  }
 0x2b6   : > { %v995_v26 = vpop.permute.xlu2 %994 }
 0x2b7   : > { %v1000_v27 = vsel %vm704_vm5, %v995_v26, %v998_v25 }
 0x2b8   : > { %v1005_v29 = vmul.f32 %v1000_v27, %v2171_v36 }
 0x2ba   : > { %1007 = vrot.lane.b32.xlu0 %v1005_v29, %s1882_s2  ;;  %890 = vrot.lane.b32.xlu1 %v2141_v31, %s1883_s14 }
 0x2be   : > { %v884_v33 = vpop.permute.xlu2 %883 }
 0x2bf   : > { %v889_v34 = vsel %vm704_vm5, %v884_v33, %v887_v30 }
 0x2c0   : > { %v894_v35 = vmul.f32 %v889_v34, %v2171_v36 }
 0x2c2   : > { %984 = vrot.lane.b32.xlu0 %v2141_v31, %s1884_s22  ;;  %896 = vrot.lane.b32.xlu1 %v894_v35, %s1883_s14  ;;  %v798_v31 = vmul.f32 %v796_v46, %v2147_v32 }
 0x2c6   : > { %v978_v38 = vpop.permute.xlu2 %977 }
 0x2c7   : > { %v983_v39 = vsel %vm704_vm5, %v978_v38, %v981_v37 }
 0x2c8   : > { %v988_v40 = vmul.f32 %v983_v39, %v2171_v36  ;;  %v618_v36 = vld [vmem:[%s2090_s23] sm:$0x3]  ;;  %s1888_s23 = smov 80  }
 0x2c9   : > { %v619_v50 = vunpack.c.0.s8 %v618_v36 }
 0x2ca   : > { %990 = vrot.lane.b32.xlu0 %v988_v40, %s1884_s22 }
 0x2cb   : > { %vm620_vm11 = vcmp.eq.s32.totalorder %v619_v50, 0 }
 0x2cc   : > { %v2242_v52 = vsel %vm620_vm11, -1e+30, %v1887_v51 }
 0x2fc   : > { %v819_v43 = vpop.permute.xlu2 %818 }
 0x2fd   : > { %v821_v44 = vadd.f32 %v819_v43, %v815_v42 }
 0x2ff   : > { %v823_v45 = vpack.c.bf16 %v821_v44, %v821_v44 }
 0x301   : > { %828 = vrot.lane.b32.xlu1 %v823_v45, %s1885_s3 }
 0x304   : > { %v802_v47 = vpop.permute.xlu2 %801 }
 0x305   : > { %v804_v48 = vadd.f32 %v802_v47, %v798_v31 }
 0x307   : > { %v822_v49 = vpack.c.bf16 %v804_v48, %v804_v48 }
 0x309   : > { %825 = vrot.lane.b32.xlu0 %v822_v49, %s1886_s26 }
 0x30c   : > { %v1002_v62 = vpop.permute.xlu2 %1001 }
 0x30d   : > { %v1004_v0 = vmul.f32 %v1002_v62, %v2133_v28 }
 0x321   : > { %v751_v54 = vpop.f32.mrf.mxu2 }
 0x322   : > { %v752_v55 = vadd.f32 %v751_v54, %v2242_v52 }
 0x324   : > { %v914_v58 = vpop.permute.xlu1 %913  ;;  %v755_v59 = vsel %vm735_vm9, %v752_v55, -inf }
 0x325   : > { %v916_v60 = vadd.f32 %v914_v58, %v910_v57  ;;  %756 = vmax.xlane.f32.xlu2 %v755_v59 }
 0x327   : > { %v918_v61 = vpack.c.bf16 %v916_v60, %v916_v60 }
 0x329   : > { %v753_v63 = vpop.f32.mrf.mxu2  ;;  %923 = vrot.lane.b32.xlu1 %v918_v61, %s1888_s23  ;;  %s1805_s23 = scalar_lea.hbm %s2389_s21, 16 }
 0x32c   : > { %v1008_v1 = vpop.permute.xlu0 %1007  ;;  %v891_v2 = vpop.permute.xlu1 %890 }
 0x32d   : > { %v1010_v3 = vadd.f32 %v1008_v1, %v1004_v0  ;;  %v893_v5 = vmul.f32 %v891_v2, %v2147_v32 }
 0x32f   : > { %v1012_v4 = vpack.c.bf16 %v1010_v3, %v1010_v3 }
 0x331   : > { %1017 = vrot.lane.b32.xlu0 %v1012_v4, %s1889_s10 }
 0x334   : > { %v985_v6 = vpop.permute.xlu0 %984  ;;  %v897_v7 = vpop.permute.xlu1 %896 }
 0x335   : > { %v899_v8 = vadd.f32 %v897_v7, %v893_v5  ;;  %v987_v10 = vmul.f32 %v985_v6, %v2147_v32 }
 0x337   : > { %v917_v9 = vpack.c.bf16 %v899_v8, %v899_v8 }
 0x339   : > { %920 = vrot.lane.b32.xlu1 %v917_v9, %s1890_s28 }
 0x33c   : > { %v991_v12 = vpop.permute.xlu0 %990 }
 0x33d   : > { %v993_v13 = vadd.f32 %v991_v12, %v987_v10 }
 0x33f   : > { %v1011_v14 = vpack.c.bf16 %v993_v13, %v993_v13 }
 0x341   : > { %1014 = vrot.lane.b32.xlu0 %v1011_v14, %s1891_s12 }
 0x349   : > { %860 = vrot.lane.b32.xlu0 %v2215_v16, %s1886_s26  ;;  %s1892_s26 = smov 64  }
 0x351   : > { %954 = vrot.lane.b32.xlu0 %v2215_v16, %s1890_s28  ;;  %s1472_s28 = sshll.u32 %s1992_s20, 3 }
 0x352   : > { %s1268_s17 = scalar_lea.hbm %s2389_s21, %s1472_s28 }
 0x353   : > { %s1272_s2 = sshll.u32 %s1268_s17, 4  ;;  %s1273_s2 = int_to_ptr.hbm [resolvable:$true] %s1272_s2 }
 0x373   : > { %v829_v28 = vpop.permute.xlu1 %828 }
 0x374   : > { %v834_v15 = vsel %vm735_vm9, %v829_v28, 0 }
 0x375   : > { %843 = vmatpush.bf16.xpose.msrb.mxu3 %v834_v15 }
 0x37b   : > { %v826_v19 = vpop.permute.xlu0 %825 }
 0x398   : > { %v757_v17 = vpop.xlane.xlu2 %756 }
 0x399   : > { %v758_v18 = vsub.f32 %v752_v55, %v757_v17 }
 0x39b   : > { %v759_v20 = vmul.f32 1.442695, %v758_v18  ;;  %v924_v32 = vpop.permute.xlu1 %923 }
 0x39c   : > { %v929_v21 = vsel %vm735_vm9, %v924_v32, 0  ;;  %v1480_v32 = vld [vmem:[#allocation8 + $0x8] sm:$0xff] }
 0x39d   : > { %1613 = vpow2.f32 %v759_v20  ;;  %938 = vmatpush.bf16.xpose.msrb.mxu1 %v929_v21  ;;  %v1479_v21 = vld [vmem:[#allocation8] sm:$0xff] }
 0x3a3   : > { %v2256_v22 = vpop.eup %1613  ;;  %v1018_v23 = vpop.permute.xlu0 %1017 }
 0x3a4   : > { %v1023_v24 = vsel %vm735_vm9, %v1018_v23, 0  ;;  %v764_v25 = vpack.c.bf16 %v2256_v22, %v2256_v22  ;;  %v761_v4 = vsel %vm735_vm9, %v2256_v22, 0.0 }
 0x3a5   : > { %1118 = vmatpush.bf16.msra.mxu1 %v1480_v32 }
 0x3a6   : > { %1429 = vmatmul.msk.bf16.vlgmr.msra.gmra.mxu3 %vm735_vm9, %v764_v25 }
 0x3a7   : > { %1032 = vmatpush.bf16.xpose.msra.mxu3 %v1023_v24 }
 0x3a9   : > { %1119 = vmatpush.bf16.msra.mxu1 %v1479_v21 }
 0x3ab   : > { %v921_v26 = vpop.permute.xlu1 %920 }
 0x3ac   : > { %1432 = vmatmul.msk.bf16.vlgmr.msrb.gmra.mxu1 %vm735_vm9, %v921_v26 }
 0x3b3   : > { %v1015_v27 = vpop.permute.xlu0 %1014 }
 0x3b6   : > { %1430 = vmatmul.msk.bf16.vlgmr.msrb.gmra.mxu3 %vm735_vm9, %v826_v19 }
 0x3bb   : > { %v861_v29 = vpop.permute.xlu0 %860 }
 0x3bc   : > { %v866_v30 = vsel %vm769_vm10, %v861_v29, 0 }
 0x3bd   : > { %875 = vmatpush.bf16.msrb.mxu0 %v866_v30 }
 0x3c3   : > { %v955_v33 = vpop.permute.xlu0 %954 }
 0x3c4   : > { %v960_v34 = vsel %vm769_vm10, %v955_v33, 0 }
 0x3c5   : > { %969 = vmatpush.bf16.msrb.mxu2 %v960_v34 }
 0x3c6   : > { %1434 = vmatmul.msk.bf16.vlgmr.msra.gmra.mxu3 %vm735_vm9, %v1015_v27 }
 0x429   : > { %v2267_v35 = vpop.f32.mrf.mxu3  ;;  %v940_v37 = vpop.f32.mrf.mxu1 }
 0x42a   : > { %v941_v38 = vadd.f32 %v940_v37, %v2242_v52  ;;  %v1605_v37 = vld [vmem:[%s2360_s11] ss:$0 sm:$0xff] }
 0x42c   : > { %v944_v39 = vsel %vm735_vm9, %v941_v38, -inf }
 0x42d   : > { %945 = vmax.xlane.f32.xlu1 %v944_v39 }
 0x431   : > { %v784_v40 = vpop.f32.mrf.mxu3  ;;  %v942_v41 = vpop.f32.mrf.mxu1 }
 0x439   : > { %v845_v42 = vpop.f32.mrf.mxu3 }
 0x43a   : > { %v846_v43 = vadd.f32 %v845_v42, %v2242_v52 }
 0x43c   : > { %v849_v44 = vsel %vm735_vm9, %v846_v43, -inf }
 0x43d   : > { %850 = vmax.xlane.f32.xlu2 %v849_v44  ;;  %v1481_v44 = vld [vmem:[#allocation10] sm:$0xff] }
 0x441   : > { %v847_v45 = vpop.f32.mrf.mxu3 }
 0x449   : > { %v1034_v46 = vpop.f32.mrf.mxu3 }
 0x44a   : > { %v1035_v31 = vadd.f32 %v1034_v46, %v2242_v52 }
 0x44c   : > { %v1038_v47 = vsel %vm735_vm9, %v1035_v31, -inf }
 0x44d   : > { %1039 = vmax.xlane.f32.xlu2 %v1038_v47 }
 0x451   : > { %v1036_v48 = vpop.f32.mrf.mxu3 }
 0x465   : > { %1048 = vrot.lane.b32.xlu2 %v2215_v16, %s1891_s12  ;;  %s1408_s12 = sshll.u32 %s2086_s27, 3 }
 0x466   : > { %s559_s19 = scalar_lea.vmem [#allocation11], %s1408_s12 }
 0x467   : > { %s1270_s25 = sshll.u32 %s559_s19, 4  ;;  %s1271_s25 = int_to_ptr.vmem [resolvable:$true] %s1270_s25 }
 0x4a0   : > { %v946_v49 = vpop.xlane.xlu1 %945 }
 0x4a1   : > { %v947_v36 = vsub.f32 %v941_v38, %v946_v49 }
 0x4a3   : > { %v948_v50 = vmul.f32 1.442695, %v947_v36 }
 0x4a5   : > { %1615 = vpow2.f32 %v948_v50 }
 0x4ab   : > { %v1616_v51 = vpop.eup %1615 }
 0x4ac   : > { %v950_v53 = vsel %vm735_vm9, %v1616_v51, 0.0  ;;  %v953_v54 = vpack.c.bf16 %v1616_v51, %v1616_v51  ;;  %v1606_v51 = vld [vmem:[%s2354_s5] ss:$0 sm:$0xff] }
 0x4ad   : > { %951 = vadd.xlane.f32.xlu2 %v950_v53 }
 0x4ae   : > { %1433 = vmatmul.msk.bf16.vlgmr.msrb.gmra.mxu2 %vm735_vm9, %v953_v54 }
 0x4b0   : > { %v851_v55 = vpop.xlane.xlu2 %850 }
 0x4b1   : > { %v852_v52 = vsub.f32 %v846_v43, %v851_v55  ;;  %v1482_v43 = vld [vmem:[#allocation10 + $0x8] sm:$0xff] }
 0x4b2   : > { %1174 = vmatpush.bf16.msra.mxu2 %v1482_v43 }
 0x4b3   : > { %v853_v57 = vmul.f32 1.442695, %v852_v52 }
 0x4b5   : > { %1617 = vpow2.f32 %v853_v57  ;;  %v1485_v57 = vld [vmem:[%s2362_s13 + $0x10] sm:$0xff] }
 0x4b6   : > { %1175 = vmatpush.bf16.msra.mxu2 %v1481_v44 }
 0x4bb   : > { %v1618_v58 = vpop.eup %1617 }
 0x4bc   : > { %v855_v59 = vsel %vm735_vm9, %v1618_v58, 0.0  ;;  %v858_v60 = vpack.c.bf16 %v1618_v58, %v1618_v58  ;;  %v1484_v58 = vld [vmem:[%s2362_s13 + $0x8] sm:$0xff] }
 0x4bd   : > { %856 = vadd.xlane.f32.xlu0 %v855_v59 }
 0x4be   : > { %1431 = vmatmul.msk.bf16.vlgmr.msrb.gmra.mxu0 %vm735_vm9, %v858_v60 }
 0x4c0   : > { %v1040_v16 = vpop.xlane.xlu2 %1039 }
 0x4c1   : > { %v1041_v61 = vsub.f32 %v1035_v31, %v1040_v16 }
 0x4c3   : > { %v1042_v62 = vmul.f32 1.442695, %v1041_v61 }
 0x4c5   : > { %1619 = vpow2.f32 %v1042_v62 }
 0x4c8   : > { %v1049_v63 = vpop.permute.xlu2 %1048 }
 0x4c9   : > { %v1054_v0 = vsel %vm769_vm10, %v1049_v63, 0 }
 0x4ca   : > { %1063 = vmatpush.bf16.msra.mxu0 %v1054_v0  ;;  %v1483_v0 = vld [vmem:[%s2362_s13] sm:$0xff] }
 0x4cb   : > { %v1620_v1 = vpop.eup %1619 }
 0x4cc   : > { %v1047_v2 = vpack.c.bf16 %v1620_v1, %v1620_v1  ;;  %v1044_v3 = vsel %vm735_vm9, %v1620_v1, 0.0 }
 0x4cd   : > { %1045 = vadd.xlane.f32.xlu1 %v1044_v3 }
 0x4ce   : > { %1435 = vmatmul.msk.bf16.vlgmr.msra.gmra.mxu0 %vm735_vm9, %v1047_v2 }
 0x4d5   : > { %762 = vadd.xlane.f32.xlu1 %v761_v4 }
 0x520   : > { %v952_v5 = vpop.xlane.xlu2 %951 }
 0x521   : > { %1621 = vrcp.f32 %v952_v5 }
 0x527   : > { %v1622_v6 = vpop.eup %1621 }
 0x530   : > { %v857_v8 = vpop.xlane.xlu0 %856 }
 0x531   : > { %v971_v7 = vpop.f32.mrf.mxu2  ;;  %1623 = vrcp.f32 %v857_v8 }
 0x532   : > { %v976_v9 = vmul.f32 %v1622_v6, %v971_v7 }
 0x534   : > { %1076 = vrot.lane.b32.xlu0 %v976_v9, %s1883_s14  ;;  %s1258_s14 = scalar_lea.sflag [#allocation4], %s2086_s27 }
 0x537   : > { %v1624_v12 = vpop.eup %1623 }
 0x539   : > { %v973_v10 = vpop.f32.mrf.mxu2 }
 0x53b   : > { %v877_v13 = vpop.f32.mrf.mxu0 }
 0x53c   : > { %v882_v14 = vmul.f32 %v1624_v12, %v877_v13 }
 0x53e   : > { %1072 = vrot.lane.b32.xlu1 %v882_v14, %s1876_s24 }
 0x540   : > { %v1046_v28 = vpop.xlane.xlu1 %1045 }
 0x541   : > { %1625 = vrcp.f32 %v1046_v28 }
 0x543   : > { %v879_v15 = vpop.f32.mrf.mxu0 }
 0x547   : > { %v1626_v17 = vpop.eup %1625 }
 0x548   : > { %v763_v22 = vpop.xlane.xlu1 %762 }
 0x549   : > { %1627 = vrcp.f32 %v763_v22 }
 0x54b   : > { %v1065_v18 = vpop.f32.mrf.mxu0 }
 0x54c   : > { %v1070_v19 = vmul.f32 %v1626_v17, %v1065_v18 }
 0x54e   : > { %1080 = vrot.lane.b32.xlu0 %v1070_v19, %s1884_s22  ;;  %s1799_s22 = sshra.s32 %s1273_s2, 4  ;;  %s1800_s22 = int_to_ptr.hbm [resolvable:$true] %s1799_s22 }
 0x54f   : > { %v1628_v23 = vpop.eup %1627  ;;  %s1801_s3 = scalar_lea.hbm %s1800_s22, 8  ;;  %p1806_p7 = scmp.lt.s32.totalorder %s1800_s22, %s2389_s21 }
 0x550   : > { %v787_v26 = vmul.f32 %v1628_v23, %v2267_v35  ;;  %p1802_p1 = scmp.ne.s32.totalorder %s1800_s22, %s1801_s3  ;;  %p1807_p8 = scmp.lt.s32.totalorder %s1805_s23, %s1801_s3 }
 0x552   : > { %p1803_p4 = pnand %p1802_p1, %p2055_p5  ;;  %p1808_p9 = por %p1807_p8, %p1806_p7 }
 0x553   : > { %v1067_v20 = vpop.f32.mrf.mxu0 }
 0x554   : > { %p1804_p12 = pneg %p1803_p4 }
 0x556   : > { %p1809_p10 = pnand %p1808_p9, %p1804_p12 }
 0x5a6   : > { %v1077_v24 = vpop.permute.xlu0 %1076 }
 0x5b0   : > { %v1073_v25 = vpop.permute.xlu1 %1072 }
 0x5b1   : > { %v1083_v27 = vsel %vm735_vm9, %v787_v26, %v1073_v25 }
 0x5b2   : > { %v1085_v30 = vsel %vm1084_vm12, %v1083_v27, %v1077_v24 }
 0x5c0   : > { %v1081_v29 = vpop.permute.xlu0 %1080 }
 0x5c1   : > { %v1087_v33 = vsel %vm1086_vm13, %v1085_v30, %v1081_v29 }
 0x5c2   : > { %v1088_v34 = vpack.c.bf16 %v1087_v33, %v1087_v33 }
 0x5c4   : > { %1444 = vmatmul.msk.bf16.vlgmr.msra.gmra.mxu1 %vm570_vm0, %v1088_v34 }
 0x641   : > { %v1121_v38 = vpop.f32.mrf.mxu1 }
 0x642   : > { %v1122_v39 = vadd.f32 %v1605_v37, %v1121_v38 }
 0x644   : > { %v1125_v40 = vadd.f32 %v1122_v39, %v2185_v56 }
 0x646   : > { %v1127_v41 = vmul.f32 %v1125_v40, %v1125_v40 }
 0x648   : > { %v1128_v35 = vsel %vm570_vm0, %v1127_v41, 0.0 }
 0x649   : > { %v1123_v42 = vpop.f32.mrf.mxu1  ;;  %1129 = vadd.xlane.f32.xlu2 %v1128_v35 }
 0x6bc   : > { %v1130_v45 = vpop.xlane.xlu2 %1129 }
 0x6bd   : > { %v1131_v46 = vmul.f32 %v1130_v45, %v2116_v11  ;;  %v1486_v11 = vld [vmem:[%s2362_s13 + $0x18] sm:$0xff] }
 0x6be   : > { %1247 = vmatpush.bf16.msrb.mxu3 %v1486_v11 }
 0x6bf   : > { %v1132_v31 = vadd.f32 1e-06, %v1131_v46 }
 0x6c1   : > { %1629 = vrsqrt.f32 %v1132_v31  ;;  %vm1139_vm15 = vweird.f32 %v1132_v31 }
 0x6c2   : > { %1248 = vmatpush.bf16.msrb.mxu3 %v1485_v57 }
 0x6c6   : > { %1249 = vmatpush.bf16.msrb.mxu3 %v1484_v58 }
 0x6c7   : > { %v1630_v47 = vpop.eup %1629 }
 0x6c8   : > { %v1134_v48 = vmul.f32 %v1630_v47, %v1132_v31  ;;  %vm1140_vm14 = vweird.f32 %v1630_v47 }
 0x6c9   : > { %vm1141_vm1 = vmor %vm1139_vm15, %vm1140_vm14 }
 0x6ca   : > { %v1135_v49 = vmul.f32 %v1630_v47, %v1134_v48  ;;  %1250 = vmatpush.bf16.msrb.mxu3 %v1483_v0 }
 0x6cc   : > { %v1136_v36 = vmul.f32 0.5, %v1135_v49 }
 0x6ce   : > { %v1137_v50 = vsub.f32 1.5, %v1136_v36 }
 0x6d0   : > { %v1138_v56 = vmul.f32 %v1630_v47, %v1137_v50 }
 0x6d2   : > { %v1142_v53 = vsel %vm1141_vm1, %v1630_v47, %v1138_v56 }
 0x6d3   : > { %v1143_v54 = vmul.f32 %v1142_v53, %v1125_v40 }
 0x6d5   : > { %v1147_v55 = vmul.f32 %v1606_v51, %v1143_v54 }
 0x6d7   : > { %v1148_v52 = vpack.c.bf16 %v1147_v55, %v1147_v55 }
 0x6d9   : > { %1453 = vmatmul.msk.bf16.vlgmr.msra.gmra.mxu2 %vm570_vm0, %v1148_v52 }
 0x75c   : > { %v1177_v59 = vpop.f32.mrf.mxu2 }
 0x75d   : > { %1202 = vrot.lane.b32.xlu1 %v1177_v59, %s1892_s26  ;;  %v1181_v16 = vsub.f32 0.0, %v1177_v59 }
 0x75f   : > { %v1182_v61 = vmul.f32 1.442695, %v1181_v16 }
 0x761   : > { %1631 = vpow2.f32 %v1182_v61 }
 0x764   : > { %v1179_v60 = vpop.f32.mrf.mxu2 }
 0x767   : > { %v1632_v62 = vpop.eup %1631 }
 0x768   : > { %v1184_v63 = vadd.f32 1.0, %v1632_v62 }
 0x76a   : > { %1633 = vrcp.f32 %v1184_v63  ;;  %v1196_v6 = vand.u32 2147483648, %v1184_v63  ;;  %vm1190_vm3 = vweird.f32 %v1184_v63  ;;  %v1194_v7 = vand.u32 2147483647, %v1184_v63 }
 0x76c   : > { %v1197_v9 = vor.u32 1.1754944e-38, %v1196_v6  ;;  %vm1195_vm5 = vcmp.eq.f32.partialorder %v1194_v7, 8.507059e+37 }
 0x770   : > { %v1634_v1 = vpop.eup %1633 }
 0x771   : > { %v1186_v2 = vmul.f32 %v1634_v1, %v1184_v63  ;;  %vm1191_vm2 = vweird.f32 %v1634_v1 }
 0x772   : > { %vm1192_vm4 = vmor %vm1190_vm3, %vm1191_vm2 }
 0x773   : > { %v1187_v3 = vsub.f32 1.0, %v1186_v2 }
 0x775   : > { %v1188_v4 = vmul.f32 %v1634_v1, %v1187_v3 }
 0x777   : > { %v1189_v5 = vadd.f32 %v1634_v1, %v1188_v4 }
 0x779   : > { %v1193_v8 = vsel %vm1192_vm4, %v1634_v1, %v1189_v5 }
 0x77a   : > { %v1198_v10 = vsel %vm1195_vm5, %v1197_v9, %v1193_v8 }
 0x77b   : > { %v1200_v12 = vmul.f32 %v1198_v10, %v1177_v59 }
 0x7cf   : > { %v1203_v13 = vpop.permute.xlu1 %1202 }
 0x7d0   : > { %v1205_v14 = vmul.f32 %v1203_v13, %v1200_v12 }
 0x7d2   : > { %v1206_v28 = vpack.c.bf16 %v1205_v14, %v1205_v14 }
 0x7d4   : > { %1470 = vmatmul.msk.bf16.vlgmr.msrb.gmra.mxu3 %vm1239_vm6, %v1206_v28 }
 0x857   : > { %v1252_v15 = vpop.f32.mrf.mxu3 }
 0x858   : > { %v1253_v17 = vadd.f32 %v1252_v15, %v1147_v55 }
 0x85a   : > { %1256 = vst.msk [vmem:[%s559_s19] sm:$0xff] %vm570_vm0, %v1253_v17 }
 0x85b   : > { %1812 = shalt.err (!%p1809_p10)
}
 0x85c   : > { %1505 = dma.vmem_to_hbm [thread:$0]  (%p2055_p5), %s1271_s25, 128, %s1273_s2, %s1258_s14  }
 0x85f   : > { %v1254_v18 = vpop.f32.mrf.mxu3 }
 0x860 PF: > { %s1284_s12 = sand.u32 1, %s1847_s29   ;;  %p2391_p13 = scmp.ge.s32.totalorder %s1859_s16, 2 }
 0x861   : > { %s1285_s24 = scalar_lea.sflag [#allocation4], %s1284_s12 }
 0x862   : > { %p1525_p11 = pnand %p2391_p13, %p2059_p6 }
 0x864   : > { %p1526_p0 = pneg %p1525_p11 }
 0x866   : > { %1842 = dma.done.wait (%p1526_p0), %s1285_s24, 128  }
 0x867   : > { %1844 = vsyncadd (%p1526_p0), %s1285_s24, 4294967168  ;;  %s2392_s16 = sld [smem:[#allocation17_spill]]  ;;  %s2395_s29 = smov %s1851_s30 }
 0x868   : > { %s2393_s15 = sld [smem:[#allocation16_spill]] }
 0x869   : > { %s2394_s17 = sld [smem:[#allocation18_spill]] }
 0x86d   : > { %p29_p2 = scmp.ge.s32.totalorder %s2392_s16, 4  }
 0x86e   : > { %s2396_s30 = smov %s2393_s15 }
 0x86f   : > { %s2397_s15 = smov %s2394_s17  ;;  %31 = sbr.rel (!%p29_p2) target bundleno = 13 (0xd), region = 140 }
 0x874   :  { %1291 = vsyncpa [#allocation3], 1 }
 0x875   :  { %1293 = vsyncpa [#allocation3 + $0x1], 1 }
 0x876   :  { %1294 = vsyncpa [#allocation6], 1 }
 0x877   :  { %1295 = vsyncpa [#allocation9], 1 }
 0x878   :  { %1296 = vsyncpa [#allocation4], 1 }
 0x879   :  { %1298 = vsyncpa [#allocation4 + $0x1], 1 }

// kernel: tpu_custom_call.1
= control target key start
LH: loop header
LB: loop body
LE: loop exit
PB: predicated region body
PF: predicated region fallthrough
CT: control target
= control target key end

     0   :  { %s2349_s0 = inlined_call_operand.vmem [shape: f32[2,8,32], index: 0, kind: input, shape index: {}]   ;;  %s2350_s1 = inlined_call_operand.hbm [shape: s8[2,8,8], index: 1, kind: input, shape index: {}]   ;;  %s2351_s2 = inlined_call_operand.hbm [shape: f32[8,8], index: 2, kind: input, shape index: {}]   ;;  %s2352_s3 = inlined_call_operand.hbm [shape: f32[8,8], index: 3, kind: input, shape index: {}]   ;;  %s2353_s4 = inlined_call_operand.vmem [shape: f32[1,32], index: 4, kind: input, shape index: {}]   ;;  %s2354_s5 = inlined_call_operand.vmem [shape: f32[1,32], index: 5, kind: input, shape index: {}]   ;;  %s2355_s6 = inlined_call_operand.vmem [shape: bf16[32,64], index: 6, kind: input, shape index: {}]   ;;  %s2356_s7 = inlined_call_operand.vmem [shape: f32[1,64], index: 7, kind: input, shape index: {}]   ;;  %s2357_s8 = inlined_call_operand.vmem [shape: bf16[32,32], index: 8, kind: input, shape index: {}]   ;;  %s2358_s9 = inlined_call_operand.vmem [shape: f32[1,32], index: 9, kind: input, shape index: {}]   ;;  %s2359_s10 = inlined_call_operand.hbm [shape: bf16[32,32], index: 10, kind: input, shape index: {}]   ;;  %s2360_s11 = inlined_call_operand.vmem [shape: f32[1,32], index: 11, kind: input, shape index: {}]   ;;  %s2361_s12 = inlined_call_operand.hbm [shape: bf16[32,128], index: 12, kind: input, shape index: {}]   ;;  %s2362_s13 = inlined_call_operand.vmem [shape: bf16[64,32], index: 13, kind: input, shape index: {}]   ;;  %s2363_s14 = inlined_call_operand.hbm [shape: f32[2,8,32], index: 14, kind: output, shape index: {}]  }
   0x1   :  { %2369 = sst [smem:[#allocation20_spill]] %s2351_s2 }
   0x2   :  { %2370 = sst [smem:[#allocation21_spill]] %s2352_s3 }
   0x3   :  { %2371 = sst [smem:[#allocation22_spill]] %s2359_s10 }
   0x4   :  { %2372 = sst [smem:[#allocation23_spill]] %s2361_s12 }
   0x5   :  { %2373 = sst [smem:[#allocation24_spill]] %s2363_s14 }
   0x6   :  { %19 = vsyncpa [#allocation3], 0 }
   0x7   :  { %21 = vsyncpa [#allocation3 + $0x1], 0 }
   0x8   :  { %22 = vsyncpa [#allocation6], 0 }
   0x9   :  { %23 = vsyncpa [#allocation9], 0 }
   0xa   :  { %24 = vsyncpa [#allocation4], 0 }
   0xb   :  { %26 = vsyncpa [#allocation4 + $0x1], 0  ;;  %s1968_s29 = smov 0   ;;  %s1970_s30 = smov 0  }
   0xc   :  { %s1972_s15 = smov 0   ;;  %s1974_s16 = smov 0  }
   0xd LB: > { %2374 = sst [smem:[#allocation16_spill]] %s1855_s15  ;;  %s1992_s20 = sadd.s32 4294967295, %s1859_s16   ;;  %s1859_s16 = sphi %s1974_s16, %s2392_s16   ;;  %s1855_s15 = sphi %s1972_s15, %s2397_s15   ;;  %s1851_s30 = sphi %s1970_s30, %s2396_s30   ;;  %s1847_s29 = sphi %s1968_s29, %s2395_s29  }
   0xe   : > { %s2375_s2 = sld [smem:[#allocation20_spill]]  ;;  %p1394_p0 = scmp.ge.s32.totalorder %s1859_s16, 1 }
   0xf   : > { %p79_p1 = scmp.eq.s32.totalorder %s1992_s20, 0  ;;  %p367_p2 = scmp.lt.s32.totalorder %s1859_s16, 3 }
  0x10   : > { %s1861_s22 = smov [#allocation5]   ;;  %s2377_s10 = sld [smem:[#allocation22_spill]] }
  0x11   : > { %p1997_p3 = pnand %p1394_p0, %p367_p2  ;;  %s381_s23 = sshll.u32 %s1861_s22, 4  ;;  %s382_s23 = int_to_ptr.vmem [resolvable:$true] %s381_s23 }
  0x12   : > { %s1862_s28 = smov [#allocation8]   ;;  %s1863_s18 = smov 64  }
  0x13   : > { %p1507_p5 = pneg %p1997_p3  ;;  %s422_s17 = sshll.u32 %s1862_s28, 4  ;;  %s423_s17 = int_to_ptr.vmem [resolvable:$true] %s422_s17 }
  0x14   : > { %s379_s19 = sshll.u32 %s2375_s2, 4  ;;  %s1864_s22 = smov 4   ;;  %s380_s19 = int_to_ptr.hbm [resolvable:$true] %s379_s19 }
  0x15   : > { %p2009_p6 = pnand %p1507_p5, %p79_p1  ;;  %s2379_s3 = sld [smem:[#allocation21_spill]] }
  0x16   : > { %s420_s26 = sshll.u32 %s2377_s10, 4  ;;  %s1865_s28 = smov [#allocation7]   ;;  %s421_s26 = int_to_ptr.hbm [resolvable:$true] %s420_s26 }
  0x17   : > { %1510 = dma.hbm_to_vmem [thread:$0]  (!%p2009_p6), %s380_s19, 128, %s382_s23, [#allocation6]  }
  0x18   : > { %1516 = dma.hbm_to_vmem [thread:$0]  (!%p2009_p6), %s421_s26, 256, %s423_s17, [#allocation9], %s1863_s18, %s1863_s18, %s1864_s22  }
  0x19   : > { %s393_s10 = sshll.u32 %s1865_s28, 4  ;;  %s2380_s12 = sld [smem:[#allocation23_spill]]  ;;  %s394_s10 = int_to_ptr.vmem [resolvable:$true] %s393_s10 }
  0x1a   : > { %s1866_s26 = smov [#allocation10]   ;;  %s1393_s24 = sadd.s32 4294967294, %s1859_s16  }
  0x1b   : > { %s391_s2 = sshll.u32 %s2379_s3, 4  ;;  %s439_s17 = sshll.u32 %s1866_s26, 4  ;;  %s392_s2 = int_to_ptr.hbm [resolvable:$true] %s391_s2  ;;  %s440_s17 = int_to_ptr.vmem [resolvable:$true] %s439_s17 }
  0x1c   : > { %1513 = dma.hbm_to_vmem [thread:$0]  (!%p2009_p6), %s392_s2, 128, %s394_s10, [#allocation6]  }
  0x1d   : > { %s2029_s25 = sadd.s32 1, %s1859_s16   ;;  %s65_s19 = sadd.s32 1, %s1855_s15 }
  0x1e   : > { %2381 = sst [smem:[#allocation17_spill]] %s2029_s25  ;;  %s62_s28 = ssub.s32 %s1859_s16, %s2029_s25 }
  0x1f   : > { %s437_s14 = sshll.u32 %s2380_s12, 4  ;;  %p63_p7 = scmp.eq.s32.totalorder %s62_s28, 0  ;;  %s438_s14 = int_to_ptr.hbm [resolvable:$true] %s437_s14 }
  0x20   : > { %1519 = dma.hbm_to_vmem [thread:$0]  (!%p2009_p6), %s438_s14, 256, %s440_s17, [#allocation9], %s1863_s18, %s1863_s18, %s1864_s22  }
  0x21   : > { %p72_p8 = scmp.ne.s32.totalorder %s1855_s15, %s1851_s30  ;;  %p73_p9 = scmp.eq.s32.totalorder %s1859_s16, 0 }
  0x22   : > { %p78_p10 = scmp.ne.s32.totalorder %s1851_s30, %s1847_s29  ;;  %p354_p13 = scmp.eq.s32.totalorder %s1992_s20, 1 }
  0x23   : > { %s2040_s2 = scalar_select %p63_p7, %s1855_s15, %s65_s19  }
  0x24   : > { %p2042_p11 = por %p73_p9, %p72_p8  ;;  %p2048_p12 = por %p79_p1, %p78_p10 }
  0x25   : > { %2382 = sst [smem:[#allocation18_spill]] %s2040_s2  ;;  %p360_p0 = scmp.eq.s32.totalorder %s1393_s24, 1 }
  0x26   : > { %p1532_p2 = scmp.lt.s32.totalorder %s1859_s16, 2  ;;  %s463_s27 = sand.u32 1, %s1855_s15  }
  0x27   : > { %p2055_p5 = por %p354_p13, %p72_p8  ;;  %p2059_p6 = por %p360_p0, %p78_p10 }
  0x28   : > { %s1400_s23 = sshll.u32 %s463_s27, 1  ;;  %s1401_s26 = sshll.u32 %s1859_s16, 1 }
  0x29   : > { %s2386_s22 = scalar_select %p2059_p6, 1, 0 }
  0x2a   : > { %s471_s19 = scalar_lea.hbm %s2350_s1, %s1401_s26  ;;  %s467_s3 = scalar_lea.vmem [#allocation2], %s1400_s23 }
  0x2b   : > { %2387 = sst [smem:[#allocation19_spill]] %s2386_s22  ;;  %s475_s12 = sshll.u32 %s467_s3, 4  ;;  %s476_s12 = int_to_ptr.vmem [resolvable:$true] %s475_s12 }
  0x2c   : > { %s473_s2 = sshll.u32 %s471_s19, 4  ;;  %p2069_p7 = pnand %p1532_p2, %p2042_p11  ;;  %s474_s2 = int_to_ptr.hbm [resolvable:$true] %s473_s2 }
  0x2d   : > { %s464_s15 = scalar_lea.sflag [#allocation3], %s463_s27  ;;  %s1755_s25 = sshra.s32 %s474_s2, 4  ;;  %s1756_s25 = int_to_ptr.hbm [resolvable:$true] %s1755_s25 }
  0x2e   : > { %s1757_s22 = scalar_lea.hbm %s1756_s25, 2  ;;  %p1759_p9 = pneg %p2069_p7 }
  0x2f   : > { %p1758_p8 = scmp.ne.s32.totalorder %s1756_s25, %s1757_s22  ;;  %s1762_s26 = scalar_lea.hbm %s2350_s1, 4 }
  0x30   : > { %p1763_p11 = scmp.lt.s32.totalorder %s1756_s25, %s2350_s1  ;;  %p1764_p0 = scmp.lt.s32.totalorder %s1762_s26, %s1757_s22 }
  0x31   : > { %p1760_p10 = pnand %p1759_p9, %p1758_p8 }
  0x32   : > { %p1765_p2 = por %p1764_p0, %p1763_p11 }
  0x33   : > { %p1761_p13 = pneg %p1760_p10 }
  0x35   : > { %p1766_p4 = pnand %p1765_p2, %p1761_p13 }
  0x37   : > { %1769 = shalt.err (!%p1766_p4)
}
  0x38   : > { %1523 = dma.hbm_to_vmem [thread:$0]  (!%p2069_p7), %s474_s2, 32, %s476_s12, %s464_s15  }
  0x39   : > { %484 = sbr.rel (%p1997_p3) target bundleno = 2144 (0x860), region = 76  ;;  %s2086_s27 = sand.u32 (!%p1997_p3), 1, %s1851_s30  }
  0x3a   : > { %s1403_s28 = sshll.u32 (!%p1997_p3), %s2086_s27, 1  ;;  %s487_s19 = scalar_lea.sflag (!%p1997_p3), [#allocation3], %s2086_s27 }
  0x3b   : > { %s2090_s23 = scalar_lea.vmem (!%p1997_p3), [#allocation2], %s1403_s28 }
  0x3e   : > { %1830 = dma.done.wait (%p2048_p12), %s487_s19, 32  }
  0x3f   : > { %1832 = vsyncadd (%p2048_p12), %s487_s19, 4294967264 }
  0x40   : > { %1834 = dma.done.wait (%p79_p1), [#allocation6], 256  }
  0x41   : > { %1836 = vsyncadd (%p79_p1), [#allocation6], 4294967040 }
  0x42   : > { %1838 = dma.done.wait (%p79_p1), [#allocation9], 512  }
  0x43   : > { %1840 = vsyncadd (%p79_p1), [#allocation9], 4294966784  ;;  %p560_p3 = scmp.lt.s32.totalorder %s1992_s20, 1  ;;  %vm570_vm0 = vcmask 261120   ;;  %v1867_v3 = vmov 32.0   ;;  %v1476_v7 = vld [vmem:[%s2355_s6 + $0x8] sm:$0xff] }
  0x44   : > { %1607 = vrcp.f32 %v1867_v3  ;;  %651 = vmatpush.bf16.msra.mxu0 %v1476_v7  ;;  %v1475_v9 = vld [vmem:[%s2355_s6] sm:$0xff]  ;;  %s1868_s19 = smov 100   ;;  %s1871_s21 = smov 124   ;;  %vm704_vm5 = vcmask 31744   ;;  %v2171_v36 = vld [vmem:[#allocation7] sm:$0xff]  ;;  %vm735_vm9 = vcmask 64512  }
  0x45   : > { %s561_s12 = scalar_select %p560_p3, %s1992_s20, 1  ;;  %v2122_v21 = vld [vmem:[%s2353_s4] ss:$0 sm:$0xff]  ;;  %v2141_v31 = vld [vmem:[#allocation5] sm:$0xff]  ;;  %vm769_vm10 = vcmask 1043456   ;;  %vm1084_vm12 = vcmask 130048  }
  0x46   : > { %v1603_v26 = vld [vmem:[%s2356_s7] ss:$0 sm:$0xff]  ;;  %s1872_s25 = smov 84   ;;  %s1874_s14 = smov 116   ;;  %v1478_v42 = vld [vmem:[%s2357_s8 + $0x8] sm:$0xff]  ;;  %vm1086_vm13 = vcmask 195584  }
  0x47   : > { %s1409_s15 = sshll.u32 %s561_s12, 3  ;;  %s1869_s12 = smov 92   ;;  %687 = vmatpush.bf16.msra.mxu1 %v1478_v42  ;;  %v1477_v44 = vld [vmem:[%s2357_s8] sm:$0xff] }
  0x48   : > { %s563_s2 = scalar_lea.vmem %s2349_s0, %s1409_s15  ;;  %652 = vmatpush.bf16.msra.mxu0 %v1475_v9  ;;  %s1870_s15 = smov 32  }
  0x49   : > { %v565_v0 = vld [vmem:[%s563_s2] sm:$0xff]  ;;  %s1873_s2 = smov 76   ;;  %s1875_s22 = smov 40  }
  0x4a   : > { %v569_v1 = vmul.f32 %v565_v0, %v565_v0  ;;  %v1608_v4 = vpop.eup %1607  ;;  %s1876_s24 = smov 8   ;;  %s1877_s3 = smov 48  }
  0x4b   : > { %v575_v5 = vmul.f32 32.0, %v1608_v4  ;;  %vm579_vm1 = vweird.f32 %v1608_v4  ;;  %s1878_s26 = smov 108   ;;  %688 = vmatpush.bf16.msra.mxu1 %v1477_v44  ;;  %s1881_s17 = smov 68  }
  0x4c   : > { %v571_v2 = vsel %vm570_vm0, %v569_v1, 0.0  ;;  %s1889_s10 = smov 72   ;;  %s1890_s28 = smov 112  }
  0x4d   : > { %572 = vadd.xlane.f32.xlu0 %v571_v2  ;;  %v576_v6 = vsub.f32 1.0, %v575_v5 }
  0x4f   : > { %v577_v8 = vmul.f32 %v1608_v4, %v576_v6 }
  0x51   : > { %v578_v10 = vadd.f32 %v1608_v4, %v577_v8 }
  0x53   : > { %v2116_v11 = vsel %vm579_vm1, %v1608_v4, %v578_v10 }
  0xc0   : > { %v573_v12 = vpop.xlane.xlu0 %572 }
  0xc1   : > { %v581_v13 = vmul.f32 %v2116_v11, %v573_v12  ;;  %v1604_v12 = vld [vmem:[%s2358_s9] ss:$0 sm:$0xff] }
  0xc3   : > { %v582_v14 = vadd.f32 1e-06, %v581_v13 }
  0xc5   : > { %1609 = vrsqrt.f32 %v582_v14  ;;  %vm589_vm3 = vweird.f32 %v582_v14 }
  0xcb   : > { %v1610_v15 = vpop.eup %1609 }
  0xcc   : > { %v584_v16 = vmul.f32 %v1610_v15, %v582_v14  ;;  %vm590_vm2 = vweird.f32 %v1610_v15 }
  0xcd   : > { %vm591_vm4 = vmor %vm589_vm3, %vm590_vm2 }
  0xce   : > { %v585_v17 = vmul.f32 %v1610_v15, %v584_v16 }
  0xd0   : > { %v586_v18 = vmul.f32 0.5, %v585_v17 }
  0xd2   : > { %v587_v19 = vsub.f32 1.5, %v586_v18 }
  0xd4   : > { %v588_v20 = vmul.f32 %v1610_v15, %v587_v19 }
  0xd6   : > { %v592_v22 = vsel %vm591_vm4, %v1610_v15, %v588_v20 }
  0xd7   : > { %v593_v23 = vmul.f32 %v592_v22, %v565_v0 }
  0xd9   : > { %v2125_v24 = vmul.f32 %v2122_v21, %v593_v23 }
  0xdb   : > { %v616_v25 = vpack.c.bf16 %v2125_v24, %v2125_v24  ;;  %v598_v34 = vmul.f32 %v2125_v24, %v2125_v24 }
  0xdd   : > { %1418 = vmatmul.msk.bf16.vlgmr.msra.gmra.mxu0 %vm570_vm0, %v616_v25  ;;  %v599_v35 = vsel %vm570_vm0, %v598_v34, 0.0 }
 0x15a   : > { %v654_v27 = vpop.f32.mrf.mxu0 }
 0x15b   : > { %v2133_v28 = vadd.f32 %v1603_v26, %v654_v27 }
 0x15d   : > { %715 = vrot.lane.b32.xlu1 %v2133_v28, %s1868_s19  ;;  %v2138_v29 = vsub.f32 0.0, %v2133_v28  ;;  %v2147_v32 = vmul.f32 0.35355338, %v2133_v28 }
 0x15f   : > { %711 = vrot.lane.b32.xlu0 %v2138_v29, %s1869_s12  ;;  %v2150_v33 = vsub.f32 0.0, %v2147_v32  ;;  %v706_v4 = vmul.f32 %v2147_v32, %v2141_v31 }
 0x162   : > { %v656_v30 = vpop.f32.mrf.mxu0 }
 0x165   : > { %720 = vrot.lane.b32.xlu1 %v2141_v31, %s1870_s15 }
 0x167   : > { %808 = vrot.lane.b32.xlu0 %v2133_v28, %s1869_s12  ;;  %s1891_s12 = smov 104  }
 0x16d   : > { %697 = vrot.lane.b32.xlu1 %v2150_v33, %s1871_s21 }
 0x16f   : > { %791 = vrot.lane.b32.xlu0 %v2147_v32, %s1871_s21  ;;  %s1880_s21 = smov 4  }
 0x177   : > { %903 = vrot.lane.b32.xlu0 %v2133_v28, %s1872_s25 }
 0x17f   : > { %997 = vrot.lane.b32.xlu0 %v2133_v28, %s1873_s2 }
 0x187   : > { %886 = vrot.lane.b32.xlu0 %v2147_v32, %s1874_s14 }
 0x18f   : > { %812 = vrot.lane.b32.xlu0 %v2141_v31, %s1875_s22 }
 0x197   : > { %795 = vrot.lane.b32.xlu0 %v2141_v31, %s1876_s24  ;;  %600 = vadd.xlane.f32.xlu1 %v599_v35 }
 0x19f   : > { %907 = vrot.lane.b32.xlu0 %v2141_v31, %s1877_s3 }
 0x1b0   : > { %980 = vrot.lane.b32.xlu1 %v2147_v32, %s1878_s26 }
 0x1cf   : > { %v716_v37 = vpop.permute.xlu1 %715 }
 0x1d1   : > { %v712_v38 = vpop.permute.xlu0 %711 }
 0x1d2   : > { %v718_v39 = vsel %vm704_vm5, %v712_v38, %v716_v37 }
 0x1d3   : > { %v724_v40 = vmul.f32 %v718_v39, %v2171_v36 }
 0x1d5   : > { %726 = vrot.lane.b32.xlu2 %v724_v40, %s1870_s15  ;;  %s1879_s15 = smov 96  }
 0x1d7   : > { %v721_v41 = vpop.permute.xlu1 %720 }
 0x1d8   : > { %v723_v58 = vmul.f32 %v721_v41, %v2133_v28 }
 0x1d9   : > { %v809_v0 = vpop.permute.xlu0 %808 }
 0x1df   : > { %v698_v43 = vpop.permute.xlu1 %697 }
 0x1e1   : > { %v792_v9 = vpop.permute.xlu0 %791 }
 0x1e9   : > { %v904_v20 = vpop.permute.xlu0 %903 }
 0x1f1   : > { %v998_v25 = vpop.permute.xlu0 %997 }
 0x1f9   : > { %v887_v30 = vpop.permute.xlu0 %886 }
 0x201   : > { %v813_v41 = vpop.permute.xlu0 %812 }
 0x202   : > { %v815_v42 = vmul.f32 %v813_v41, %v2133_v28 }
 0x20a   : > { %v601_v45 = vpop.xlane.xlu1 %600 }
 0x20b   : > { %v602_v46 = vmul.f32 %v601_v45, %v2116_v11 }
 0x20d   : > { %v603_v47 = vadd.f32 1e-06, %v602_v46  ;;  %v796_v46 = vpop.permute.xlu0 %795 }
 0x20f   : > { %1611 = vrsqrt.f32 %v603_v47  ;;  %vm610_vm7 = vweird.f32 %v603_v47 }
 0x215   : > { %v1612_v48 = vpop.eup %1611 }
 0x216   : > { %v605_v49 = vmul.f32 %v1612_v48, %v603_v47  ;;  %vm611_vm6 = vweird.f32 %v1612_v48 }
 0x217   : > { %vm612_vm8 = vmor %vm610_vm7, %vm611_vm6  ;;  %vm1239_vm6 = vcmask 523264  }
 0x218   : > { %v606_v50 = vmul.f32 %v1612_v48, %v605_v49 }
 0x21a   : > { %v607_v51 = vmul.f32 0.5, %v606_v50 }
 0x21c   : > { %v608_v52 = vsub.f32 1.5, %v607_v51  ;;  %v1887_v51 = vmov 0.0  }
 0x21e   : > { %v609_v53 = vmul.f32 %v1612_v48, %v608_v52 }
 0x220   : > { %v613_v54 = vsel %vm612_vm8, %v1612_v48, %v609_v53  ;;  %v908_v53 = vpop.permute.xlu0 %907 }
 0x221   : > { %v614_v55 = vmul.f32 %v613_v54, %v2125_v24 }
 0x222   : > { %v981_v37 = vpop.permute.xlu1 %980 }
 0x223   : > { %v2185_v56 = vmul.f32 %v2122_v21, %v614_v55 }
 0x225   : > { %v617_v57 = vpack.c.bf16 %v2185_v56, %v2185_v56 }
 0x227   : > { %1427 = vmatmul.msk.bf16.vlgmr.msra.gmra.mxu1 %vm570_vm0, %v617_v57  ;;  %v910_v57 = vmul.f32 %v908_v53, %v2133_v28 }
 0x22f   : > { %v727_v59 = vpop.permute.xlu2 %726 }
 0x230   : > { %v729_v60 = vadd.f32 %v727_v59, %v723_v58 }
 0x232   : > { %v731_v61 = vpack.c.bf16 %v729_v60, %v729_v60 }
 0x234   : > { %733 = vrot.lane.b32.xlu2 %v731_v61, %s1879_s15 }
 0x23c   : > { %701 = vrot.lane.b32.xlu2 %v2147_v32, %s1880_s21  ;;  %s2389_s21 = sld [smem:[#allocation24_spill]] }
 0x244   : > { %805 = vrot.lane.b32.xlu2 %v2138_v29, %s1872_s25 }
 0x24c   : > { %788 = vrot.lane.b32.xlu2 %v2150_v33, %s1874_s14  ;;  %s1883_s14 = smov 16  }
 0x254   : > { %900 = vrot.lane.b32.xlu2 %v2138_v29, %s1873_s2  ;;  %s1882_s2 = smov 56  }
 0x25c   : > { %994 = vrot.lane.b32.xlu2 %v2138_v29, %s1881_s17 }
 0x264   : > { %883 = vrot.lane.b32.xlu2 %v2150_v33, %s1878_s26  ;;  %s1886_s26 = smov 120  }
 0x26c   : > { %977 = vrot.lane.b32.xlu2 %v2150_v33, %s1868_s19 }
 0x28e   : > { %v734_v62 = vpop.permute.xlu2 %733 }
 0x28f   : > { %v740_v63 = vsel %vm735_vm9, %v734_v62, 0 }
 0x290   : > { %749 = vmatpush.bf16.xpose.msra.mxu2 %v740_v63 }
 0x296   : > { %v702_v1 = vpop.permute.xlu2 %701 }
 0x297   : > { %v705_v2 = vsel %vm704_vm5, %v698_v43, %v702_v1 }
 0x298   : > { %v707_v3 = vmul.f32 %v705_v2, %v2171_v36 }
 0x29a   : > { %v708_v5 = vadd.f32 %v707_v3, %v706_v4 }
 0x29c   : > { %v730_v6 = vpack.c.bf16 %v708_v5, %v708_v5 }
 0x29e   : > { %v806_v7 = vpop.permute.xlu2 %805  ;;  %1428 = vmatmul.msk.bf16.vlgmr.msra.gmra.mxu2 %vm735_vm9, %v730_v6 }
 0x29f   : > { %v811_v8 = vsel %vm704_vm5, %v806_v7, %v809_v0 }
 0x2a0   : > { %v816_v10 = vmul.f32 %v811_v8, %v2171_v36 }
 0x2a2   : > { %818 = vrot.lane.b32.xlu2 %v816_v10, %s1875_s22  ;;  %s1884_s22 = smov 24  }
 0x2a4   : > { %v690_v13 = vpop.f32.mrf.mxu1 }
 0x2a5   : > { %v691_v14 = vadd.f32 %v1604_v12, %v690_v13 }
 0x2a6   : > { %v789_v15 = vpop.permute.xlu2 %788 }
 0x2a7   : > { %v2215_v16 = vpack.c.bf16 %v691_v14, %v691_v14  ;;  %v794_v17 = vsel %vm704_vm5, %v789_v15, %v792_v9 }
 0x2a8   : > { %v799_v18 = vmul.f32 %v794_v17, %v2171_v36 }
 0x2a9   : > { %v771_v19 = vsel %vm769_vm10, %v2215_v16, 0 }
 0x2aa   : > { %801 = vrot.lane.b32.xlu2 %v799_v18, %s1876_s24  ;;  %780 = vmatpush.bf16.msra.mxu3 %v771_v19 }
 0x2ac   : > { %v692_v21 = vpop.f32.mrf.mxu1 }
 0x2ae   : > { %v901_v22 = vpop.permute.xlu2 %900 }
 0x2af   : > { %v906_v23 = vsel %vm704_vm5, %v901_v22, %v904_v20 }
 0x2b0   : > { %v911_v24 = vmul.f32 %v906_v23, %v2171_v36 }
 0x2b2   : > { %1001 = vrot.lane.b32.xlu2 %v2141_v31, %s1882_s2  ;;  %913 = vrot.lane.b32.xlu1 %v911_v24, %s1877_s3  ;;  %s1885_s3 = smov 88  }
 0x2b6   : > { %v995_v26 = vpop.permute.xlu2 %994 }
 0x2b7   : > { %v1000_v27 = vsel %vm704_vm5, %v995_v26, %v998_v25 }
 0x2b8   : > { %v1005_v29 = vmul.f32 %v1000_v27, %v2171_v36 }
 0x2ba   : > { %1007 = vrot.lane.b32.xlu0 %v1005_v29, %s1882_s2  ;;  %890 = vrot.lane.b32.xlu1 %v2141_v31, %s1883_s14 }
 0x2be   : > { %v884_v33 = vpop.permute.xlu2 %883 }
 0x2bf   : > { %v889_v34 = vsel %vm704_vm5, %v884_v33, %v887_v30 }
 0x2c0   : > { %v894_v35 = vmul.f32 %v889_v34, %v2171_v36 }
 0x2c2   : > { %984 = vrot.lane.b32.xlu0 %v2141_v31, %s1884_s22  ;;  %896 = vrot.lane.b32.xlu1 %v894_v35, %s1883_s14  ;;  %v798_v31 = vmul.f32 %v796_v46, %v2147_v32 }
 0x2c6   : > { %v978_v38 = vpop.permute.xlu2 %977 }
 0x2c7   : > { %v983_v39 = vsel %vm704_vm5, %v978_v38, %v981_v37 }
 0x2c8   : > { %v988_v40 = vmul.f32 %v983_v39, %v2171_v36  ;;  %v618_v36 = vld [vmem:[%s2090_s23] sm:$0x3]  ;;  %s1888_s23 = smov 80  }
 0x2c9   : > { %v619_v50 = vunpack.c.0.s8 %v618_v36 }
 0x2ca   : > { %990 = vrot.lane.b32.xlu0 %v988_v40, %s1884_s22 }
 0x2cb   : > { %vm620_vm11 = vcmp.eq.s32.totalorder %v619_v50, 0 }
 0x2cc   : > { %v2242_v52 = vsel %vm620_vm11, -1e+30, %v1887_v51 }
 0x2fc   : > { %v819_v43 = vpop.permute.xlu2 %818 }
 0x2fd   : > { %v821_v44 = vadd.f32 %v819_v43, %v815_v42 }
 0x2ff   : > { %v823_v45 = vpack.c.bf16 %v821_v44, %v821_v44 }
 0x301   : > { %828 = vrot.lane.b32.xlu1 %v823_v45, %s1885_s3 }
 0x304   : > { %v802_v47 = vpop.permute.xlu2 %801 }
 0x305   : > { %v804_v48 = vadd.f32 %v802_v47, %v798_v31 }
 0x307   : > { %v822_v49 = vpack.c.bf16 %v804_v48, %v804_v48 }
 0x309   : > { %825 = vrot.lane.b32.xlu0 %v822_v49, %s1886_s26 }
 0x30c   : > { %v1002_v62 = vpop.permute.xlu2 %1001 }
 0x30d   : > { %v1004_v0 = vmul.f32 %v1002_v62, %v2133_v28 }
 0x321   : > { %v751_v54 = vpop.f32.mrf.mxu2 }
 0x322   : > { %v752_v55 = vadd.f32 %v751_v54, %v2242_v52 }
 0x324   : > { %v914_v58 = vpop.permute.xlu1 %913  ;;  %v755_v59 = vsel %vm735_vm9, %v752_v55, -inf }
 0x325   : > { %v916_v60 = vadd.f32 %v914_v58, %v910_v57  ;;  %756 = vmax.xlane.f32.xlu2 %v755_v59 }
 0x327   : > { %v918_v61 = vpack.c.bf16 %v916_v60, %v916_v60 }
 0x329   : > { %v753_v63 = vpop.f32.mrf.mxu2  ;;  %923 = vrot.lane.b32.xlu1 %v918_v61, %s1888_s23  ;;  %s1805_s23 = scalar_lea.hbm %s2389_s21, 16 }
 0x32c   : > { %v1008_v1 = vpop.permute.xlu0 %1007  ;;  %v891_v2 = vpop.permute.xlu1 %890 }
 0x32d   : > { %v1010_v3 = vadd.f32 %v1008_v1, %v1004_v0  ;;  %v893_v5 = vmul.f32 %v891_v2, %v2147_v32 }
 0x32f   : > { %v1012_v4 = vpack.c.bf16 %v1010_v3, %v1010_v3 }
 0x331   : > { %1017 = vrot.lane.b32.xlu0 %v1012_v4, %s1889_s10 }
 0x334   : > { %v985_v6 = vpop.permute.xlu0 %984  ;;  %v897_v7 = vpop.permute.xlu1 %896 }
 0x335   : > { %v899_v8 = vadd.f32 %v897_v7, %v893_v5  ;;  %v987_v10 = vmul.f32 %v985_v6, %v2147_v32 }
 0x337   : > { %v917_v9 = vpack.c.bf16 %v899_v8, %v899_v8 }
 0x339   : > { %920 = vrot.lane.b32.xlu1 %v917_v9, %s1890_s28 }
 0x33c   : > { %v991_v12 = vpop.permute.xlu0 %990 }
 0x33d   : > { %v993_v13 = vadd.f32 %v991_v12, %v987_v10 }
 0x33f   : > { %v1011_v14 = vpack.c.bf16 %v993_v13, %v993_v13 }
 0x341   : > { %1014 = vrot.lane.b32.xlu0 %v1011_v14, %s1891_s12 }
 0x349   : > { %860 = vrot.lane.b32.xlu0 %v2215_v16, %s1886_s26  ;;  %s1892_s26 = smov 64  }
 0x351   : > { %954 = vrot.lane.b32.xlu0 %v2215_v16, %s1890_s28  ;;  %s1472_s28 = sshll.u32 %s1992_s20, 3 }
 0x352   : > { %s1268_s17 = scalar_lea.hbm %s2389_s21, %s1472_s28 }
 0x353   : > { %s1272_s2 = sshll.u32 %s1268_s17, 4  ;;  %s1273_s2 = int_to_ptr.hbm [resolvable:$true] %s1272_s2 }
 0x373   : > { %v829_v28 = vpop.permute.xlu1 %828 }
 0x374   : > { %v834_v15 = vsel %vm735_vm9, %v829_v28, 0 }
 0x375   : > { %843 = vmatpush.bf16.xpose.msrb.mxu3 %v834_v15 }
 0x37b   : > { %v826_v19 = vpop.permute.xlu0 %825 }
 0x398   : > { %v757_v17 = vpop.xlane.xlu2 %756 }
 0x399   : > { %v758_v18 = vsub.f32 %v752_v55, %v757_v17 }
 0x39b   : > { %v759_v20 = vmul.f32 1.442695, %v758_v18  ;;  %v924_v32 = vpop.permute.xlu1 %923 }
 0x39c   : > { %v929_v21 = vsel %vm735_vm9, %v924_v32, 0  ;;  %v1480_v32 = vld [vmem:[#allocation8 + $0x8] sm:$0xff] }
 0x39d   : > { %1613 = vpow2.f32 %v759_v20  ;;  %938 = vmatpush.bf16.xpose.msrb.mxu1 %v929_v21  ;;  %v1479_v21 = vld [vmem:[#allocation8] sm:$0xff] }
 0x3a3   : > { %v2256_v22 = vpop.eup %1613  ;;  %v1018_v23 = vpop.permute.xlu0 %1017 }
 0x3a4   : > { %v1023_v24 = vsel %vm735_vm9, %v1018_v23, 0  ;;  %v764_v25 = vpack.c.bf16 %v2256_v22, %v2256_v22  ;;  %v761_v4 = vsel %vm735_vm9, %v2256_v22, 0.0 }
 0x3a5   : > { %1118 = vmatpush.bf16.msra.mxu1 %v1480_v32 }
 0x3a6   : > { %1429 = vmatmul.msk.bf16.vlgmr.msra.gmra.mxu3 %vm735_vm9, %v764_v25 }
 0x3a7   : > { %1032 = vmatpush.bf16.xpose.msra.mxu3 %v1023_v24 }
 0x3a9   : > { %1119 = vmatpush.bf16.msra.mxu1 %v1479_v21 }
 0x3ab   : > { %v921_v26 = vpop.permute.xlu1 %920 }
 0x3ac   : > { %1432 = vmatmul.msk.bf16.vlgmr.msrb.gmra.mxu1 %vm735_vm9, %v921_v26 }
 0x3b3   : > { %v1015_v27 = vpop.permute.xlu0 %1014 }
 0x3b6   : > { %1430 = vmatmul.msk.bf16.vlgmr.msrb.gmra.mxu3 %vm735_vm9, %v826_v19 }
 0x3bb   : > { %v861_v29 = vpop.permute.xlu0 %860 }
 0x3bc   : > { %v866_v30 = vsel %vm769_vm10, %v861_v29, 0 }
 0x3bd   : > { %875 = vmatpush.bf16.msrb.mxu0 %v866_v30 }
 0x3c3   : > { %v955_v33 = vpop.permute.xlu0 %954 }
 0x3c4   : > { %v960_v34 = vsel %vm769_vm10, %v955_v33, 0 }
 0x3c5   : > { %969 = vmatpush.bf16.msrb.mxu2 %v960_v34 }
 0x3c6   : > { %1434 = vmatmul.msk.bf16.vlgmr.msra.gmra.mxu3 %vm735_vm9, %v1015_v27 }
 0x429   : > { %v2267_v35 = vpop.f32.mrf.mxu3  ;;  %v940_v37 = vpop.f32.mrf.mxu1 }
 0x42a   : > { %v941_v38 = vadd.f32 %v940_v37, %v2242_v52  ;;  %v1605_v37 = vld [vmem:[%s2360_s11] ss:$0 sm:$0xff] }
 0x42c   : > { %v944_v39 = vsel %vm735_vm9, %v941_v38, -inf }
 0x42d   : > { %945 = vmax.xlane.f32.xlu1 %v944_v39 }
 0x431   : > { %v784_v40 = vpop.f32.mrf.mxu3  ;;  %v942_v41 = vpop.f32.mrf.mxu1 }
 0x439   : > { %v845_v42 = vpop.f32.mrf.mxu3 }
 0x43a   : > { %v846_v43 = vadd.f32 %v845_v42, %v2242_v52 }
 0x43c   : > { %v849_v44 = vsel %vm735_vm9, %v846_v43, -inf }
 0x43d   : > { %850 = vmax.xlane.f32.xlu2 %v849_v44  ;;  %v1481_v44 = vld [vmem:[#allocation10] sm:$0xff] }
 0x441   : > { %v847_v45 = vpop.f32.mrf.mxu3 }
 0x449   : > { %v1034_v46 = vpop.f32.mrf.mxu3 }
 0x44a   : > { %v1035_v31 = vadd.f32 %v1034_v46, %v2242_v52 }
 0x44c   : > { %v1038_v47 = vsel %vm735_vm9, %v1035_v31, -inf }
 0x44d   : > { %1039 = vmax.xlane.f32.xlu2 %v1038_v47 }
 0x451   : > { %v1036_v48 = vpop.f32.mrf.mxu3 }
 0x465   : > { %1048 = vrot.lane.b32.xlu2 %v2215_v16, %s1891_s12  ;;  %s1408_s12 = sshll.u32 %s2086_s27, 3 }
 0x466   : > { %s559_s19 = scalar_lea.vmem [#allocation11], %s1408_s12 }
 0x467   : > { %s1270_s25 = sshll.u32 %s559_s19, 4  ;;  %s1271_s25 = int_to_ptr.vmem [resolvable:$true] %s1270_s25 }
 0x4a0   : > { %v946_v49 = vpop.xlane.xlu1 %945 }
 0x4a1   : > { %v947_v36 = vsub.f32 %v941_v38, %v946_v49 }
 0x4a3   : > { %v948_v50 = vmul.f32 1.442695, %v947_v36 }
 0x4a5   : > { %1615 = vpow2.f32 %v948_v50 }
 0x4ab   : > { %v1616_v51 = vpop.eup %1615 }
 0x4ac   : > { %v950_v53 = vsel %vm735_vm9, %v1616_v51, 0.0  ;;  %v953_v54 = vpack.c.bf16 %v1616_v51, %v1616_v51  ;;  %v1606_v51 = vld [vmem:[%s2354_s5] ss:$0 sm:$0xff] }
 0x4ad   : > { %951 = vadd.xlane.f32.xlu2 %v950_v53 }
 0x4ae   : > { %1433 = vmatmul.msk.bf16.vlgmr.msrb.gmra.mxu2 %vm735_vm9, %v953_v54 }
 0x4b0   : > { %v851_v55 = vpop.xlane.xlu2 %850 }
 0x4b1   : > { %v852_v52 = vsub.f32 %v846_v43, %v851_v55  ;;  %v1482_v43 = vld [vmem:[#allocation10 + $0x8] sm:$0xff] }
 0x4b2   : > { %1174 = vmatpush.bf16.msra.mxu2 %v1482_v43 }
 0x4b3   : > { %v853_v57 = vmul.f32 1.442695, %v852_v52 }
 0x4b5   : > { %1617 = vpow2.f32 %v853_v57  ;;  %v1485_v57 = vld [vmem:[%s2362_s13 + $0x10] sm:$0xff] }
 0x4b6   : > { %1175 = vmatpush.bf16.msra.mxu2 %v1481_v44 }
 0x4bb   : > { %v1618_v58 = vpop.eup %1617 }
 0x4bc   : > { %v855_v59 = vsel %vm735_vm9, %v1618_v58, 0.0  ;;  %v858_v60 = vpack.c.bf16 %v1618_v58, %v1618_v58  ;;  %v1484_v58 = vld [vmem:[%s2362_s13 + $0x8] sm:$0xff] }
 0x4bd   : > { %856 = vadd.xlane.f32.xlu0 %v855_v59 }
 0x4be   : > { %1431 = vmatmul.msk.bf16.vlgmr.msrb.gmra.mxu0 %vm735_vm9, %v858_v60 }
 0x4c0   : > { %v1040_v16 = vpop.xlane.xlu2 %1039 }
 0x4c1   : > { %v1041_v61 = vsub.f32 %v1035_v31, %v1040_v16 }
 0x4c3   : > { %v1042_v62 = vmul.f32 1.442695, %v1041_v61 }
 0x4c5   : > { %1619 = vpow2.f32 %v1042_v62 }
 0x4c8   : > { %v1049_v63 = vpop.permute.xlu2 %1048 }
 0x4c9   : > { %v1054_v0 = vsel %vm769_vm10, %v1049_v63, 0 }
 0x4ca   : > { %1063 = vmatpush.bf16.msra.mxu0 %v1054_v0  ;;  %v1483_v0 = vld [vmem:[%s2362_s13] sm:$0xff] }
 0x4cb   : > { %v1620_v1 = vpop.eup %1619 }
 0x4cc   : > { %v1047_v2 = vpack.c.bf16 %v1620_v1, %v1620_v1  ;;  %v1044_v3 = vsel %vm735_vm9, %v1620_v1, 0.0 }
 0x4cd   : > { %1045 = vadd.xlane.f32.xlu1 %v1044_v3 }
 0x4ce   : > { %1435 = vmatmul.msk.bf16.vlgmr.msra.gmra.mxu0 %vm735_vm9, %v1047_v2 }
 0x4d5   : > { %762 = vadd.xlane.f32.xlu1 %v761_v4 }
 0x520   : > { %v952_v5 = vpop.xlane.xlu2 %951 }
 0x521   : > { %1621 = vrcp.f32 %v952_v5 }
 0x527   : > { %v1622_v6 = vpop.eup %1621 }
 0x530   : > { %v857_v8 = vpop.xlane.xlu0 %856 }
 0x531   : > { %v971_v7 = vpop.f32.mrf.mxu2  ;;  %1623 = vrcp.f32 %v857_v8 }
 0x532   : > { %v976_v9 = vmul.f32 %v1622_v6, %v971_v7 }
 0x534   : > { %1076 = vrot.lane.b32.xlu0 %v976_v9, %s1883_s14  ;;  %s1258_s14 = scalar_lea.sflag [#allocation4], %s2086_s27 }
 0x537   : > { %v1624_v12 = vpop.eup %1623 }
 0x539   : > { %v973_v10 = vpop.f32.mrf.mxu2 }
 0x53b   : > { %v877_v13 = vpop.f32.mrf.mxu0 }
 0x53c   : > { %v882_v14 = vmul.f32 %v1624_v12, %v877_v13 }
 0x53e   : > { %1072 = vrot.lane.b32.xlu1 %v882_v14, %s1876_s24 }
 0x540   : > { %v1046_v28 = vpop.xlane.xlu1 %1045 }
 0x541   : > { %1625 = vrcp.f32 %v1046_v28 }
 0x543   : > { %v879_v15 = vpop.f32.mrf.mxu0 }
 0x547   : > { %v1626_v17 = vpop.eup %1625 }
 0x548   : > { %v763_v22 = vpop.xlane.xlu1 %762 }
 0x549   : > { %1627 = vrcp.f32 %v763_v22 }
 0x54b   : > { %v1065_v18 = vpop.f32.mrf.mxu0 }
 0x54c   : > { %v1070_v19 = vmul.f32 %v1626_v17, %v1065_v18 }
 0x54e   : > { %1080 = vrot.lane.b32.xlu0 %v1070_v19, %s1884_s22  ;;  %s1799_s22 = sshra.s32 %s1273_s2, 4  ;;  %s1800_s22 = int_to_ptr.hbm [resolvable:$true] %s1799_s22 }
 0x54f   : > { %v1628_v23 = vpop.eup %1627  ;;  %s1801_s3 = scalar_lea.hbm %s1800_s22, 8  ;;  %p1806_p7 = scmp.lt.s32.totalorder %s1800_s22, %s2389_s21 }
 0x550   : > { %v787_v26 = vmul.f32 %v1628_v23, %v2267_v35  ;;  %p1802_p1 = scmp.ne.s32.totalorder %s1800_s22, %s1801_s3  ;;  %p1807_p8 = scmp.lt.s32.totalorder %s1805_s23, %s1801_s3 }
 0x552   : > { %p1803_p4 = pnand %p1802_p1, %p2055_p5  ;;  %p1808_p9 = por %p1807_p8, %p1806_p7 }
 0x553   : > { %v1067_v20 = vpop.f32.mrf.mxu0 }
 0x554   : > { %p1804_p12 = pneg %p1803_p4 }
 0x556   : > { %p1809_p10 = pnand %p1808_p9, %p1804_p12 }
 0x5a6   : > { %v1077_v24 = vpop.permute.xlu0 %1076 }
 0x5b0   : > { %v1073_v25 = vpop.permute.xlu1 %1072 }
 0x5b1   : > { %v1083_v27 = vsel %vm735_vm9, %v787_v26, %v1073_v25 }
 0x5b2   : > { %v1085_v30 = vsel %vm1084_vm12, %v1083_v27, %v1077_v24 }
 0x5c0   : > { %v1081_v29 = vpop.permute.xlu0 %1080 }
 0x5c1   : > { %v1087_v33 = vsel %vm1086_vm13, %v1085_v30, %v1081_v29 }
 0x5c2   : > { %v1088_v34 = vpack.c.bf16 %v1087_v33, %v1087_v33 }
 0x5c4   : > { %1444 = vmatmul.msk.bf16.vlgmr.msra.gmra.mxu1 %vm570_vm0, %v1088_v34 }
 0x641   : > { %v1121_v38 = vpop.f32.mrf.mxu1 }
 0x642   : > { %v1122_v39 = vadd.f32 %v1605_v37, %v1121_v38 }
 0x644   : > { %v1125_v40 = vadd.f32 %v1122_v39, %v2185_v56 }
 0x646   : > { %v1127_v41 = vmul.f32 %v1125_v40, %v1125_v40 }
 0x648   : > { %v1128_v35 = vsel %vm570_vm0, %v1127_v41, 0.0 }
 0x649   : > { %v1123_v42 = vpop.f32.mrf.mxu1  ;;  %1129 = vadd.xlane.f32.xlu2 %v1128_v35 }
 0x6bc   : > { %v1130_v45 = vpop.xlane.xlu2 %1129 }
 0x6bd   : > { %v1131_v46 = vmul.f32 %v1130_v45, %v2116_v11  ;;  %v1486_v11 = vld [vmem:[%s2362_s13 + $0x18] sm:$0xff] }
 0x6be   : > { %1247 = vmatpush.bf16.msrb.mxu3 %v1486_v11 }
 0x6bf   : > { %v1132_v31 = vadd.f32 1e-06, %v1131_v46 }
 0x6c1   : > { %1629 = vrsqrt.f32 %v1132_v31  ;;  %vm1139_vm15 = vweird.f32 %v1132_v31 }
 0x6c2   : > { %1248 = vmatpush.bf16.msrb.mxu3 %v1485_v57 }
 0x6c6   : > { %1249 = vmatpush.bf16.msrb.mxu3 %v1484_v58 }
 0x6c7   : > { %v1630_v47 = vpop.eup %1629 }
 0x6c8   : > { %v1134_v48 = vmul.f32 %v1630_v47, %v1132_v31  ;;  %vm1140_vm14 = vweird.f32 %v1630_v47 }
 0x6c9   : > { %vm1141_vm1 = vmor %vm1139_vm15, %vm1140_vm14 }
 0x6ca   : > { %v1135_v49 = vmul.f32 %v1630_v47, %v1134_v48  ;;  %1250 = vmatpush.bf16.msrb.mxu3 %v1483_v0 }
 0x6cc   : > { %v1136_v36 = vmul.f32 0.5, %v1135_v49 }
 0x6ce   : > { %v1137_v50 = vsub.f32 1.5, %v1136_v36 }
 0x6d0   : > { %v1138_v56 = vmul.f32 %v1630_v47, %v1137_v50 }
 0x6d2   : > { %v1142_v53 = vsel %vm1141_vm1, %v1630_v47, %v1138_v56 }
 0x6d3   : > { %v1143_v54 = vmul.f32 %v1142_v53, %v1125_v40 }
 0x6d5   : > { %v1147_v55 = vmul.f32 %v1606_v51, %v1143_v54 }
 0x6d7   : > { %v1148_v52 = vpack.c.bf16 %v1147_v55, %v1147_v55 }
 0x6d9   : > { %1453 = vmatmul.msk.bf16.vlgmr.msra.gmra.mxu2 %vm570_vm0, %v1148_v52 }
 0x75c   : > { %v1177_v59 = vpop.f32.mrf.mxu2 }
 0x75d   : > { %1202 = vrot.lane.b32.xlu1 %v1177_v59, %s1892_s26  ;;  %v1181_v16 = vsub.f32 0.0, %v1177_v59 }
 0x75f   : > { %v1182_v61 = vmul.f32 1.442695, %v1181_v16 }
 0x761   : > { %1631 = vpow2.f32 %v1182_v61 }
 0x764   : > { %v1179_v60 = vpop.f32.mrf.mxu2 }
 0x767   : > { %v1632_v62 = vpop.eup %1631 }
 0x768   : > { %v1184_v63 = vadd.f32 1.0, %v1632_v62 }
 0x76a   : > { %1633 = vrcp.f32 %v1184_v63  ;;  %v1196_v6 = vand.u32 2147483648, %v1184_v63  ;;  %vm1190_vm3 = vweird.f32 %v1184_v63  ;;  %v1194_v7 = vand.u32 2147483647, %v1184_v63 }
 0x76c   : > { %v1197_v9 = vor.u32 1.1754944e-38, %v1196_v6  ;;  %vm1195_vm5 = vcmp.eq.f32.partialorder %v1194_v7, 8.507059e+37 }
 0x770   : > { %v1634_v1 = vpop.eup %1633 }
 0x771   : > { %v1186_v2 = vmul.f32 %v1634_v1, %v1184_v63  ;;  %vm1191_vm2 = vweird.f32 %v1634_v1 }
 0x772   : > { %vm1192_vm4 = vmor %vm1190_vm3, %vm1191_vm2 }
 0x773   : > { %v1187_v3 = vsub.f32 1.0, %v1186_v2 }
 0x775   : > { %v1188_v4 = vmul.f32 %v1634_v1, %v1187_v3 }
 0x777   : > { %v1189_v5 = vadd.f32 %v1634_v1, %v1188_v4 }
 0x779   : > { %v1193_v8 = vsel %vm1192_vm4, %v1634_v1, %v1189_v5 }
 0x77a   : > { %v1198_v10 = vsel %vm1195_vm5, %v1197_v9, %v1193_v8 }
 0x77b   : > { %v1200_v12 = vmul.f32 %v1198_v10, %v1177_v59 }
 0x7cf   : > { %v1203_v13 = vpop.permute.xlu1 %1202 }
 0x7d0   : > { %v1205_v14 = vmul.f32 %v1203_v13, %v1200_v12 }
 0x7d2   : > { %v1206_v28 = vpack.c.bf16 %v1205_v14, %v1205_v14 }
 0x7d4   : > { %1470 = vmatmul.msk.bf16.vlgmr.msrb.gmra.mxu3 %vm1239_vm6, %v1206_v28 }
 0x857   : > { %v1252_v15 = vpop.f32.mrf.mxu3 }
 0x858   : > { %v1253_v17 = vadd.f32 %v1252_v15, %v1147_v55 }
 0x85a   : > { %1256 = vst.msk [vmem:[%s559_s19] sm:$0xff] %vm570_vm0, %v1253_v17 }
 0x85b   : > { %1812 = shalt.err (!%p1809_p10)
}
 0x85c   : > { %1505 = dma.vmem_to_hbm [thread:$0]  (%p2055_p5), %s1271_s25, 128, %s1273_s2, %s1258_s14  }
 0x85f   : > { %v1254_v18 = vpop.f32.mrf.mxu3 }
 0x860 PF: > { %s1284_s12 = sand.u32 1, %s1847_s29   ;;  %p2391_p13 = scmp.ge.s32.totalorder %s1859_s16, 2 }
 0x861   : > { %s1285_s24 = scalar_lea.sflag [#allocation4], %s1284_s12 }
 0x862   : > { %p1525_p11 = pnand %p2391_p13, %p2059_p6 }
 0x864   : > { %p1526_p0 = pneg %p1525_p11 }
 0x866   : > { %1842 = dma.done.wait (%p1526_p0), %s1285_s24, 128  }
 0x867   : > { %1844 = vsyncadd (%p1526_p0), %s1285_s24, 4294967168  ;;  %s2392_s16 = sld [smem:[#allocation17_spill]]  ;;  %s2395_s29 = smov %s1851_s30 }
 0x868   : > { %s2393_s15 = sld [smem:[#allocation16_spill]] }
 0x869   : > { %s2394_s17 = sld [smem:[#allocation18_spill]] }
 0x86d   : > { %p29_p2 = scmp.ge.s32.totalorder %s2392_s16, 4  }
 0x86e   : > { %s2396_s30 = smov %s2393_s15 }
 0x86f   : > { %s2397_s15 = smov %s2394_s17  ;;  %31 = sbr.rel (!%p29_p2) target bundleno = 13 (0xd), region = 140 }
 0x874   :  { %1291 = vsyncpa [#allocation3], 1 }
 0x875   :  { %1293 = vsyncpa [#allocation3 + $0x1], 1 }
 0x876   :  { %1294 = vsyncpa [#allocation6], 1 }
 0x877   :  { %1295 = vsyncpa [#allocation9], 1 }
 0x878   :  { %1296 = vsyncpa [#allocation4], 1 }
 0x879   :  { %1298 = vsyncpa [#allocation4 + $0x1], 1 }

</bundles_post_ra>
